<compile_context>
chip_gen: v7x
topology: tpu7x:2x2x1
jax: 0.10.0
libtpu: 0.0.40
codegen_flags: <defaults>
</compile_context>

<pallas_src>
import functools

import jax
import jax.numpy as jnp
from jax.experimental import pallas as pl
from jax.experimental.pallas import tpu as pltpu

GENE_NUMBER = 978
DRUG_NUMBER = 166

LANE = 128
DRUG_PAD = 256    # 166 -> 2 * 128
GENE_PAD = 1024   # 978 -> 8 * 128


def _round_up(x, m):
    return (x + m - 1) // m * m


def _pad2d(x, rows, cols):
    return jnp.pad(x, ((0, rows - x.shape[0]), (0, cols - x.shape[1])))


@functools.lru_cache(maxsize=1)
def _is_v7x():
    try:
        return "v7" in jax.devices()[0].device_kind.lower()
    except Exception:
        return False


def _state_transition_kernel(
    drug_ref, ccl_ref,
    w1_ref, b1_ref,            # encoder layer1: (256,256), (1,256)
    w2_ref, b2_ref,            # encoder layer2: (1024,1024), (1,1024)
    w5d_ref, w5c_ref, b5_ref,  # decoder layer1 split: (256,Hp), (1024,Hp), (1,Hp)
    w6_ref, b6_ref,            # decoder layer2: (Hp,1024), (1,1024)
    out_ref,
):
    # Encoder branch 1: sigmoid(drug @ W1 + b1)   (f32 accumulation)
    a1 = jax.nn.sigmoid(
        jnp.dot(drug_ref[...], w1_ref[...], preferred_element_type=jnp.float32)
        + b1_ref[...]
    )
    # Encoder branch 2: sigmoid(ccl @ W2 + b2)
    a2 = jax.nn.sigmoid(
        jnp.dot(ccl_ref[...], w2_ref[...], preferred_element_type=jnp.float32)
        + b2_ref[...]
    )

    # Decoder layer 1 (concat folded into two matmuls)
    pre = (
        jnp.dot(a1.astype(w5d_ref.dtype), w5d_ref[...],
                preferred_element_type=jnp.float32)
        + jnp.dot(a2.astype(w5c_ref.dtype), w5c_ref[...],
                  preferred_element_type=jnp.float32)
        + b5_ref[...]
    )
    r = jax.nn.sigmoid(pre)

    # Decoder layer 2 (no activation)
    out_ref[...] = (
        jnp.dot(r.astype(w6_ref.dtype), w6_ref[...],
                preferred_element_type=jnp.float32)
        + b6_ref[...]
    ).astype(out_ref.dtype)


def prepare_params(params, compute_dtype=jnp.bfloat16):
    """One-time weight prep: zero-pad to lane-dense shapes + cast MXU operands.

    Zero pad rows/cols keep the math exact (padded sigmoid(0)=0.5 activations
    only ever multiply zero-valued weight rows). Biases stay f32 (added after
    the f32-accumulated matmul).
    """
    hidden = params["w5d"].shape[1]
    hidden_pad = _round_up(hidden, LANE)
    cd = compute_dtype
    return {
        "w1": _pad2d(params["w1"], DRUG_PAD, DRUG_PAD).astype(cd),
        "b1": _pad2d(params["b1"], 1, DRUG_PAD).astype(jnp.float32),
        "w2": _pad2d(params["w2"], GENE_PAD, GENE_PAD).astype(cd),
        "b2": _pad2d(params["b2"], 1, GENE_PAD).astype(jnp.float32),
        "w5d": _pad2d(params["w5d"], DRUG_PAD, hidden_pad).astype(cd),
        "w5c": _pad2d(params["w5c"], GENE_PAD, hidden_pad).astype(cd),
        "b5": _pad2d(params["b5"], 1, hidden_pad).astype(jnp.float32),
        "w6": _pad2d(params["w6"], hidden_pad, GENE_PAD).astype(cd),
        "b6": _pad2d(params["b6"], 1, GENE_PAD).astype(jnp.float32),
    }


@functools.partial(jax.jit, static_argnames=("bm",))
def state_transition_forward(drug, ccl, prepared, bm=None):
    """drug: (B, 166) f32, ccl: (B, 978) f32 -> (B, 978) f32."""
    B = drug.shape[0]
    cd = prepared["w1"].dtype                 # compute dtype (bf16 or f32)
    isz = cd.itemsize
    hidden_pad = prepared["w5d"].shape[1]

    # ---- batch tiling -------------------------------------------------------
    sub = 16 if isz == 2 else 8               # bf16 packs 2 rows / sublane
    B_pad = _round_up(max(B, sub), sub)
    if bm is None:
        if B_pad < 64:
            bm = B_pad                        # single grid step, single tile
        else:
            # >= 2 tiles so both v7x TensorCores get work; bigger tiles on
            # single-TC v5e/v6e to amortize per-step overhead.
            cap = 256 if _is_v7x() else 512
            bm = max(sub, min(cap, _round_up(pl.cdiv(B_pad, 2), sub)))
    B_pad = _round_up(B_pad, bm)              # full, unmasked tiles only
    grid = (B_pad // bm,)

    # ---- per-call input padding (weights were prepared once) ----------------
    drug_p = _pad2d(drug, B_pad, DRUG_PAD).astype(cd)
    ccl_p = _pad2d(ccl, B_pad, GENE_PAD).astype(cd)

    def weight_spec(shape):
        # constant index_map -> DMA'd once; single-buffered to save VMEM
        return pl.BlockSpec(shape, lambda i: (0,) * len(shape),
                            pipeline_mode=pl.Buffered(1))

    # ---- VMEM limit: weights once, double-buffered I/O, f32 temporaries -----
    weight_bytes = (DRUG_PAD * DRUG_PAD + GENE_PAD * GENE_PAD
                    + (DRUG_PAD + GENE_PAD) * hidden_pad
                    + hidden_pad * GENE_PAD) * isz
    bias_bytes = (DRUG_PAD + 2 * GENE_PAD + hidden_pad) * 4
    io_bytes = 2 * bm * (DRUG_PAD + GENE_PAD) * isz + 2 * bm * GENE_PAD * 4
    tmp_bytes = bm * (DRUG_PAD + 2 * GENE_PAD + hidden_pad) * 4  # a1, a2, pre/r, out
    vmem_limit = weight_bytes + bias_bytes + io_bytes + tmp_bytes + (4 << 20)
    vmem_limit = max(vmem_limit, 32 << 20)    # never below the scoped default
    vmem_limit = int(min(vmem_limit, (60 << 20) if _is_v7x() else (100 << 20)))

    cost = pl.CostEstimate(
        flops=int(2 * B_pad * (DRUG_PAD * DRUG_PAD
                               + GENE_PAD * GENE_PAD
                               + (DRUG_PAD + GENE_PAD) * hidden_pad
                               + hidden_pad * GENE_PAD)),
        transcendentals=int(B_pad * (DRUG_PAD + GENE_PAD + hidden_pad)),
        bytes_accessed=int(weight_bytes + bias_bytes
                           + B_pad * (DRUG_PAD + GENE_PAD) * isz   # inputs
                           + B_pad * GENE_PAD * 4),                # output write
    )

    out_padded = pl.pallas_call(
        _state_transition_kernel,
        out_shape=jax.ShapeDtypeStruct((B_pad, GENE_PAD), jnp.float32),
        grid_spec=pltpu.PrefetchScalarGridSpec(
            num_scalar_prefetch=0,
            grid=grid,
            in_specs=[
                pl.BlockSpec((bm, DRUG_PAD), lambda i: (i, 0)),
                pl.BlockSpec((bm, GENE_PAD), lambda i: (i, 0)),
                weight_spec((DRUG_PAD, DRUG_PAD)),
                weight_spec((1, DRUG_PAD)),
                weight_spec((GENE_PAD, GENE_PAD)),
                weight_spec((1, GENE_PAD)),
                weight_spec((DRUG_PAD, hidden_pad)),
                weight_spec((GENE_PAD, hidden_pad)),
                weight_spec((1, hidden_pad)),
                weight_spec((hidden_pad, GENE_PAD)),
                weight_spec((1, GENE_PAD)),
            ],
            out_specs=pl.BlockSpec((bm, GENE_PAD), lambda i: (i, 0)),
        ),
        compiler_params=pltpu.CompilerParams(
            dimension_semantics=("parallel",),
            vmem_limit_bytes=vmem_limit,
        ),
        cost_estimate=cost,
    )(drug_p, ccl_p,
      prepared["w1"], prepared["b1"],
      prepared["w2"], prepared["b2"],
      prepared["w5d"], prepared["w5c"], prepared["b5"],
      prepared["w6"], prepared["b6"])

    return out_padded[:B, :GENE_NUMBER]


def init_params(key, hidden_size):
    """Deterministic synthetic params, PyTorch nn.Linear-style uniform init.

    Stored pre-transposed as (in_features, out_features); decoder layer-1
    weight is split into its drug (first 166 inputs) and ccl (next 978) halves.
    """
    ks = jax.random.split(key, 8)

    def linear(kw, kb, fan_in, fan_out):
        bound = 1.0 / jnp.sqrt(jnp.float32(fan_in))
        w = jax.random.uniform(kw, (fan_in, fan_out), jnp.float32, -bound, bound)
        b = jax.random.uniform(kb, (1, fan_out), jnp.float32, -bound, bound)
        return w, b

    w1, b1 = linear(ks[0], ks[1], DRUG_NUMBER, DRUG_NUMBER)
    w2, b2 = linear(ks[2], ks[3], GENE_NUMBER, GENE_NUMBER)
    w5, b5 = linear(ks[4], ks[5], DRUG_NUMBER + GENE_NUMBER, hidden_size)
    w6, b6 = linear(ks[6], ks[7], hidden_size, GENE_NUMBER)

    return {
        "w1": w1, "b1": b1,
        "w2": w2, "b2": b2,
        "w5d": w5[:DRUG_NUMBER, :],   # concat -> split decoder weight
        "w5c": w5[DRUG_NUMBER:, :],
        "b5": b5,
        "w6": w6, "b6": b6,
    }


def reference_forward(drug, ccl, params):
    a1 = jax.nn.sigmoid(drug @ params["w1"] + params["b1"])
    a2 = jax.nn.sigmoid(ccl @ params["w2"] + params["b2"])
    pre = a1 @ params["w5d"] + a2 @ params["w5c"] + params["b5"]
    r = jax.nn.sigmoid(pre)
    return r @ params["w6"] + params["b6"]


# TODO(synk): optional v6e-only int8 quantization of W2/W6 (2x bf16 MXU rate,
# halves weight DMA again) is not implemented; not portable to v7x (fp8 MXU).

if __name__ == "__main__":
    key = jax.random.PRNGKey(0)
    k_drug, k_ccl, k_params = jax.random.split(key, 3)

    batch = 8
    hidden_size = 32

    drug = jax.random.normal(k_drug, (batch, DRUG_NUMBER), jnp.float32)
    ccl = jax.random.normal(k_ccl, (batch, GENE_NUMBER), jnp.float32)
    params = init_params(k_params, hidden_size)
    ref = reference_forward(drug, ccl, params)

    # f32 compute path: the concat-split / zero-pad algebra is exact.
    prep_f32 = prepare_params(params, compute_dtype=jnp.float32)
    out_f32 = jax.block_until_ready(state_transition_forward(drug, ccl, prep_f32))
    assert out_f32.shape == (batch, GENE_NUMBER)
    assert jnp.allclose(out_f32, ref, atol=1e-4, rtol=1e-4)

    # Default bf16 MXU-operand path (f32 accumulation) -> relaxed tolerance.
    prep_bf16 = prepare_params(params)
    out_bf16 = jax.block_until_ready(state_transition_forward(drug, ccl, prep_bf16))
    assert out_bf16.shape == (batch, GENE_NUMBER)
    assert jnp.allclose(out_bf16, ref, atol=3e-2, rtol=3e-2)

    print("KERNEL_OK")
</pallas_src>

<mosaic_0001>
module attributes {stable_mosaic.version = 11 : i64} {
  func.func @_state_transition_kernel(%arg0: i32, %arg1: memref<8x256xf32, #tpu.memory_space<vmem>>, %arg2: memref<8x1024xf32, #tpu.memory_space<vmem>>, %arg3: memref<256x256xf32, #tpu.memory_space<vmem>>, %arg4: memref<1x256xf32, #tpu.memory_space<vmem>>, %arg5: memref<1024x1024xf32, #tpu.memory_space<vmem>>, %arg6: memref<1x1024xf32, #tpu.memory_space<vmem>>, %arg7: memref<256x128xf32, #tpu.memory_space<vmem>>, %arg8: memref<1024x128xf32, #tpu.memory_space<vmem>>, %arg9: memref<1x128xf32, #tpu.memory_space<vmem>>, %arg10: memref<128x1024xf32, #tpu.memory_space<vmem>>, %arg11: memref<1x1024xf32, #tpu.memory_space<vmem>>, %arg12: memref<8x1024xf32, #tpu.memory_space<vmem>>) attributes {dimension_semantics = [#tpu.dimension_semantics<parallel>], iteration_bounds = array<i64: 1>, scalar_prefetch = 0 : i64, scratch_operands = 0 : i64, tpu.core_type = #tpu.core_type<tc>, window_params = [{transform_indices = @transform_0, window_bounds = array<i64: 8, 256>}, {transform_indices = @transform_1, window_bounds = array<i64: 8, 1024>}, {pipeline_mode = #tpu.pipeline_mode<synchronous>, transform_indices = @transform_2, window_bounds = array<i64: 256, 256>}, {pipeline_mode = #tpu.pipeline_mode<synchronous>, transform_indices = @transform_3, window_bounds = array<i64: 1, 256>}, {pipeline_mode = #tpu.pipeline_mode<synchronous>, transform_indices = @transform_4, window_bounds = array<i64: 1024, 1024>}, {pipeline_mode = #tpu.pipeline_mode<synchronous>, transform_indices = @transform_5, window_bounds = array<i64: 1, 1024>}, {pipeline_mode = #tpu.pipeline_mode<synchronous>, transform_indices = @transform_6, window_bounds = array<i64: 256, 128>}, {pipeline_mode = #tpu.pipeline_mode<synchronous>, transform_indices = @transform_7, window_bounds = array<i64: 1024, 128>}, {pipeline_mode = #tpu.pipeline_mode<synchronous>, transform_indices = @transform_8, window_bounds = array<i64: 1, 128>}, {pipeline_mode = #tpu.pipeline_mode<synchronous>, transform_indices = @transform_9, window_bounds = array<i64: 128, 1024>}, {pipeline_mode = #tpu.pipeline_mode<synchronous>, transform_indices = @transform_10, window_bounds = array<i64: 1, 1024>}, {transform_indices = @transform_11, window_bounds = array<i64: 8, 1024>}]} {
    %c0 = arith.constant 0 : index
    %c0_0 = arith.constant 0 : index
    %0 = vector.load %arg1[%c0, %c0_0] : memref<8x256xf32, #tpu.memory_space<vmem>>, vector<8x256xf32>
    %c0_1 = arith.constant 0 : index
    %c0_2 = arith.constant 0 : index
    %1 = vector.load %arg3[%c0_1, %c0_2] : memref<256x256xf32, #tpu.memory_space<vmem>>, vector<256x256xf32>
    %cst = arith.constant dense<0.000000e+00> : vector<8x256xf32>
    %2 = tpu.matmul %0, %1, %cst {dimension_numbers = #tpu.dot_dimension_numbers<[1], [0], [0], [1], [0, 0, 1, 1], [], []>} : vector<8x256xf32>, vector<256x256xf32>, vector<8x256xf32> -> vector<8x256xf32>
    %c0_3 = arith.constant 0 : index
    %c0_4 = arith.constant 0 : index
    %3 = vector.load %arg4[%c0_3, %c0_4] : memref<1x256xf32, #tpu.memory_space<vmem>>, vector<1x256xf32>
    %4 = vector.broadcast %3 : vector<1x256xf32> to vector<8x256xf32>
    %5 = arith.addf %2, %4 : vector<8x256xf32>
    %6 = arith.negf %5 : vector<8x256xf32>
    %7 = math.exp %6 : vector<8x256xf32>
    %cst_5 = arith.constant 1.000000e+00 : f32
    %8 = vector.broadcast %cst_5 : f32 to vector<8x256xf32>
    %9 = arith.addf %8, %7 : vector<8x256xf32>
    %10 = arith.divf %8, %9 : vector<8x256xf32>
    %c0_6 = arith.constant 0 : index
    %c0_7 = arith.constant 0 : index
    %11 = vector.load %arg2[%c0_6, %c0_7] : memref<8x1024xf32, #tpu.memory_space<vmem>>, vector<8x1024xf32>
    %c0_8 = arith.constant 0 : index
    %c0_9 = arith.constant 0 : index
    %12 = vector.load %arg5[%c0_8, %c0_9] : memref<1024x1024xf32, #tpu.memory_space<vmem>>, vector<1024x1024xf32>
    %cst_10 = arith.constant dense<0.000000e+00> : vector<8x1024xf32>
    %13 = tpu.matmul %11, %12, %cst_10 {dimension_numbers = #tpu.dot_dimension_numbers<[1], [0], [0], [1], [0, 0, 1, 1], [], []>} : vector<8x1024xf32>, vector<1024x1024xf32>, vector<8x1024xf32> -> vector<8x1024xf32>
    %c0_11 = arith.constant 0 : index
    %c0_12 = arith.constant 0 : index
    %14 = vector.load %arg6[%c0_11, %c0_12] : memref<1x1024xf32, #tpu.memory_space<vmem>>, vector<1x1024xf32>
    %15 = vector.broadcast %14 : vector<1x1024xf32> to vector<8x1024xf32>
    %16 = arith.addf %13, %15 : vector<8x1024xf32>
    %17 = arith.negf %16 : vector<8x1024xf32>
    %18 = math.exp %17 : vector<8x1024xf32>
    %cst_13 = arith.constant 1.000000e+00 : f32
    %19 = vector.broadcast %cst_13 : f32 to vector<8x1024xf32>
    %20 = arith.addf %19, %18 : vector<8x1024xf32>
    %21 = arith.divf %19, %20 : vector<8x1024xf32>
    %c0_14 = arith.constant 0 : index
    %c0_15 = arith.constant 0 : index
    %22 = vector.load %arg7[%c0_14, %c0_15] : memref<256x128xf32, #tpu.memory_space<vmem>>, vector<256x128xf32>
    %cst_16 = arith.constant dense<0.000000e+00> : vector<8x128xf32>
    %23 = tpu.matmul %10, %22, %cst_16 {dimension_numbers = #tpu.dot_dimension_numbers<[1], [0], [0], [1], [0, 0, 1, 1], [], []>} : vector<8x256xf32>, vector<256x128xf32>, vector<8x128xf32> -> vector<8x128xf32>
    %c0_17 = arith.constant 0 : index
    %c0_18 = arith.constant 0 : index
    %24 = vector.load %arg8[%c0_17, %c0_18] : memref<1024x128xf32, #tpu.memory_space<vmem>>, vector<1024x128xf32>
    %cst_19 = arith.constant dense<0.000000e+00> : vector<8x128xf32>
    %25 = tpu.matmul %21, %24, %cst_19 {dimension_numbers = #tpu.dot_dimension_numbers<[1], [0], [0], [1], [0, 0, 1, 1], [], []>} : vector<8x1024xf32>, vector<1024x128xf32>, vector<8x128xf32> -> vector<8x128xf32>
    %26 = arith.addf %23, %25 : vector<8x128xf32>
    %c0_20 = arith.constant 0 : index
    %c0_21 = arith.constant 0 : index
    %27 = vector.load %arg9[%c0_20, %c0_21] : memref<1x128xf32, #tpu.memory_space<vmem>>, vector<1x128xf32>
    %28 = vector.broadcast %27 : vector<1x128xf32> to vector<8x128xf32>
    %29 = arith.addf %26, %28 : vector<8x128xf32>
    %30 = arith.negf %29 : vector<8x128xf32>
    %31 = math.exp %30 : vector<8x128xf32>
    %cst_22 = arith.constant 1.000000e+00 : f32
    %32 = vector.broadcast %cst_22 : f32 to vector<8x128xf32>
    %33 = arith.addf %32, %31 : vector<8x128xf32>
    %34 = arith.divf %32, %33 : vector<8x128xf32>
    %c0_23 = arith.constant 0 : index
    %c0_24 = arith.constant 0 : index
    %35 = vector.load %arg10[%c0_23, %c0_24] : memref<128x1024xf32, #tpu.memory_space<vmem>>, vector<128x1024xf32>
    %cst_25 = arith.constant dense<0.000000e+00> : vector<8x1024xf32>
    %36 = tpu.matmul %34, %35, %cst_25 {dimension_numbers = #tpu.dot_dimension_numbers<[1], [0], [0], [1], [0, 0, 1, 1], [], []>} : vector<8x128xf32>, vector<128x1024xf32>, vector<8x1024xf32> -> vector<8x1024xf32>
    %c0_26 = arith.constant 0 : index
    %c0_27 = arith.constant 0 : index
    %37 = vector.load %arg11[%c0_26, %c0_27] : memref<1x1024xf32, #tpu.memory_space<vmem>>, vector<1x1024xf32>
    %38 = vector.broadcast %37 : vector<1x1024xf32> to vector<8x1024xf32>
    %39 = arith.addf %36, %38 : vector<8x1024xf32>
    %c0_28 = arith.constant 0 : index
    %c0_29 = arith.constant 0 : index
    %40 = vector.load %arg12[%c0_28, %c0_29] : memref<8x1024xf32, #tpu.memory_space<vmem>>, vector<8x1024xf32>
    tpu.vector_store %arg12[%c0_28, %c0_29], %39 {strides = array<i32>} : memref<8x1024xf32, #tpu.memory_space<vmem>>, vector<8x1024xf32>,
    return
  }
  func.func @transform_0(%arg0: i32) -> (i32, i32) {
    %c0_i32 = arith.constant 0 : i32
    %c0_i32_0 = arith.constant 0 : i32
    return %arg0, %c0_i32 : i32, i32
  }
  func.func @transform_1(%arg0: i32) -> (i32, i32) {
    %c0_i32 = arith.constant 0 : i32
    %c0_i32_0 = arith.constant 0 : i32
    return %arg0, %c0_i32 : i32, i32
  }
  func.func @transform_2(%arg0: i32) -> (i32, i32) {
    %c0_i32 = arith.constant 0 : i32
    %c0_i32_0 = arith.constant 0 : i32
    %c0_i32_1 = arith.constant 0 : i32
    return %c0_i32, %c0_i32_0 : i32, i32
  }
  func.func @transform_3(%arg0: i32) -> (i32, i32) {
    %c0_i32 = arith.constant 0 : i32
    %c0_i32_0 = arith.constant 0 : i32
    %c0_i32_1 = arith.constant 0 : i32
    return %c0_i32, %c0_i32_0 : i32, i32
  }
  func.func @transform_4(%arg0: i32) -> (i32, i32) {
    %c0_i32 = arith.constant 0 : i32
    %c0_i32_0 = arith.constant 0 : i32
    %c0_i32_1 = arith.constant 0 : i32
    return %c0_i32, %c0_i32_0 : i32, i32
  }
  func.func @transform_5(%arg0: i32) -> (i32, i32) {
    %c0_i32 = arith.constant 0 : i32
    %c0_i32_0 = arith.constant 0 : i32
    %c0_i32_1 = arith.constant 0 : i32
    return %c0_i32, %c0_i32_0 : i32, i32
  }
  func.func @transform_6(%arg0: i32) -> (i32, i32) {
    %c0_i32 = arith.constant 0 : i32
    %c0_i32_0 = arith.constant 0 : i32
    %c0_i32_1 = arith.constant 0 : i32
    return %c0_i32, %c0_i32_0 : i32, i32
  }
  func.func @transform_7(%arg0: i32) -> (i32, i32) {
    %c0_i32 = arith.constant 0 : i32
    %c0_i32_0 = arith.constant 0 : i32
    %c0_i32_1 = arith.constant 0 : i32
    return %c0_i32, %c0_i32_0 : i32, i32
  }
  func.func @transform_8(%arg0: i32) -> (i32, i32) {
    %c0_i32 = arith.constant 0 : i32
    %c0_i32_0 = arith.constant 0 : i32
    %c0_i32_1 = arith.constant 0 : i32
    return %c0_i32, %c0_i32_0 : i32, i32
  }
  func.func @transform_9(%arg0: i32) -> (i32, i32) {
    %c0_i32 = arith.constant 0 : i32
    %c0_i32_0 = arith.constant 0 : i32
    %c0_i32_1 = arith.constant 0 : i32
    return %c0_i32, %c0_i32_0 : i32, i32
  }
  func.func @transform_10(%arg0: i32) -> (i32, i32) {
    %c0_i32 = arith.constant 0 : i32
    %c0_i32_0 = arith.constant 0 : i32
    %c0_i32_1 = arith.constant 0 : i32
    return %c0_i32, %c0_i32_0 : i32, i32
  }
  func.func @transform_11(%arg0: i32) -> (i32, i32) {
    %c0_i32 = arith.constant 0 : i32
    %c0_i32_0 = arith.constant 0 : i32
    return %arg0, %c0_i32 : i32, i32
  }
}

</mosaic_0001>

<bundles_post_ra>
// kernel: state_transition_forward.1
= control target key start
LH: loop header
LB: loop body
LE: loop exit
PB: predicated region body
PF: predicated region fallthrough
CT: control target
= control target key end

     0   :  { %16 = vsyncpa [#allocation3], 0  ;;  %s5882_s0 = inlined_call_operand.vmem [shape: f32[8,256], index: 0, kind: input, shape index: {}]   ;;  %s5883_s1 = inlined_call_operand.vmem [shape: f32[8,1024], index: 1, kind: input, shape index: {}]   ;;  %s5884_s2 = inlined_call_operand.hbm [shape: f32[256,256], index: 2, kind: input, shape index: {}]   ;;  %s5885_s3 = inlined_call_operand.hbm [shape: f32[1,256], index: 3, kind: input, shape index: {}]   ;;  %s5886_s4 = inlined_call_operand.hbm [shape: f32[1024,1024], index: 4, kind: input, shape index: {}]   ;;  %s5887_s5 = inlined_call_operand.hbm [shape: f32[1,1024], index: 5, kind: input, shape index: {}]   ;;  %s5888_s6 = inlined_call_operand.hbm [shape: f32[256,128], index: 6, kind: input, shape index: {}]   ;;  %s5889_s7 = inlined_call_operand.hbm [shape: f32[1024,128], index: 7, kind: input, shape index: {}]   ;;  %s5890_s8 = inlined_call_operand.hbm [shape: f32[1,128], index: 8, kind: input, shape index: {}]   ;;  %s5891_s9 = inlined_call_operand.hbm [shape: f32[128,1024], index: 9, kind: input, shape index: {}]   ;;  %s5892_s10 = inlined_call_operand.hbm [shape: f32[1,1024], index: 10, kind: input, shape index: {}]   ;;  %s5893_s11 = inlined_call_operand.hbm [shape: f32[8,1024], index: 11, kind: output, shape index: {}]  }
   0x1   :  { %17 = vsyncpa [#allocation6], 0 }
   0x2   :  { %18 = vsyncpa [#allocation9], 0 }
   0x3   :  { %19 = vsyncpa [#allocation12], 0 }
   0x4   :  { %20 = vsyncpa [#allocation15], 0 }
   0x5   :  { %21 = vsyncpa [#allocation4], 0  ;;  %s5474_s17 = smov [#allocation5]   ;;  %s5475_s19 = smov [#allocation8]  }
   0x6   :  { %s44_s18 = sshll.u32 %s5474_s17, 4  ;;  %s66_s20 = sshll.u32 %s5475_s19, 4  ;;  %s45_s18 = int_to_ptr.vmem [resolvable:$true] %s44_s18  ;;  %s67_s20 = int_to_ptr.vmem [resolvable:$true] %s66_s20 }
   0x7   :  { %s5242_s23 = scalar_lea.hbm %s5885_s3, 32 }
   0x8   :  { %p5243_p0 = scmp.ne.s32.totalorder %s5885_s3, %s5242_s23  ;;  %p5246_p1 = scmp.lt.u32.totalorder %s5242_s23, %s5885_s3 }
   0xa   :  { %p5248_p2 = pnand %p5246_p1, %p5243_p0 }
   0xc   :  { %5251 = shalt.err (!%p5248_p2)
}
   0xd   :  { %s5252_s28 = scalar_lea.vmem %s45_s18, 32  ;;  %p5257_p4 = scmp.lt.s32.totalorder %s45_s18, %s45_s18 }
   0xe   :  { %p5253_p3 = scmp.ne.s32.totalorder %s45_s18, %s5252_s28  ;;  %p5258_p5 = scmp.lt.s32.totalorder %s5252_s28, %s5252_s28 }
  0x10   :  { %p5259_p6 = por %p5258_p5, %p5257_p4 }
  0x12   :  { %p5260_p7 = pnand %p5259_p6, %p5253_p3 }
  0x14   :  { %5263 = shalt.err (!%p5260_p7)
}
  0x15   :  { %47 = dma.hbm_to_vmem [thread:$0]  %s5885_s3, 32, %s45_s18, [#allocation6]  }
  0x16   :  { %s5264_s14 = scalar_lea.hbm %s5887_s5, 128 }
  0x17   :  { %p5265_p8 = scmp.ne.s32.totalorder %s5887_s5, %s5264_s14  ;;  %p5268_p9 = scmp.lt.u32.totalorder %s5264_s14, %s5887_s5 }
  0x19   :  { %p5270_p10 = pnand %p5268_p9, %p5265_p8 }
  0x1b   :  { %5273 = shalt.err (!%p5270_p10)
}
  0x1c   :  { %s5274_s21 = scalar_lea.vmem %s67_s20, 128  ;;  %p5279_p12 = scmp.lt.s32.totalorder %s67_s20, %s67_s20 }
  0x1d   :  { %p5275_p11 = scmp.ne.s32.totalorder %s67_s20, %s5274_s21  ;;  %p5280_p13 = scmp.lt.s32.totalorder %s5274_s21, %s5274_s21 }
  0x1f   :  { %p5281_p0 = por %p5280_p13, %p5279_p12 }
  0x21   :  { %p5282_p1 = pnand %p5281_p0, %p5275_p11 }
  0x23   :  { %5285 = shalt.err (!%p5282_p1)
}
  0x24   :  { %69 = dma.hbm_to_vmem [thread:$0]  %s5887_s5, 128, %s67_s20, [#allocation9]  }
  0x25   :  { %s5476_s22 = smov [#allocation11]   ;;  %s5286_s26 = scalar_lea.hbm %s5889_s7, 16384 }
  0x26   :  { %s87_s23 = sshll.u32 %s5476_s22, 4  ;;  %p5287_p2 = scmp.ne.s32.totalorder %s5889_s7, %s5286_s26  ;;  %s88_s23 = int_to_ptr.vmem [resolvable:$true] %s87_s23 }
  0x27   :  { %p5290_p3 = scmp.lt.u32.totalorder %s5286_s26, %s5889_s7 }
  0x29   :  { %p5292_p4 = pnand %p5290_p3, %p5287_p2 }
  0x2b   :  { %5295 = shalt.err (!%p5292_p4)
}
  0x2c   :  { %s5296_s12 = scalar_lea.vmem %s88_s23, 16384  ;;  %p5301_p6 = scmp.lt.s32.totalorder %s88_s23, %s88_s23 }
  0x2d   :  { %p5297_p5 = scmp.ne.s32.totalorder %s88_s23, %s5296_s12  ;;  %p5302_p7 = scmp.lt.s32.totalorder %s5296_s12, %s5296_s12 }
  0x2f   :  { %p5303_p8 = por %p5302_p7, %p5301_p6 }
  0x31   :  { %p5304_p9 = pnand %p5303_p8, %p5297_p5 }
  0x33   :  { %5307 = shalt.err (!%p5304_p9)
}
  0x34   :  { %s5477_s5 = smov 128   ;;  %s5478_s20 = smov 8  }
  0x35   :  { %93 = dma.hbm_to_vmem [thread:$0]  %s5889_s7, 16384, %s88_s23, [#allocation12], %s5477_s5, %s5477_s5, %s5478_s20  }
  0x36   :  { %s5479_s15 = smov [#allocation14]   ;;  %s5480_s17 = smov [#allocation2]  }
  0x37   :  { %s109_s16 = sshll.u32 %s5479_s15, 4  ;;  %s31_s19 = sshll.u32 %s5480_s17, 4  ;;  %s110_s16 = int_to_ptr.vmem [resolvable:$true] %s109_s16  ;;  %s32_s19 = int_to_ptr.vmem [resolvable:$true] %s31_s19 }
  0x38   :  { %s5308_s18 = scalar_lea.hbm %s5891_s9, 16384 }
  0x39   :  { %p5309_p10 = scmp.ne.s32.totalorder %s5891_s9, %s5308_s18  ;;  %p5312_p11 = scmp.lt.u32.totalorder %s5308_s18, %s5891_s9 }
  0x3b   :  { %p5314_p12 = pnand %p5312_p11, %p5309_p10 }
  0x3d   :  { %5317 = shalt.err (!%p5314_p12)
}
  0x3e   :  { %s5318_s7 = scalar_lea.vmem %s110_s16, 16384  ;;  %p5323_p0 = scmp.lt.s32.totalorder %s110_s16, %s110_s16 }
  0x3f   :  { %p5319_p13 = scmp.ne.s32.totalorder %s110_s16, %s5318_s7  ;;  %p5324_p1 = scmp.lt.s32.totalorder %s5318_s7, %s5318_s7 }
  0x41   :  { %p5325_p2 = por %p5324_p1, %p5323_p0 }
  0x43   :  { %p5326_p3 = pnand %p5325_p2, %p5319_p13 }
  0x45   :  { %5329 = shalt.err (!%p5326_p3)
}
  0x46   :  { %s5481_s23 = smov 1024   ;;  %s5482_s27 = smov 64  }
  0x47   :  { %115 = dma.hbm_to_vmem [thread:$0]  %s5891_s9, 16384, %s110_s16, [#allocation15], %s5481_s23, %s5481_s23, %s5482_s27  }
  0x48   :  { %s5330_s13 = scalar_lea.hbm %s5884_s2, 8192 }
  0x49   :  { %p5331_p4 = scmp.ne.s32.totalorder %s5884_s2, %s5330_s13  ;;  %p5334_p5 = scmp.lt.u32.totalorder %s5330_s13, %s5884_s2 }
  0x4b   :  { %p5336_p6 = pnand %p5334_p5, %p5331_p4 }
  0x4d   :  { %5339 = shalt.err (!%p5336_p6)
}
  0x4e   :  { %s5340_s3 = scalar_lea.vmem %s32_s19, 8192  ;;  %p5345_p8 = scmp.lt.s32.totalorder %s32_s19, %s32_s19 }
  0x4f   :  { %p5341_p7 = scmp.ne.s32.totalorder %s32_s19, %s5340_s3  ;;  %p5346_p9 = scmp.lt.s32.totalorder %s5340_s3, %s5340_s3 }
  0x51   :  { %p5347_p10 = por %p5346_p9, %p5345_p8 }
  0x53   :  { %p5348_p11 = pnand %p5347_p10, %p5341_p7 }
  0x55   :  { %5351 = shalt.err (!%p5348_p11)
}
  0x56   :  { %s5483_s9 = smov 256   ;;  %s5484_s16 = smov 16  }
  0x57   :  { %37 = dma.hbm_to_vmem [thread:$0]  %s5884_s2, 8192, %s32_s19, [#allocation3], %s5483_s9, %s5483_s9, %s5484_s16  }
  0x58   :  { %s5485_s24 = smov [#allocation7]   ;;  %s5486_s26 = smov [#allocation10]  }
  0x59   :  { %s53_s25 = sshll.u32 %s5485_s24, 4  ;;  %s75_s7 = sshll.u32 %s5486_s26, 4  ;;  %s54_s25 = int_to_ptr.vmem [resolvable:$true] %s53_s25  ;;  %s76_s7 = int_to_ptr.vmem [resolvable:$true] %s75_s7 }
  0x5a   :  { %s5352_s30 = scalar_lea.hbm %s5886_s4, 131072 }
  0x5b   :  { %p5353_p12 = scmp.ne.s32.totalorder %s5886_s4, %s5352_s30  ;;  %p5356_p13 = scmp.lt.u32.totalorder %s5352_s30, %s5886_s4 }
  0x5d   :  { %p5358_p0 = pnand %p5356_p13, %p5353_p12 }
  0x5f   :  { %5361 = shalt.err (!%p5358_p0)
}
  0x60   :  { %s5362_s2 = scalar_lea.vmem %s54_s25, 131072  ;;  %p5367_p2 = scmp.lt.s32.totalorder %s54_s25, %s54_s25 }
  0x61   :  { %p5363_p1 = scmp.ne.s32.totalorder %s54_s25, %s5362_s2  ;;  %p5368_p3 = scmp.lt.s32.totalorder %s5362_s2, %s5362_s2 }
  0x63   :  { %p5369_p4 = por %p5368_p3, %p5367_p2 }
  0x65   :  { %p5370_p5 = pnand %p5369_p4, %p5363_p1 }
  0x67   :  { %5373 = shalt.err (!%p5370_p5)
}
  0x68   :  { %59 = dma.hbm_to_vmem [thread:$0]  %s5886_s4, 131072, %s54_s25, [#allocation6], %s5481_s23, %s5481_s23, %s5482_s27  }
  0x69   :  { %s5374_s9 = scalar_lea.hbm %s5888_s6, 4096 }
  0x6a   :  { %p5375_p6 = scmp.ne.s32.totalorder %s5888_s6, %s5374_s9  ;;  %p5378_p7 = scmp.lt.u32.totalorder %s5374_s9, %s5888_s6 }
  0x6c   :  { %p5380_p8 = pnand %p5378_p7, %p5375_p6 }
  0x6e   :  { %5383 = shalt.err (!%p5380_p8)
}
  0x6f   :  { %s5384_s26 = scalar_lea.vmem %s76_s7, 4096  ;;  %p5389_p10 = scmp.lt.s32.totalorder %s76_s7, %s76_s7 }
  0x70   :  { %p5385_p9 = scmp.ne.s32.totalorder %s76_s7, %s5384_s26  ;;  %p5390_p11 = scmp.lt.s32.totalorder %s5384_s26, %s5384_s26 }
  0x72   :  { %p5391_p12 = por %p5390_p11, %p5389_p10 }
  0x74   :  { %p5392_p13 = pnand %p5391_p12, %p5385_p9 }
  0x76   :  { %5395 = shalt.err (!%p5392_p13)
}
  0x77   :  { %81 = dma.hbm_to_vmem [thread:$0]  %s5888_s6, 4096, %s76_s7, [#allocation9], %s5477_s5, %s5477_s5, %s5478_s20  }
  0x78   :  { %s5487_s27 = smov [#allocation13]   ;;  %s5488_s28 = smov [#allocation16]  }
  0x79   :  { %s100_s25 = sshll.u32 %s5487_s27, 4  ;;  %s122_s29 = sshll.u32 %s5488_s28, 4  ;;  %s101_s25 = int_to_ptr.vmem [resolvable:$true] %s100_s25  ;;  %s123_s29 = int_to_ptr.vmem [resolvable:$true] %s122_s29 }
  0x7a   :  { %s5396_s13 = scalar_lea.hbm %s5890_s8, 16 }
  0x7b   :  { %p5397_p0 = scmp.ne.s32.totalorder %s5890_s8, %s5396_s13  ;;  %p5400_p1 = scmp.lt.u32.totalorder %s5396_s13, %s5890_s8 }
  0x7d   :  { %p5402_p2 = pnand %p5400_p1, %p5397_p0 }
  0x7f   :  { %5405 = shalt.err (!%p5402_p2)
}
  0x80   :  { %s5406_s6 = scalar_lea.vmem %s101_s25, 16  ;;  %s5410_s5 = scalar_lea.vmem %s101_s25, 32 }
  0x81   :  { %p5407_p3 = scmp.ne.s32.totalorder %s101_s25, %s5406_s6  ;;  %p5411_p4 = scmp.lt.s32.totalorder %s101_s25, %s101_s25 }
  0x82   :  { %p5412_p5 = scmp.lt.s32.totalorder %s5410_s5, %s5406_s6 }
  0x84   :  { %p5413_p6 = por %p5412_p5, %p5411_p4 }
  0x86   :  { %p5414_p7 = pnand %p5413_p6, %p5407_p3 }
  0x88   :  { %5417 = shalt.err (!%p5414_p7)
}
  0x89   :  { %103 = dma.hbm_to_vmem [thread:$0]  %s5890_s8, 16, %s101_s25, [#allocation12]  }
  0x8a   :  { %s5418_s3 = scalar_lea.hbm %s5892_s10, 128 }
  0x8b   :  { %p5419_p8 = scmp.ne.s32.totalorder %s5892_s10, %s5418_s3  ;;  %p5422_p9 = scmp.lt.u32.totalorder %s5418_s3, %s5892_s10 }
  0x8d   :  { %p5424_p10 = pnand %p5422_p9, %p5419_p8 }
  0x8f   :  { %5427 = shalt.err (!%p5424_p10)
}
  0x90   :  { %s5428_s24 = scalar_lea.vmem %s123_s29, 128  ;;  %p5433_p12 = scmp.lt.s32.totalorder %s123_s29, %s123_s29 }
  0x91   :  { %p5429_p11 = scmp.ne.s32.totalorder %s123_s29, %s5428_s24  ;;  %p5434_p13 = scmp.lt.s32.totalorder %s5428_s24, %s5428_s24 }
  0x93   :  { %p5435_p0 = por %p5434_p13, %p5433_p12 }
  0x95   :  { %p5436_p1 = pnand %p5435_p0, %p5429_p11 }
  0x97   :  { %5439 = shalt.err (!%p5436_p1)
}
  0x98   :  { %125 = dma.hbm_to_vmem [thread:$0]  %s5892_s10, 128, %s123_s29, [#allocation15]  }
  0x99   :  { %5462 = dma.done.wait [#allocation3], 8192  }
  0x9a   :  { %5463 = vsyncadd [#allocation3], 4294959104 }
  0x9b   :  { %5464 = dma.done.wait [#allocation6], 131104  }
  0x9c   :  { %5465 = vsyncadd [#allocation6], 4294836192 }
  0x9d   :  { %5466 = dma.done.wait [#allocation9], 4224  }
  0x9e   :  { %5467 = vsyncadd [#allocation9], 4294963072 }
  0x9f   :  { %5468 = dma.done.wait [#allocation12], 16400  }
  0xa0   :  { %5469 = vsyncadd [#allocation12], 4294950896 }
  0xa1   :  { %5470 = dma.done.wait [#allocation15], 16512  }
  0xa2   :  { %5471 = vsyncadd [#allocation15], 4294950784  ;;  %v156_v0 = vld [vmem:[#allocation2 + $0x8] sm:$0xff]  ;;  %v158_v1 = vld [vmem:[#allocation2 + $0x18] sm:$0xff] }
  0xa3   :  { %v323_v2 = vld [vmem:[#allocation7 + $0x8] sm:$0xff]  ;;  %v3764_v3 = vpack.c.bf16 %v158_v1, %v156_v0  ;;  %v155_v5 = vld [vmem:[#allocation2] sm:$0xff]  ;;  %v162_v13 = vld [vmem:[#allocation2 + $0x38] sm:$0xff] }
  0xa4   :  { %v331_v4 = vld [vmem:[#allocation7 + $0x48] sm:$0xff]  ;;  %v322_v9 = vld [vmem:[#allocation7] sm:$0xff]  ;;  %v166_v24 = vld [vmem:[#allocation2 + $0x58] sm:$0xff] }
  0xa5   :  { %v157_v6 = vld [vmem:[#allocation2 + $0x10] sm:$0xff]  ;;  %v3828_v7 = vpack.c.bf16 %v331_v4, %v323_v2  ;;  %v330_v10 = vld [vmem:[#allocation7 + $0x40] sm:$0xff]  ;;  %3765 = vmatprep.subr.bf16.mxu0 %v3764_v3  ;;  %v170_v36 = vld [vmem:[#allocation2 + $0x78] sm:$0xff] }
  0xa6   :  { %v3766_v8 = vpack.c.bf16 %v157_v6, %v155_v5  ;;  %v160_v11 = vld [vmem:[#allocation2 + $0x28] sm:$0xff]  ;;  %v3830_v12 = vpack.c.bf16 %v330_v10, %v322_v9  ;;  %v159_v18 = vld [vmem:[#allocation2 + $0x20] sm:$0xff]  ;;  %v161_v19 = vld [vmem:[#allocation2 + $0x30] sm:$0xff] }
  0xa7   :  { %v339_v14 = vld [vmem:[#allocation7 + $0x88] sm:$0xff]  ;;  %3829 = vmatprep.subr.bf16.mxu1 %v3828_v7  ;;  %v3768_v16 = vpack.c.bf16 %v162_v13, %v160_v11  ;;  %v338_v20 = vld [vmem:[#allocation7 + $0x80] sm:$0xff]  ;;  %v3770_v21 = vpack.c.bf16 %v161_v19, %v159_v18  ;;  %v174_v47 = vld [vmem:[#allocation2 + $0x98] sm:$0xff] }
  0xa8   :  { %v347_v15 = vld [vmem:[#allocation7 + $0xc8] sm:$0xff]  ;;  %3767 = vmatpush1.bf16.msra.mxu0 %v3766_v8  ;;  %3831 = vmatpush1.bf16.msra.mxu1 %v3830_v12  ;;  %v346_v22 = vld [vmem:[#allocation7 + $0xc0] sm:$0xff]  ;;  %v178_v59 = vld [vmem:[#allocation2 + $0xb8] sm:$0xff] }
  0xa9   :  { %v3832_v17 = vpack.c.bf16 %v347_v15, %v339_v14  ;;  %v164_v23 = vld [vmem:[#allocation2 + $0x48] sm:$0xff]  ;;  %3769 = vmatprep.subr.bf16.mxu0 %v3768_v16  ;;  %v3834_v25 = vpack.c.bf16 %v346_v22, %v338_v20  ;;  %v163_v29 = vld [vmem:[#allocation2 + $0x40] sm:$0xff]  ;;  %v165_v31 = vld [vmem:[#allocation2 + $0x50] sm:$0xff] }
  0xaa   :  { %v3772_v26 = vpack.c.bf16 %v166_v24, %v164_v23  ;;  %v355_v27 = vld [vmem:[#allocation7 + $0x108] sm:$0xff]  ;;  %v354_v32 = vld [vmem:[#allocation7 + $0x100] sm:$0xff]  ;;  %v3774_v34 = vpack.c.bf16 %v165_v31, %v163_v29  ;;  %v182_v7 = vld [vmem:[#allocation2 + $0xd8] sm:$0xff] }
  0xab   :  { %3833 = vmatprep.subr.bf16.mxu1 %v3832_v17  ;;  %v363_v28 = vld [vmem:[#allocation7 + $0x148] sm:$0xff]  ;;  %v362_v33 = vld [vmem:[#allocation7 + $0x140] sm:$0xff]  ;;  %v186_v19 = vld [vmem:[#allocation2 + $0xf8] sm:$0xff] }
  0xac   :  { %v3836_v30 = vpack.c.bf16 %v363_v28, %v355_v27  ;;  %3771 = vmatpush1.bf16.msra.mxu0 %v3770_v21  ;;  %v168_v35 = vld [vmem:[#allocation2 + $0x68] sm:$0xff]  ;;  %3835 = vmatpush1.bf16.msra.mxu1 %v3834_v25  ;;  %v3838_v38 = vpack.c.bf16 %v362_v33, %v354_v32  ;;  %v167_v41 = vld [vmem:[#allocation2 + $0x60] sm:$0xff]  ;;  %v169_v42 = vld [vmem:[#allocation2 + $0x70] sm:$0xff] }
  0xad   :  { %v371_v37 = vld [vmem:[#allocation7 + $0x188] sm:$0xff]  ;;  %3773 = vmatprep.subr.bf16.mxu0 %v3772_v26  ;;  %v3776_v39 = vpack.c.bf16 %v170_v36, %v168_v35  ;;  %v370_v44 = vld [vmem:[#allocation7 + $0x180] sm:$0xff]  ;;  %v3778_v50 = vpack.c.bf16 %v169_v42, %v167_v41  ;;  %v190_v31 = vld [vmem:[#allocation2 + $0x118] sm:$0xff] }
  0xae   :  { %v379_v40 = vld [vmem:[#allocation7 + $0x1c8] sm:$0xff]  ;;  %3837 = vmatprep.subr.bf16.mxu1 %v3836_v30  ;;  %v378_v45 = vld [vmem:[#allocation7 + $0x1c0] sm:$0xff] }
  0xaf   :  { %v3840_v43 = vpack.c.bf16 %v379_v40, %v371_v37  ;;  %v172_v46 = vld [vmem:[#allocation2 + $0x88] sm:$0xff]  ;;  %v3842_v51 = vpack.c.bf16 %v378_v45, %v370_v44  ;;  %v171_v53 = vld [vmem:[#allocation2 + $0x80] sm:$0xff]  ;;  %v173_v54 = vld [vmem:[#allocation2 + $0x90] sm:$0xff] }
  0xb0   :  { %v387_v48 = vld [vmem:[#allocation7 + $0x208] sm:$0xff]  ;;  %3775 = vmatpush1.bf16.msra.mxu0 %v3774_v34  ;;  %3839 = vmatpush1.bf16.msra.mxu1 %v3838_v38  ;;  %v3780_v52 = vpack.c.bf16 %v174_v47, %v172_v46  ;;  %v386_v55 = vld [vmem:[#allocation7 + $0x200] sm:$0xff]  ;;  %v3782_v62 = vpack.c.bf16 %v173_v54, %v171_v53 }
  0xb1   :  { %v395_v49 = vld [vmem:[#allocation7 + $0x248] sm:$0xff]  ;;  %3777 = vmatprep.subr.bf16.mxu0 %v3776_v39  ;;  %3841 = vmatprep.subr.bf16.mxu1 %v3840_v43  ;;  %v394_v57 = vld [vmem:[#allocation7 + $0x240] sm:$0xff]  ;;  %v194_v43 = vld [vmem:[#allocation2 + $0x138] sm:$0xff] }
  0xb2   :  { %v3844_v56 = vpack.c.bf16 %v395_v49, %v387_v48  ;;  %v176_v58 = vld [vmem:[#allocation2 + $0xa8] sm:$0xff]  ;;  %v3846_v63 = vpack.c.bf16 %v394_v57, %v386_v55  ;;  %v175_v1 = vld [vmem:[#allocation2 + $0xa0] sm:$0xff]  ;;  %v177_v2 = vld [vmem:[#allocation2 + $0xb0] sm:$0xff] }
  0xb3   :  { %v403_v60 = vld [vmem:[#allocation7 + $0x288] sm:$0xff]  ;;  %v3784_v0 = vpack.c.bf16 %v178_v59, %v176_v58  ;;  %v402_v3 = vld [vmem:[#allocation7 + $0x280] sm:$0xff]  ;;  %v3786_v10 = vpack.c.bf16 %v177_v2, %v175_v1  ;;  %v198_v55 = vld [vmem:[#allocation2 + $0x158] sm:$0xff] }
  0xb4   :  { %v411_v61 = vld [vmem:[#allocation7 + $0x2c8] sm:$0xff]  ;;  %3779 = vmatpush1.bf16.msra.mxu0 %v3778_v50  ;;  %3843 = vmatpush1.bf16.msra.mxu1 %v3842_v51  ;;  %v410_v5 = vld [vmem:[#allocation7 + $0x2c0] sm:$0xff] }
  0xb5   :  { %3781 = vmatprep.subr.bf16.mxu0 %v3780_v52  ;;  %3845 = vmatprep.subr.bf16.mxu1 %v3844_v56  ;;  %v3848_v4 = vpack.c.bf16 %v411_v61, %v403_v60  ;;  %v180_v6 = vld [vmem:[#allocation2 + $0xc8] sm:$0xff]  ;;  %v3850_v11 = vpack.c.bf16 %v410_v5, %v402_v3  ;;  %v179_v13 = vld [vmem:[#allocation2 + $0xc0] sm:$0xff]  ;;  %v181_v14 = vld [vmem:[#allocation2 + $0xd0] sm:$0xff] }
  0xb6   :  { %v419_v8 = vld [vmem:[#allocation7 + $0x308] sm:$0xff]  ;;  %v3788_v12 = vpack.c.bf16 %v182_v7, %v180_v6  ;;  %v418_v15 = vld [vmem:[#allocation7 + $0x300] sm:$0xff]  ;;  %v3790_v22 = vpack.c.bf16 %v181_v14, %v179_v13  ;;  %v202_v3 = vld [vmem:[#allocation2 + $0x178] sm:$0xff] }
  0xb7   :  { %v427_v9 = vld [vmem:[#allocation7 + $0x348] sm:$0xff]  ;;  %v426_v17 = vld [vmem:[#allocation7 + $0x340] sm:$0xff] }
  0xb8   :  { %3783 = vmatpush1.bf16.msra.mxu0 %v3782_v62  ;;  %3847 = vmatpush1.bf16.msra.mxu1 %v3846_v63  ;;  %v3852_v16 = vpack.c.bf16 %v427_v9, %v419_v8  ;;  %v184_v18 = vld [vmem:[#allocation2 + $0xe8] sm:$0xff]  ;;  %v3854_v23 = vpack.c.bf16 %v426_v17, %v418_v15  ;;  %v183_v25 = vld [vmem:[#allocation2 + $0xe0] sm:$0xff]  ;;  %v185_v26 = vld [vmem:[#allocation2 + $0xf0] sm:$0xff] }
  0xb9   :  { %3785 = vmatprep.subr.bf16.mxu0 %v3784_v0  ;;  %3849 = vmatprep.subr.bf16.mxu1 %v3848_v4  ;;  %v435_v20 = vld [vmem:[#allocation7 + $0x388] sm:$0xff]  ;;  %v3792_v24 = vpack.c.bf16 %v186_v19, %v184_v18  ;;  %v434_v27 = vld [vmem:[#allocation7 + $0x380] sm:$0xff]  ;;  %v3794_v34 = vpack.c.bf16 %v185_v26, %v183_v25  ;;  %v206_v15 = vld [vmem:[#allocation2 + $0x198] sm:$0xff] }
  0xba   :  { %v443_v21 = vld [vmem:[#allocation7 + $0x3c8] sm:$0xff]  ;;  %v442_v29 = vld [vmem:[#allocation7 + $0x3c0] sm:$0xff] }
  0xbb   :  { %v3856_v28 = vpack.c.bf16 %v443_v21, %v435_v20  ;;  %v188_v30 = vld [vmem:[#allocation2 + $0x108] sm:$0xff]  ;;  %v3858_v35 = vpack.c.bf16 %v442_v29, %v434_v27  ;;  %v187_v37 = vld [vmem:[#allocation2 + $0x100] sm:$0xff]  ;;  %v189_v38 = vld [vmem:[#allocation2 + $0x110] sm:$0xff] }
  0xbc   :  { %3787 = vmatpush1.bf16.msra.mxu0 %v3786_v10  ;;  %3851 = vmatpush1.bf16.msra.mxu1 %v3850_v11  ;;  %v451_v32 = vld [vmem:[#allocation7 + $0x408] sm:$0xff]  ;;  %v3796_v36 = vpack.c.bf16 %v190_v31, %v188_v30  ;;  %v450_v39 = vld [vmem:[#allocation7 + $0x400] sm:$0xff]  ;;  %v3798_v46 = vpack.c.bf16 %v189_v38, %v187_v37  ;;  %v210_v29 = vld [vmem:[#allocation2 + $0x1b8] sm:$0xff] }
  0xbd   :  { %3789 = vmatprep.subr.bf16.mxu0 %v3788_v12  ;;  %3853 = vmatprep.subr.bf16.mxu1 %v3852_v16  ;;  %v459_v33 = vld [vmem:[#allocation7 + $0x448] sm:$0xff]  ;;  %v458_v41 = vld [vmem:[#allocation7 + $0x440] sm:$0xff] }
  0xbe   :  { %v3860_v40 = vpack.c.bf16 %v459_v33, %v451_v32  ;;  %v192_v42 = vld [vmem:[#allocation2 + $0x128] sm:$0xff]  ;;  %v3862_v47 = vpack.c.bf16 %v458_v41, %v450_v39  ;;  %v191_v49 = vld [vmem:[#allocation2 + $0x120] sm:$0xff]  ;;  %v193_v50 = vld [vmem:[#allocation2 + $0x130] sm:$0xff] }
  0xbf   :  { %v467_v44 = vld [vmem:[#allocation7 + $0x488] sm:$0xff]  ;;  %v3800_v48 = vpack.c.bf16 %v194_v43, %v192_v42  ;;  %v466_v51 = vld [vmem:[#allocation7 + $0x480] sm:$0xff]  ;;  %v3802_v58 = vpack.c.bf16 %v193_v50, %v191_v49  ;;  %v214_v41 = vld [vmem:[#allocation2 + $0x1d8] sm:$0xff] }
  0xc0   :  { %3791 = vmatpush1.bf16.msra.mxu0 %v3790_v22  ;;  %3855 = vmatpush1.bf16.msra.mxu1 %v3854_v23  ;;  %v475_v45 = vld [vmem:[#allocation7 + $0x4c8] sm:$0xff]  ;;  %v474_v53 = vld [vmem:[#allocation7 + $0x4c0] sm:$0xff] }
  0xc1   :  { %3793 = vmatprep.subr.bf16.mxu0 %v3792_v24  ;;  %3857 = vmatprep.subr.bf16.mxu1 %v3856_v28  ;;  %v3864_v52 = vpack.c.bf16 %v475_v45, %v467_v44  ;;  %v196_v54 = vld [vmem:[#allocation2 + $0x148] sm:$0xff]  ;;  %v3866_v59 = vpack.c.bf16 %v474_v53, %v466_v51  ;;  %v195_v61 = vld [vmem:[#allocation2 + $0x140] sm:$0xff]  ;;  %v197_v62 = vld [vmem:[#allocation2 + $0x150] sm:$0xff] }
  0xc2   :  { %v483_v56 = vld [vmem:[#allocation7 + $0x508] sm:$0xff]  ;;  %v3804_v60 = vpack.c.bf16 %v198_v55, %v196_v54  ;;  %v482_v63 = vld [vmem:[#allocation7 + $0x500] sm:$0xff]  ;;  %v3806_v6 = vpack.c.bf16 %v197_v62, %v195_v61  ;;  %v218_v53 = vld [vmem:[#allocation2 + $0x1f8] sm:$0xff] }
  0xc3   :  { %v491_v57 = vld [vmem:[#allocation7 + $0x548] sm:$0xff]  ;;  %v490_v1 = vld [vmem:[#allocation7 + $0x540] sm:$0xff] }
  0xc4   :  { %3795 = vmatpush1.bf16.msra.mxu0 %v3794_v34  ;;  %3859 = vmatpush1.bf16.msra.mxu1 %v3858_v35  ;;  %v3868_v0 = vpack.c.bf16 %v491_v57, %v483_v56  ;;  %v200_v2 = vld [vmem:[#allocation2 + $0x168] sm:$0xff]  ;;  %v199_v7 = vld [vmem:[#allocation2 + $0x160] sm:$0xff]  ;;  %v3870_v8 = vpack.c.bf16 %v490_v1, %v482_v63  ;;  %v201_v10 = vld [vmem:[#allocation2 + $0x170] sm:$0xff] }
  0xc5   :  { %3797 = vmatprep.subr.bf16.mxu0 %v3796_v36  ;;  %3861 = vmatprep.subr.bf16.mxu1 %v3860_v40  ;;  %v499_v4 = vld [vmem:[#allocation7 + $0x588] sm:$0xff]  ;;  %v3808_v9 = vpack.c.bf16 %v202_v3, %v200_v2  ;;  %v498_v11 = vld [vmem:[#allocation7 + $0x580] sm:$0xff]  ;;  %v3810_v20 = vpack.c.bf16 %v201_v10, %v199_v7  ;;  %v333_v1 = vld [vmem:[#allocation7 + $0x58] sm:$0xff] }
  0xc6   :  { %v507_v5 = vld [vmem:[#allocation7 + $0x5c8] sm:$0xff]  ;;  %v506_v12 = vld [vmem:[#allocation7 + $0x5c0] sm:$0xff] }
  0xc7   :  { %v3872_v13 = vpack.c.bf16 %v507_v5, %v499_v4  ;;  %v204_v14 = vld [vmem:[#allocation2 + $0x188] sm:$0xff]  ;;  %v3874_v21 = vpack.c.bf16 %v506_v12, %v498_v11  ;;  %v203_v23 = vld [vmem:[#allocation2 + $0x180] sm:$0xff]  ;;  %v205_v24 = vld [vmem:[#allocation2 + $0x190] sm:$0xff] }
  0xc8   :  { %3799 = vmatpush1.bf16.msra.mxu0 %v3798_v46  ;;  %3863 = vmatpush1.bf16.msra.mxu1 %v3862_v47  ;;  %v154_v16 = vld [vmem:[%s5882_s0 + $0x8] sm:$0xff]  ;;  %v3812_v22 = vpack.c.bf16 %v206_v15, %v204_v14  ;;  %v3814_v32 = vpack.c.bf16 %v205_v24, %v203_v23  ;;  %v207_v35 = vld [vmem:[#allocation2 + $0x1a0] sm:$0xff]  ;;  %v209_v36 = vld [vmem:[#allocation2 + $0x1b0] sm:$0xff] }
  0xc9   :  { %3801 = vmatprep.subr.bf16.mxu0 %v3800_v48  ;;  %3865 = vmatprep.subr.bf16.mxu1 %v3864_v52  ;;  %v515_v17 = vld [vmem:[#allocation7 + $0x608] sm:$0xff]  ;;  %v514_v25 = vld [vmem:[#allocation7 + $0x600] sm:$0xff]  ;;  %v3818_v44 = vpack.c.bf16 %v209_v36, %v207_v35  ;;  %v341_v12 = vld [vmem:[#allocation7 + $0x98] sm:$0xff] }
  0xca   :  { %v523_v18 = vld [vmem:[#allocation7 + $0x648] sm:$0xff]  ;;  %295 = vmatprep.mubr.f32.mxu0 %v154_v16  ;;  %v522_v27 = vld [vmem:[#allocation7 + $0x640] sm:$0xff]  ;;  %v340_v23 = vld [vmem:[#allocation7 + $0x90] sm:$0xff] }
  0xcb   :  { %v5677_v19 = vld [vmem:[%s5883_s1 + $0x8] sm:$0xff]  ;;  %v3876_v26 = vpack.c.bf16 %v523_v18, %v515_v17  ;;  %v3878_v33 = vpack.c.bf16 %v522_v27, %v514_v25  ;;  %v211_v47 = vld [vmem:[#allocation2 + $0x1c0] sm:$0xff]  ;;  %v213_v48 = vld [vmem:[#allocation2 + $0x1d0] sm:$0xff] }
  0xcc   :  { %3803 = vmatpush1.bf16.msra.mxu0 %v3802_v58  ;;  %3867 = vmatpush1.bf16.msra.mxu1 %v3866_v59  ;;  %v208_v28 = vld [vmem:[#allocation2 + $0x1a8] sm:$0xff]  ;;  %v3822_v56 = vpack.c.bf16 %v213_v48, %v211_v47  ;;  %v215_v59 = vld [vmem:[#allocation2 + $0x1e0] sm:$0xff]  ;;  %v348_v24 = vld [vmem:[#allocation7 + $0xd0] sm:$0xff] }
  0xcd   :  { %3805 = vmatprep.subr.bf16.mxu0 %v3804_v60  ;;  %3869 = vmatprep.subr.bf16.mxu1 %v3868_v0  ;;  %v531_v30 = vld [vmem:[#allocation7 + $0x688] sm:$0xff]  ;;  %v3816_v34 = vpack.c.bf16 %v210_v29, %v208_v28  ;;  %v530_v37 = vld [vmem:[#allocation7 + $0x680] sm:$0xff]  ;;  %v325_v0 = vld [vmem:[#allocation7 + $0x18] sm:$0xff] }
  0xce   :  { %1452 = vmatprep.mubr.f32.mxu1 %v5677_v19  ;;  %v539_v31 = vld [vmem:[#allocation7 + $0x6c8] sm:$0xff]  ;;  %v538_v39 = vld [vmem:[#allocation7 + $0x6c0] sm:$0xff]  ;;  %v357_v27 = vld [vmem:[#allocation7 + $0x118] sm:$0xff] }
  0xcf   :  { %v3880_v38 = vpack.c.bf16 %v539_v31, %v531_v30  ;;  %v212_v40 = vld [vmem:[#allocation2 + $0x1c8] sm:$0xff]  ;;  %v3882_v45 = vpack.c.bf16 %v538_v39, %v530_v37  ;;  %v217_v60 = vld [vmem:[#allocation2 + $0x1f0] sm:$0xff]  ;;  %v153_v16 = vld [vmem:[%s5882_s0] sm:$0xff]  ;;  %v4090_v31 = vpack.c.bf16 %v348_v24, %v340_v23 }
  0xd0   :  { %3807 = vmatpush1.bf16.msra.mxu0 %v3806_v6  ;;  %3871 = vmatpush1.bf16.msra.mxu1 %v3870_v8  ;;  %v547_v42 = vld [vmem:[#allocation7 + $0x708] sm:$0xff]  ;;  %v3820_v46 = vpack.c.bf16 %v214_v41, %v212_v40  ;;  %v546_v49 = vld [vmem:[#allocation7 + $0x700] sm:$0xff]  ;;  %v3826_v4 = vpack.c.bf16 %v217_v60, %v215_v59  ;;  %v4084_v6 = vpack.c.bf16 %v333_v1, %v325_v0  ;;  %v324_v8 = vld [vmem:[#allocation7 + $0x10] sm:$0xff] }
  0xd1   :  { %3809 = vmatprep.subr.bf16.mxu0 %v3808_v9  ;;  %3873 = vmatprep.subr.bf16.mxu1 %v3872_v13  ;;  %v555_v43 = vld [vmem:[#allocation7 + $0x748] sm:$0xff]  ;;  %v554_v51 = vld [vmem:[#allocation7 + $0x740] sm:$0xff]  ;;  %v332_v9 = vld [vmem:[#allocation7 + $0x50] sm:$0xff] }
  0xd2   :  { %v3884_v50 = vpack.c.bf16 %v555_v43, %v547_v42  ;;  %v216_v52 = vld [vmem:[#allocation2 + $0x1e8] sm:$0xff]  ;;  %v3886_v57 = vpack.c.bf16 %v554_v51, %v546_v49  ;;  %v349_v13 = vld [vmem:[#allocation7 + $0xd8] sm:$0xff]  ;;  %v4086_v18 = vpack.c.bf16 %v332_v9, %v324_v8  ;;  %v356_v35 = vld [vmem:[#allocation7 + $0x110] sm:$0xff] }
  0xd3   :  { %v563_v54 = vld [vmem:[#allocation7 + $0x788] sm:$0xff]  ;;  %v3824_v58 = vpack.c.bf16 %v218_v53, %v216_v52  ;;  %v562_v61 = vld [vmem:[#allocation7 + $0x780] sm:$0xff]  ;;  %v365_v28 = vld [vmem:[#allocation7 + $0x158] sm:$0xff] }
  0xd4   :  { %3811 = vmatpush1.bf16.msra.mxu0 %v3810_v20  ;;  %3875 = vmatpush1.bf16.msra.mxu1 %v3874_v21  ;;  %v571_v55 = vld [vmem:[#allocation7 + $0x7c8] sm:$0xff]  ;;  %v570_v63 = vld [vmem:[#allocation7 + $0x7c0] sm:$0xff]  ;;  %v4088_v21 = vpack.c.bf16 %v349_v13, %v341_v12  ;;  %v364_v36 = vld [vmem:[#allocation7 + $0x150] sm:$0xff] }
  0xd5   :  { %3813 = vmatprep.subr.bf16.mxu0 %v3812_v22  ;;  %3877 = vmatprep.subr.bf16.mxu1 %v3876_v26  ;;  %v3888_v62 = vpack.c.bf16 %v571_v55, %v563_v54  ;;  %v579_v2 = vld [vmem:[#allocation7 + $0x808] sm:$0xff]  ;;  %v3890_v5 = vpack.c.bf16 %v570_v63, %v562_v61  ;;  %v578_v7 = vld [vmem:[#allocation7 + $0x800] sm:$0xff]  ;;  %v373_v39 = vld [vmem:[#allocation7 + $0x198] sm:$0xff]  ;;  %v4094_v43 = vpack.c.bf16 %v364_v36, %v356_v35 }
  0xd6   :  { %v587_v3 = vld [vmem:[#allocation7 + $0x848] sm:$0xff]  ;;  %v586_v11 = vld [vmem:[#allocation7 + $0x840] sm:$0xff]  ;;  %v381_v40 = vld [vmem:[#allocation7 + $0x1d8] sm:$0xff] }
  0xd7   :  { %v3892_v10 = vpack.c.bf16 %v587_v3, %v579_v2  ;;  %v595_v14 = vld [vmem:[#allocation7 + $0x888] sm:$0xff]  ;;  %v5686_v17 = vld [vmem:[%s5883_s1] sm:$0xff]  ;;  %v3894_v20 = vpack.c.bf16 %v586_v11, %v578_v7  ;;  %v372_v47 = vld [vmem:[#allocation7 + $0x190] sm:$0xff] }
  0xd8   :  { %3815 = vmatpush1.bf16.msra.mxu0 %v3814_v32  ;;  %3879 = vmatpush1.bf16.msra.mxu1 %v3878_v33  ;;  %v603_v15 = vld [vmem:[#allocation7 + $0x8c8] sm:$0xff]  ;;  %v594_v22 = vld [vmem:[#allocation7 + $0x880] sm:$0xff]  ;;  %v4092_v33 = vpack.c.bf16 %v365_v28, %v357_v27  ;;  %v380_v48 = vld [vmem:[#allocation7 + $0x1d0] sm:$0xff] }
  0xd9   :  { %3817 = vmatprep.subr.bf16.mxu0 %v3816_v34  ;;  %3881 = vmatprep.subr.bf16.mxu1 %v3880_v38  ;;  %v3896_v25 = vpack.c.bf16 %v603_v15, %v595_v14  ;;  %v602_v26 = vld [vmem:[#allocation7 + $0x8c0] sm:$0xff]  ;;  %v611_v29 = vld [vmem:[#allocation7 + $0x908] sm:$0xff]  ;;  %v389_v51 = vld [vmem:[#allocation7 + $0x218] sm:$0xff] }
  0xda   :  { %v619_v30 = vld [vmem:[#allocation7 + $0x948] sm:$0xff]  ;;  %v3898_v32 = vpack.c.bf16 %v602_v26, %v594_v22  ;;  %v610_v34 = vld [vmem:[#allocation7 + $0x900] sm:$0xff]  ;;  %v397_v52 = vld [vmem:[#allocation7 + $0x258] sm:$0xff] }
  0xdb   :  { %v3900_v37 = vpack.c.bf16 %v619_v30, %v611_v29  ;;  %v618_v38 = vld [vmem:[#allocation7 + $0x940] sm:$0xff]  ;;  %v627_v41 = vld [vmem:[#allocation7 + $0x988] sm:$0xff]  ;;  %v396_v59 = vld [vmem:[#allocation7 + $0x250] sm:$0xff] }
  0xdc   :  { %3819 = vmatpush1.bf16.msra.mxu0 %v3818_v44  ;;  %3883 = vmatpush1.bf16.msra.mxu1 %v3882_v45  ;;  %v635_v42 = vld [vmem:[#allocation7 + $0x9c8] sm:$0xff]  ;;  %v3902_v44 = vpack.c.bf16 %v618_v38, %v610_v34  ;;  %v4096_v45 = vpack.c.bf16 %v381_v40, %v373_v39  ;;  %v650_v61 = vld [vmem:[#allocation7 + $0xa40] sm:$0xff]  ;;  %v413_v63 = vld [vmem:[#allocation7 + $0x2d8] sm:$0xff] }
  0xdd   :  { %3821 = vmatprep.subr.bf16.mxu0 %v3820_v46  ;;  %3885 = vmatprep.subr.bf16.mxu1 %v3884_v50  ;;  %v626_v46 = vld [vmem:[#allocation7 + $0x980] sm:$0xff]  ;;  %v3904_v49 = vpack.c.bf16 %v635_v42, %v627_v41  ;;  %v643_v53 = vld [vmem:[#allocation7 + $0xa08] sm:$0xff]  ;;  %v412_v7 = vld [vmem:[#allocation7 + $0x2d0] sm:$0xff] }
  0xde   :  { %v634_v50 = vld [vmem:[#allocation7 + $0x9c0] sm:$0xff]  ;;  %v651_v54 = vld [vmem:[#allocation7 + $0xa48] sm:$0xff]  ;;  %v429_v11 = vld [vmem:[#allocation7 + $0x358] sm:$0xff] }
  0xdf   :  { %v3906_v55 = vpack.c.bf16 %v634_v50, %v626_v46  ;;  %v3908_v60 = vpack.c.bf16 %v651_v54, %v643_v53  ;;  %v659_v0 = vld [vmem:[#allocation7 + $0xa88] sm:$0xff]  ;;  %v666_v9 = vld [vmem:[#allocation7 + $0xac0] sm:$0xff]  ;;  %v428_v22 = vld [vmem:[#allocation7 + $0x350] sm:$0xff] }
  0xe0   :  { %3823 = vmatpush1.bf16.msra.mxu0 %v3822_v56  ;;  %3887 = vmatpush1.bf16.msra.mxu1 %v3886_v57  ;;  %v4100_v56 = vpack.c.bf16 %v397_v52, %v389_v51  ;;  %v642_v57 = vld [vmem:[#allocation7 + $0xa00] sm:$0xff]  ;;  %v667_v1 = vld [vmem:[#allocation7 + $0xac8] sm:$0xff]  ;;  %v437_v24 = vld [vmem:[#allocation7 + $0x398] sm:$0xff] }
  0xe1   :  { %3825 = vmatprep.subr.bf16.mxu0 %v3824_v58  ;;  %3889 = vmatprep.subr.bf16.mxu1 %v3888_v62  ;;  %v388_v58 = vld [vmem:[#allocation7 + $0x210] sm:$0xff]  ;;  %v405_v62 = vld [vmem:[#allocation7 + $0x298] sm:$0xff]  ;;  %v3910_v3 = vpack.c.bf16 %v650_v61, %v642_v57  ;;  %v3912_v8 = vpack.c.bf16 %v667_v1, %v659_v0  ;;  %v675_v12 = vld [vmem:[#allocation7 + $0xb08] sm:$0xff] }
  0xe2   :  { %v4102_v2 = vpack.c.bf16 %v396_v59, %v388_v58  ;;  %v683_v13 = vld [vmem:[#allocation7 + $0xb48] sm:$0xff]  ;;  %v674_v15 = vld [vmem:[#allocation7 + $0xb00] sm:$0xff]  ;;  %v5693_v26 = vld [vmem:[%s5883_s1 + $0x18] sm:$0xff] }
  0xe3   :  { %v3916_v23 = vpack.c.bf16 %v683_v13, %v675_v12  ;;  %v691_v27 = vld [vmem:[#allocation7 + $0xb88] sm:$0xff]  ;;  %v444_v34 = vld [vmem:[#allocation7 + $0x3d0] sm:$0xff]  ;;  %v698_v36 = vld [vmem:[#allocation7 + $0xbc0] sm:$0xff] }
  0xe4   :  { %3827 = vmatpush1.bf16.msra.mxu0 %v3826_v4  ;;  %3891 = vmatpush1.bf16.msra.mxu1 %v3890_v5  ;;  %v4104_v4 = vpack.c.bf16 %v413_v63, %v405_v62  ;;  %v658_v5 = vld [vmem:[#allocation7 + $0xa80] sm:$0xff]  ;;  %v699_v28 = vld [vmem:[#allocation7 + $0xbc8] sm:$0xff]  ;;  %v461_v38 = vld [vmem:[#allocation7 + $0x458] sm:$0xff] }
  0xe5   :  { %4085 = vmatprep.subr.bf16.mxu0 %v4084_v6  ;;  %3893 = vmatprep.subr.bf16.mxu1 %v3892_v10  ;;  %v404_v6 = vld [vmem:[#allocation7 + $0x290] sm:$0xff]  ;;  %v421_v10 = vld [vmem:[#allocation7 + $0x318] sm:$0xff]  ;;  %v3920_v35 = vpack.c.bf16 %v699_v28, %v691_v27  ;;  %v707_v39 = vld [vmem:[#allocation7 + $0xc08] sm:$0xff] }
  0xe6   :  { %v4106_v14 = vpack.c.bf16 %v412_v7, %v404_v6  ;;  %v715_v40 = vld [vmem:[#allocation7 + $0xc48] sm:$0xff]  ;;  %v460_v46 = vld [vmem:[#allocation7 + $0x450] sm:$0xff]  ;;  %v477_v50 = vld [vmem:[#allocation7 + $0x4d8] sm:$0xff] }
  0xe7   :  { %296 = vmatmul.mubr.f32.vlgmr.msra.gmra.mrb[0].mxu0 %v153_v16  ;;  %1453 = vmatmul.mubr.f32.vlgmr.msra.gmra.mrb[0].mxu1 %v5686_v17  ;;  %v3914_v16 = vpack.c.bf16 %v666_v9, %v658_v5  ;;  %v723_v51 = vld [vmem:[#allocation7 + $0xc88] sm:$0xff]  ;;  %v476_v57 = vld [vmem:[#allocation7 + $0x4d0] sm:$0xff]  ;;  %v730_v59 = vld [vmem:[#allocation7 + $0xcc0] sm:$0xff] }
  0xe8   :  { %4087 = vmatpush1.bf16.msra.mxu0 %v4086_v18  ;;  %3895 = vmatpush1.bf16.msra.mxu1 %v3894_v20  ;;  %v4108_v18 = vpack.c.bf16 %v429_v11, %v421_v10  ;;  %v682_v20 = vld [vmem:[#allocation7 + $0xb40] sm:$0xff]  ;;  %v731_v52 = vld [vmem:[#allocation7 + $0xcc8] sm:$0xff]  ;;  %v493_v61 = vld [vmem:[#allocation7 + $0x558] sm:$0xff] }
  0xe9   :  { %4089 = vmatprep.subr.bf16.mxu0 %v4088_v21  ;;  %3897 = vmatprep.subr.bf16.mxu1 %v3896_v25  ;;  %v420_v21 = vld [vmem:[#allocation7 + $0x310] sm:$0xff]  ;;  %v445_v25 = vld [vmem:[#allocation7 + $0x3d8] sm:$0xff]  ;;  %v3918_v30 = vpack.c.bf16 %v682_v20, %v674_v15  ;;  %v3928_v58 = vpack.c.bf16 %v731_v52, %v723_v51  ;;  %v739_v62 = vld [vmem:[#allocation7 + $0xd08] sm:$0xff] }
  0xea   :  { %1736 = vmatprep.mubr.f32.mxu0 %v5677_v19  ;;  %v4098_v19 = vpack.c.bf16 %v380_v48, %v372_v47  ;;  %1523 = vmatprep.mubr.f32.mxu1 %v5693_v26  ;;  %v4110_v29 = vpack.c.bf16 %v428_v22, %v420_v21  ;;  %v3924_v47 = vpack.c.bf16 %v715_v40, %v707_v39  ;;  %v714_v48 = vld [vmem:[#allocation7 + $0xc40] sm:$0xff]  ;;  %v747_v63 = vld [vmem:[#allocation7 + $0xd48] sm:$0xff]  ;;  %v492_v5 = vld [vmem:[#allocation7 + $0x550] sm:$0xff] }
  0xeb   :  { %v3932_v6 = vpack.c.bf16 %v747_v63, %v739_v62  ;;  %v746_v7 = vld [vmem:[#allocation7 + $0xd40] sm:$0xff]  ;;  %v509_v9 = vld [vmem:[#allocation7 + $0x5d8] sm:$0xff]  ;;  %v755_v10 = vld [vmem:[#allocation7 + $0xd88] sm:$0xff] }
  0xec   :  { %4091 = vmatpush1.bf16.msra.mxu0 %v4090_v31  ;;  %3899 = vmatpush1.bf16.msra.mxu1 %v3898_v32  ;;  %v4112_v31 = vpack.c.bf16 %v445_v25, %v437_v24  ;;  %v690_v32 = vld [vmem:[#allocation7 + $0xb80] sm:$0xff]  ;;  %v763_v11 = vld [vmem:[#allocation7 + $0xdc8] sm:$0xff]  ;;  %v517_v22 = vld [vmem:[#allocation7 + $0x618] sm:$0xff] }
  0xed   :  { %4093 = vmatprep.subr.bf16.mxu0 %v4092_v33  ;;  %3901 = vmatprep.subr.bf16.mxu1 %v3900_v37  ;;  %v436_v33 = vld [vmem:[#allocation7 + $0x390] sm:$0xff]  ;;  %v453_v37 = vld [vmem:[#allocation7 + $0x418] sm:$0xff]  ;;  %v3922_v42 = vpack.c.bf16 %v698_v36, %v690_v32  ;;  %v754_v15 = vld [vmem:[#allocation7 + $0xd80] sm:$0xff]  ;;  %v3936_v20 = vpack.c.bf16 %v763_v11, %v755_v10 }
  0xee   :  { %v4114_v41 = vpack.c.bf16 %v444_v34, %v436_v33  ;;  %v762_v21 = vld [vmem:[#allocation7 + $0xdc0] sm:$0xff]  ;;  %v771_v24 = vld [vmem:[#allocation7 + $0xe08] sm:$0xff]  ;;  %v524_v32 = vld [vmem:[#allocation7 + $0x650] sm:$0xff] }
  0xef   :  { %v779_v25 = vld [vmem:[#allocation7 + $0xe48] sm:$0xff]  ;;  %v3938_v28 = vpack.c.bf16 %v762_v21, %v754_v15  ;;  %v778_v34 = vld [vmem:[#allocation7 + $0xe40] sm:$0xff]  ;;  %v541_v36 = vld [vmem:[#allocation7 + $0x6d8] sm:$0xff] }
  0xf0   :  { %4095 = vmatpush1.bf16.msra.mxu0 %v4094_v43  ;;  %3903 = vmatpush1.bf16.msra.mxu1 %v3902_v44  ;;  %v4116_v43 = vpack.c.bf16 %v461_v38, %v453_v37  ;;  %v706_v44 = vld [vmem:[#allocation7 + $0xc00] sm:$0xff]  ;;  %v3940_v33 = vpack.c.bf16 %v779_v25, %v771_v24  ;;  %v787_v37 = vld [vmem:[#allocation7 + $0xe88] sm:$0xff]  ;;  %v588_v15 = vld [vmem:[#allocation7 + $0x850] sm:$0xff] }
  0xf1   :  { %4097 = vmatprep.subr.bf16.mxu0 %v4096_v45  ;;  %3905 = vmatprep.subr.bf16.mxu1 %v3904_v49  ;;  %v452_v45 = vld [vmem:[#allocation7 + $0x410] sm:$0xff]  ;;  %v469_v49 = vld [vmem:[#allocation7 + $0x498] sm:$0xff]  ;;  %v3926_v54 = vpack.c.bf16 %v714_v48, %v706_v44  ;;  %v795_v38 = vld [vmem:[#allocation7 + $0xec8] sm:$0xff] }
  0xf2   :  { %v4118_v53 = vpack.c.bf16 %v460_v46, %v452_v45  ;;  %v540_v44 = vld [vmem:[#allocation7 + $0x6d0] sm:$0xff]  ;;  %v3944_v45 = vpack.c.bf16 %v795_v38, %v787_v37  ;;  %v794_v46 = vld [vmem:[#allocation7 + $0xec0] sm:$0xff]  ;;  %v557_v48 = vld [vmem:[#allocation7 + $0x758] sm:$0xff] }
  0xf3   :  { %v605_v21 = vld [vmem:[#allocation7 + $0x8d8] sm:$0xff]  ;;  %v5699_v24 = vld [vmem:[%s5883_s1 + $0x10] sm:$0xff]  ;;  %v5705_v38 = vld [vmem:[%s5883_s1 + $0x28] sm:$0xff] }
  0xf4   :  { %4099 = vmatpush1.bf16.msra.mxu0 %v4098_v19  ;;  %3907 = vmatpush1.bf16.msra.mxu1 %v3906_v55  ;;  %v4120_v19 = vpack.c.bf16 %v477_v50, %v469_v49  ;;  %v722_v55 = vld [vmem:[#allocation7 + $0xc80] sm:$0xff]  ;;  %v803_v49 = vld [vmem:[#allocation7 + $0xf08] sm:$0xff] }
  0xf5   :  { %4101 = vmatprep.subr.bf16.mxu0 %v4100_v56  ;;  %3909 = vmatprep.subr.bf16.mxu1 %v3908_v60  ;;  %v468_v56 = vld [vmem:[#allocation7 + $0x490] sm:$0xff]  ;;  %v485_v60 = vld [vmem:[#allocation7 + $0x518] sm:$0xff]  ;;  %v3930_v1 = vpack.c.bf16 %v730_v59, %v722_v55  ;;  %v811_v50 = vld [vmem:[#allocation7 + $0xf48] sm:$0xff] }
  0xf6   :  { %v4122_v0 = vpack.c.bf16 %v476_v57, %v468_v56  ;;  %v556_v55 = vld [vmem:[#allocation7 + $0x750] sm:$0xff]  ;;  %v3948_v56 = vpack.c.bf16 %v811_v50, %v803_v49  ;;  %v810_v57 = vld [vmem:[#allocation7 + $0xf40] sm:$0xff]  ;;  %v573_v59 = vld [vmem:[#allocation7 + $0x7d8] sm:$0xff] }
  0xf7   :  { %v875_v37 = vld [vmem:[#allocation7 + $0x1148] sm:$0xff] }
  0xf8   :  { %4103 = vmatpush1.bf16.msra.mxu0 %v4102_v2  ;;  %3911 = vmatpush1.bf16.msra.mxu1 %v3910_v3  ;;  %v4124_v2 = vpack.c.bf16 %v493_v61, %v485_v60  ;;  %v738_v3 = vld [vmem:[#allocation7 + $0xd00] sm:$0xff]  ;;  %v819_v60 = vld [vmem:[#allocation7 + $0xf88] sm:$0xff] }
  0xf9   :  { %4105 = vmatprep.subr.bf16.mxu0 %v4104_v4  ;;  %3913 = vmatprep.subr.bf16.mxu1 %v3912_v8  ;;  %v484_v4 = vld [vmem:[#allocation7 + $0x510] sm:$0xff]  ;;  %v501_v8 = vld [vmem:[#allocation7 + $0x598] sm:$0xff]  ;;  %v3934_v13 = vpack.c.bf16 %v746_v7, %v738_v3  ;;  %v827_v61 = vld [vmem:[#allocation7 + $0xfc8] sm:$0xff] }
  0xfa   :  { %v4126_v12 = vpack.c.bf16 %v492_v5, %v484_v4  ;;  %v572_v3 = vld [vmem:[#allocation7 + $0x7d0] sm:$0xff]  ;;  %v3952_v4 = vpack.c.bf16 %v827_v61, %v819_v60  ;;  %v826_v5 = vld [vmem:[#allocation7 + $0xfc0] sm:$0xff]  ;;  %v589_v7 = vld [vmem:[#allocation7 + $0x858] sm:$0xff] }
  0xfb   :  { %v891_v49 = vld [vmem:[#allocation7 + $0x11c8] sm:$0xff] }
  0xfc   :  { %4107 = vmatpush1.bf16.msra.mxu0 %v4106_v14  ;;  %3915 = vmatpush1.bf16.msra.mxu1 %v3914_v16  ;;  %v4128_v14 = vpack.c.bf16 %v509_v9, %v501_v8  ;;  %v500_v16 = vld [vmem:[#allocation7 + $0x590] sm:$0xff]  ;;  %v835_v8 = vld [vmem:[#allocation7 + $0x1008] sm:$0xff] }
  0xfd   :  { %4109 = vmatprep.subr.bf16.mxu0 %v4108_v18  ;;  %3917 = vmatprep.subr.bf16.mxu1 %v3916_v23  ;;  %v508_v18 = vld [vmem:[#allocation7 + $0x5d0] sm:$0xff]  ;;  %v525_v23 = vld [vmem:[#allocation7 + $0x658] sm:$0xff]  ;;  %v843_v9 = vld [vmem:[#allocation7 + $0x1048] sm:$0xff] }
  0xfe   :  { %v4130_v27 = vpack.c.bf16 %v508_v18, %v500_v16  ;;  %v3956_v16 = vpack.c.bf16 %v843_v9, %v835_v8  ;;  %v842_v18 = vld [vmem:[#allocation7 + $0x1040] sm:$0xff]  ;;  %v907_v60 = vld [vmem:[#allocation7 + $0x1248] sm:$0xff] }
 0x100   :  { %4111 = vmatpush1.bf16.msra.mxu0 %v4110_v29  ;;  %3919 = vmatpush1.bf16.msra.mxu1 %v3918_v30  ;;  %v4132_v29 = vpack.c.bf16 %v525_v23, %v517_v22  ;;  %v770_v30 = vld [vmem:[#allocation7 + $0xe00] sm:$0xff]  ;;  %v851_v22 = vld [vmem:[#allocation7 + $0x1088] sm:$0xff] }
 0x101   :  { %4113 = vmatprep.subr.bf16.mxu0 %v4112_v31  ;;  %3921 = vmatprep.subr.bf16.mxu1 %v3920_v35  ;;  %v516_v31 = vld [vmem:[#allocation7 + $0x610] sm:$0xff]  ;;  %v533_v35 = vld [vmem:[#allocation7 + $0x698] sm:$0xff]  ;;  %v3942_v40 = vpack.c.bf16 %v778_v34, %v770_v30  ;;  %v859_v23 = vld [vmem:[#allocation7 + $0x10c8] sm:$0xff] }
 0x102   :  { %v4134_v39 = vpack.c.bf16 %v524_v32, %v516_v31  ;;  %v596_v30 = vld [vmem:[#allocation7 + $0x890] sm:$0xff]  ;;  %v3960_v32 = vpack.c.bf16 %v859_v23, %v851_v22  ;;  %v613_v34 = vld [vmem:[#allocation7 + $0x918] sm:$0xff] }
 0x103   :  { %v604_v31 = vld [vmem:[#allocation7 + $0x8d0] sm:$0xff] }
 0x104   :  { %4115 = vmatpush1.bf16.msra.mxu0 %v4114_v41  ;;  %3923 = vmatpush1.bf16.msra.mxu1 %v3922_v42  ;;  %v4136_v41 = vpack.c.bf16 %v541_v36, %v533_v35  ;;  %v786_v42 = vld [vmem:[#allocation7 + $0xe80] sm:$0xff]  ;;  %v621_v35 = vld [vmem:[#allocation7 + $0x958] sm:$0xff]  ;;  %v867_v36 = vld [vmem:[#allocation7 + $0x1108] sm:$0xff] }
 0x105   :  { %4117 = vmatprep.subr.bf16.mxu0 %v4116_v43  ;;  %3925 = vmatprep.subr.bf16.mxu1 %v3924_v47  ;;  %v532_v43 = vld [vmem:[#allocation7 + $0x690] sm:$0xff]  ;;  %v549_v47 = vld [vmem:[#allocation7 + $0x718] sm:$0xff]  ;;  %v3946_v52 = vpack.c.bf16 %v794_v46, %v786_v42  ;;  %v866_v42 = vld [vmem:[#allocation7 + $0x1100] sm:$0xff] }
 0x106   :  { %v4138_v51 = vpack.c.bf16 %v540_v44, %v532_v43  ;;  %v612_v43 = vld [vmem:[#allocation7 + $0x910] sm:$0xff]  ;;  %v629_v46 = vld [vmem:[#allocation7 + $0x998] sm:$0xff] }
 0x107   :  { %v620_v44 = vld [vmem:[#allocation7 + $0x950] sm:$0xff] }
 0x108   :  { %4119 = vmatpush1.bf16.msra.mxu0 %v4118_v53  ;;  %3927 = vmatpush1.bf16.msra.mxu1 %v3926_v54  ;;  %v4140_v53 = vpack.c.bf16 %v557_v48, %v549_v47  ;;  %v802_v54 = vld [vmem:[#allocation7 + $0xf00] sm:$0xff]  ;;  %v637_v47 = vld [vmem:[#allocation7 + $0x9d8] sm:$0xff]  ;;  %v883_v48 = vld [vmem:[#allocation7 + $0x1188] sm:$0xff]  ;;  %v4158_v50 = vpack.c.bf16 %v620_v44, %v612_v43 }
 0x109   :  { %4121 = vmatprep.subr.bf16.mxu0 %v4120_v19  ;;  %3929 = vmatprep.subr.bf16.mxu1 %v3928_v58  ;;  %v548_v19 = vld [vmem:[#allocation7 + $0x710] sm:$0xff]  ;;  %v565_v58 = vld [vmem:[#allocation7 + $0x798] sm:$0xff]  ;;  %v3950_v63 = vpack.c.bf16 %v810_v57, %v802_v54  ;;  %v954_v44 = vld [vmem:[#allocation7 + $0x13c0] sm:$0xff] }
 0x10a   :  { %v4142_v62 = vpack.c.bf16 %v556_v55, %v548_v19  ;;  %v628_v54 = vld [vmem:[#allocation7 + $0x990] sm:$0xff]  ;;  %v3968_v55 = vpack.c.bf16 %v891_v49, %v883_v48  ;;  %v645_v57 = vld [vmem:[#allocation7 + $0xa18] sm:$0xff] }
 0x10b   :  { %v636_v19 = vld [vmem:[#allocation7 + $0x9d0] sm:$0xff] }
 0x10c   :  { %4123 = vmatpush1.bf16.msra.mxu0 %v4122_v0  ;;  %3931 = vmatpush1.bf16.msra.mxu1 %v3930_v1  ;;  %v4144_v0 = vpack.c.bf16 %v573_v59, %v565_v58  ;;  %v818_v1 = vld [vmem:[#allocation7 + $0xf80] sm:$0xff]  ;;  %v653_v58 = vld [vmem:[#allocation7 + $0xa58] sm:$0xff]  ;;  %v899_v59 = vld [vmem:[#allocation7 + $0x1208] sm:$0xff]  ;;  %v4162_v61 = vpack.c.bf16 %v636_v19, %v628_v54 }
 0x10d   :  { %4125 = vmatprep.subr.bf16.mxu0 %v4124_v2  ;;  %3933 = vmatprep.subr.bf16.mxu1 %v3932_v6  ;;  %v564_v2 = vld [vmem:[#allocation7 + $0x790] sm:$0xff]  ;;  %v581_v6 = vld [vmem:[#allocation7 + $0x818] sm:$0xff]  ;;  %v3954_v11 = vpack.c.bf16 %v826_v5, %v818_v1  ;;  %v970_v19 = vld [vmem:[#allocation7 + $0x1440] sm:$0xff] }
 0x10e   :  { %v4146_v10 = vpack.c.bf16 %v572_v3, %v564_v2  ;;  %v652_v1 = vld [vmem:[#allocation7 + $0xa50] sm:$0xff]  ;;  %v3972_v2 = vpack.c.bf16 %v907_v60, %v899_v59  ;;  %v906_v3 = vld [vmem:[#allocation7 + $0x1240] sm:$0xff]  ;;  %v669_v5 = vld [vmem:[#allocation7 + $0xad8] sm:$0xff] }
 0x110   :  { %4127 = vmatpush1.bf16.msra.mxu0 %v4126_v12  ;;  %3935 = vmatpush1.bf16.msra.mxu1 %v3934_v13  ;;  %v4148_v12 = vpack.c.bf16 %v589_v7, %v581_v6  ;;  %v834_v13 = vld [vmem:[#allocation7 + $0x1000] sm:$0xff]  ;;  %v915_v6 = vld [vmem:[#allocation7 + $0x1288] sm:$0xff] }
 0x111   :  { %4129 = vmatprep.subr.bf16.mxu0 %v4128_v14  ;;  %3937 = vmatprep.subr.bf16.mxu1 %v3936_v20  ;;  %v580_v14 = vld [vmem:[#allocation7 + $0x810] sm:$0xff]  ;;  %v597_v20 = vld [vmem:[#allocation7 + $0x898] sm:$0xff]  ;;  %v923_v7 = vld [vmem:[#allocation7 + $0x12c8] sm:$0xff] }
 0x112   :  { %v4150_v25 = vpack.c.bf16 %v588_v15, %v580_v14  ;;  %v3976_v14 = vpack.c.bf16 %v923_v7, %v915_v6  ;;  %v922_v15 = vld [vmem:[#allocation7 + $0x12c0] sm:$0xff] }
 0x114   :  { %4131 = vmatpush1.bf16.msra.mxu0 %v4130_v27  ;;  %3939 = vmatpush1.bf16.msra.mxu1 %v3938_v28  ;;  %v3958_v27 = vpack.c.bf16 %v842_v18, %v834_v13  ;;  %v4152_v28 = vpack.c.bf16 %v605_v21, %v597_v20  ;;  %v668_v13 = vld [vmem:[#allocation7 + $0xad0] sm:$0xff]  ;;  %v685_v18 = vld [vmem:[#allocation7 + $0xb58] sm:$0xff]  ;;  %v931_v20 = vld [vmem:[#allocation7 + $0x1308] sm:$0xff] }
 0x115   :  { %4133 = vmatprep.subr.bf16.mxu0 %v4132_v29  ;;  %3941 = vmatprep.subr.bf16.mxu1 %v3940_v33  ;;  %v850_v29 = vld [vmem:[#allocation7 + $0x1080] sm:$0xff]  ;;  %v939_v21 = vld [vmem:[#allocation7 + $0x1348] sm:$0xff] }
 0x116   :  { %v858_v33 = vld [vmem:[#allocation7 + $0x10c0] sm:$0xff] }
 0x118   :  { %4135 = vmatpush1.bf16.msra.mxu0 %v4134_v39  ;;  %3943 = vmatpush1.bf16.msra.mxu1 %v3942_v40  ;;  %v4154_v39 = vpack.c.bf16 %v604_v31, %v596_v30  ;;  %v3962_v40 = vpack.c.bf16 %v858_v33, %v850_v29  ;;  %v684_v29 = vld [vmem:[#allocation7 + $0xb50] sm:$0xff]  ;;  %v3980_v30 = vpack.c.bf16 %v939_v21, %v931_v20  ;;  %v938_v31 = vld [vmem:[#allocation7 + $0x1340] sm:$0xff]  ;;  %v701_v33 = vld [vmem:[#allocation7 + $0xbd8] sm:$0xff] }
 0x119   :  { %4137 = vmatprep.subr.bf16.mxu0 %v4136_v41  ;;  %3945 = vmatprep.subr.bf16.mxu1 %v3944_v45  ;;  %v4156_v41 = vpack.c.bf16 %v621_v35, %v613_v34  ;;  %v874_v45 = vld [vmem:[#allocation7 + $0x1140] sm:$0xff]  ;;  %v947_v34 = vld [vmem:[#allocation7 + $0x1388] sm:$0xff] }
 0x11a   :  { %v955_v35 = vld [vmem:[#allocation7 + $0x13c8] sm:$0xff] }
 0x11b   :  { %v3984_v43 = vpack.c.bf16 %v955_v35, %v947_v34 }
 0x11c   :  { %4139 = vmatpush1.bf16.msra.mxu0 %v4138_v51  ;;  %3947 = vmatpush1.bf16.msra.mxu1 %v3946_v52  ;;  %v3966_v51 = vpack.c.bf16 %v874_v45, %v866_v42  ;;  %v4160_v52 = vpack.c.bf16 %v637_v47, %v629_v46  ;;  %v700_v42 = vld [vmem:[#allocation7 + $0xbd0] sm:$0xff]  ;;  %v717_v45 = vld [vmem:[#allocation7 + $0xc58] sm:$0xff]  ;;  %v963_v46 = vld [vmem:[#allocation7 + $0x1408] sm:$0xff] }
 0x11d   :  { %4141 = vmatprep.subr.bf16.mxu0 %v4140_v53  ;;  %3949 = vmatprep.subr.bf16.mxu1 %v3948_v56  ;;  %v882_v53 = vld [vmem:[#allocation7 + $0x1180] sm:$0xff]  ;;  %v971_v47 = vld [vmem:[#allocation7 + $0x1448] sm:$0xff] }
 0x11e   :  { %v890_v56 = vld [vmem:[#allocation7 + $0x11c0] sm:$0xff]  ;;  %v3988_v54 = vpack.c.bf16 %v971_v47, %v963_v46 }
 0x120   :  { %4143 = vmatpush1.bf16.msra.mxu0 %v4142_v62  ;;  %3951 = vmatpush1.bf16.msra.mxu1 %v3950_v63  ;;  %v4164_v62 = vpack.c.bf16 %v653_v58, %v645_v57  ;;  %v898_v63 = vld [vmem:[#allocation7 + $0x1200] sm:$0xff]  ;;  %v979_v57 = vld [vmem:[#allocation7 + $0x1488] sm:$0xff] }
 0x121   :  { %4145 = vmatprep.subr.bf16.mxu0 %v4144_v0  ;;  %3953 = vmatprep.subr.bf16.mxu1 %v3952_v4  ;;  %v644_v0 = vld [vmem:[#allocation7 + $0xa10] sm:$0xff]  ;;  %v661_v4 = vld [vmem:[#allocation7 + $0xa98] sm:$0xff]  ;;  %v3974_v9 = vpack.c.bf16 %v906_v3, %v898_v63  ;;  %v987_v58 = vld [vmem:[#allocation7 + $0x14c8] sm:$0xff] }
 0x122   :  { %v4166_v8 = vpack.c.bf16 %v652_v1, %v644_v0  ;;  %v732_v63 = vld [vmem:[#allocation7 + $0xcd0] sm:$0xff]  ;;  %v3992_v0 = vpack.c.bf16 %v987_v58, %v979_v57  ;;  %v986_v1 = vld [vmem:[#allocation7 + $0x14c0] sm:$0xff]  ;;  %v749_v3 = vld [vmem:[#allocation7 + $0xd58] sm:$0xff] }
 0x124   :  { %4147 = vmatpush1.bf16.msra.mxu0 %v4146_v10  ;;  %3955 = vmatpush1.bf16.msra.mxu1 %v3954_v11  ;;  %v4168_v10 = vpack.c.bf16 %v669_v5, %v661_v4  ;;  %v914_v11 = vld [vmem:[#allocation7 + $0x1280] sm:$0xff]  ;;  %v995_v4 = vld [vmem:[#allocation7 + $0x1508] sm:$0xff] }
 0x125   :  { %4149 = vmatprep.subr.bf16.mxu0 %v4148_v12  ;;  %3957 = vmatprep.subr.bf16.mxu1 %v3956_v16  ;;  %v660_v12 = vld [vmem:[#allocation7 + $0xa90] sm:$0xff]  ;;  %v677_v16 = vld [vmem:[#allocation7 + $0xb18] sm:$0xff]  ;;  %v3978_v23 = vpack.c.bf16 %v922_v15, %v914_v11  ;;  %v1003_v5 = vld [vmem:[#allocation7 + $0x1548] sm:$0xff] }
 0x126   :  { %v4170_v22 = vpack.c.bf16 %v668_v13, %v660_v12  ;;  %v748_v11 = vld [vmem:[#allocation7 + $0xd50] sm:$0xff]  ;;  %v3996_v12 = vpack.c.bf16 %v1003_v5, %v995_v4  ;;  %v1002_v13 = vld [vmem:[#allocation7 + $0x1540] sm:$0xff]  ;;  %v765_v15 = vld [vmem:[#allocation7 + $0xdd8] sm:$0xff] }
 0x127   :  { %1737 = vmatmul.mubr.f32.vlgmr.msra.gmra.mrb[2].mxu0 %v5686_v17  ;;  %1524 = vmatmul.mubr.f32.vlgmr.msra.gmra.mrb[0].mxu1 %v5699_v24  ;;  %v3964_v17 = vpack.c.bf16 %v875_v37, %v867_v36 }
 0x128   :  { %4151 = vmatpush1.bf16.msra.mxu0 %v4150_v25  ;;  %3959 = vmatpush1.bf16.msra.mxu1 %v3958_v27  ;;  %v4172_v25 = vpack.c.bf16 %v685_v18, %v677_v16  ;;  %v930_v27 = vld [vmem:[#allocation7 + $0x1300] sm:$0xff]  ;;  %v1011_v16 = vld [vmem:[#allocation7 + $0x1588] sm:$0xff] }
 0x129   :  { %4153 = vmatprep.subr.bf16.mxu0 %v4152_v28  ;;  %3961 = vmatprep.subr.bf16.mxu1 %v3960_v32  ;;  %v676_v28 = vld [vmem:[#allocation7 + $0xb10] sm:$0xff]  ;;  %v693_v32 = vld [vmem:[#allocation7 + $0xb98] sm:$0xff]  ;;  %v3982_v37 = vpack.c.bf16 %v938_v31, %v930_v27  ;;  %v1019_v18 = vld [vmem:[#allocation7 + $0x15c8] sm:$0xff] }
 0x12a   :  { %1594 = vmatprep.mubr.f32.mxu1 %v5705_v38  ;;  %1807 = vmatprep.mubr.f32.mxu0 %v5693_v26  ;;  %v3970_v26 = vpack.c.bf16 %v890_v56, %v882_v53  ;;  %v4174_v36 = vpack.c.bf16 %v684_v29, %v676_v28  ;;  %v716_v53 = vld [vmem:[#allocation7 + $0xc50] sm:$0xff]  ;;  %v733_v56 = vld [vmem:[#allocation7 + $0xcd8] sm:$0xff]  ;;  %v4000_v28 = vpack.c.bf16 %v1019_v18, %v1011_v16  ;;  %v1018_v29 = vld [vmem:[#allocation7 + $0x15c0] sm:$0xff] }
 0x12b   :  { %v764_v27 = vld [vmem:[#allocation7 + $0xdd0] sm:$0xff]  ;;  %v781_v31 = vld [vmem:[#allocation7 + $0xe58] sm:$0xff] }
 0x12c   :  { %4155 = vmatpush1.bf16.msra.mxu0 %v4154_v39  ;;  %3963 = vmatpush1.bf16.msra.mxu1 %v3962_v40  ;;  %v4176_v39 = vpack.c.bf16 %v701_v33, %v693_v32  ;;  %v946_v40 = vld [vmem:[#allocation7 + $0x1380] sm:$0xff]  ;;  %v1027_v32 = vld [vmem:[#allocation7 + $0x1608] sm:$0xff] }
 0x12d   :  { %4157 = vmatprep.subr.bf16.mxu0 %v4156_v41  ;;  %3965 = vmatprep.subr.bf16.mxu1 %v3964_v17  ;;  %v692_v41 = vld [vmem:[#allocation7 + $0xb90] sm:$0xff]  ;;  %v709_v17 = vld [vmem:[#allocation7 + $0xc18] sm:$0xff]  ;;  %v3986_v49 = vpack.c.bf16 %v954_v44, %v946_v40  ;;  %v1035_v33 = vld [vmem:[#allocation7 + $0x1648] sm:$0xff] }
 0x12e   :  { %v4178_v48 = vpack.c.bf16 %v700_v42, %v692_v41  ;;  %v780_v40 = vld [vmem:[#allocation7 + $0xe50] sm:$0xff]  ;;  %v4004_v41 = vpack.c.bf16 %v1035_v33, %v1027_v32  ;;  %v1034_v42 = vld [vmem:[#allocation7 + $0x1640] sm:$0xff]  ;;  %v797_v44 = vld [vmem:[#allocation7 + $0xed8] sm:$0xff] }
 0x12f   :  { %v5713_v32 = vld [vmem:[%s5883_s1 + $0x20] sm:$0xff] }
 0x130   :  { %4159 = vmatpush1.bf16.msra.mxu0 %v4158_v50  ;;  %3967 = vmatpush1.bf16.msra.mxu1 %v3966_v51  ;;  %v4180_v50 = vpack.c.bf16 %v717_v45, %v709_v17  ;;  %v962_v51 = vld [vmem:[#allocation7 + $0x1400] sm:$0xff]  ;;  %v1043_v17 = vld [vmem:[#allocation7 + $0x1688] sm:$0xff] }
 0x131   :  { %4161 = vmatprep.subr.bf16.mxu0 %v4160_v52  ;;  %3969 = vmatprep.subr.bf16.mxu1 %v3968_v55  ;;  %v708_v52 = vld [vmem:[#allocation7 + $0xc10] sm:$0xff]  ;;  %v725_v55 = vld [vmem:[#allocation7 + $0xc98] sm:$0xff]  ;;  %v3990_v60 = vpack.c.bf16 %v970_v19, %v962_v51  ;;  %v1051_v45 = vld [vmem:[#allocation7 + $0x16c8] sm:$0xff] }
 0x132   :  { %v4182_v59 = vpack.c.bf16 %v716_v53, %v708_v52  ;;  %v796_v51 = vld [vmem:[#allocation7 + $0xed0] sm:$0xff]  ;;  %v4008_v52 = vpack.c.bf16 %v1051_v45, %v1043_v17  ;;  %v1050_v53 = vld [vmem:[#allocation7 + $0x16c0] sm:$0xff]  ;;  %v813_v19 = vld [vmem:[#allocation7 + $0xf58] sm:$0xff] }
 0x133   :  { %v1131_v17 = vld [vmem:[#allocation7 + $0x1948] sm:$0xff]  ;;  %v5719_v45 = vld [vmem:[%s5883_s1 + $0x38] sm:$0xff] }
 0x134   :  { %4163 = vmatpush1.bf16.msra.mxu0 %v4162_v61  ;;  %3971 = vmatpush1.bf16.msra.mxu1 %v3970_v26  ;;  %v4184_v61 = vpack.c.bf16 %v733_v56, %v725_v55  ;;  %v978_v26 = vld [vmem:[#allocation7 + $0x1480] sm:$0xff]  ;;  %v1059_v55 = vld [vmem:[#allocation7 + $0x1708] sm:$0xff] }
 0x135   :  { %4165 = vmatprep.subr.bf16.mxu0 %v4164_v62  ;;  %3973 = vmatprep.subr.bf16.mxu1 %v3972_v2  ;;  %v724_v62 = vld [vmem:[#allocation7 + $0xc90] sm:$0xff]  ;;  %v741_v2 = vld [vmem:[#allocation7 + $0xd18] sm:$0xff]  ;;  %v3994_v7 = vpack.c.bf16 %v986_v1, %v978_v26  ;;  %v1067_v56 = vld [vmem:[#allocation7 + $0x1748] sm:$0xff] }
 0x136   :  { %v4186_v6 = vpack.c.bf16 %v732_v63, %v724_v62  ;;  %v812_v26 = vld [vmem:[#allocation7 + $0xf50] sm:$0xff]  ;;  %v4012_v62 = vpack.c.bf16 %v1067_v56, %v1059_v55  ;;  %v1066_v63 = vld [vmem:[#allocation7 + $0x1740] sm:$0xff]  ;;  %v829_v1 = vld [vmem:[#allocation7 + $0xfd8] sm:$0xff] }
 0x137   :  { %v1147_v55 = vld [vmem:[#allocation7 + $0x19c8] sm:$0xff] }
 0x138   :  { %4167 = vmatpush1.bf16.msra.mxu0 %v4166_v8  ;;  %3975 = vmatpush1.bf16.msra.mxu1 %v3974_v9  ;;  %v4188_v8 = vpack.c.bf16 %v749_v3, %v741_v2  ;;  %v994_v9 = vld [vmem:[#allocation7 + $0x1500] sm:$0xff]  ;;  %v1075_v2 = vld [vmem:[#allocation7 + $0x1788] sm:$0xff] }
 0x139   :  { %4169 = vmatprep.subr.bf16.mxu0 %v4168_v10  ;;  %3977 = vmatprep.subr.bf16.mxu1 %v3976_v14  ;;  %v740_v10 = vld [vmem:[#allocation7 + $0xd10] sm:$0xff]  ;;  %v757_v14 = vld [vmem:[#allocation7 + $0xd98] sm:$0xff]  ;;  %v3998_v21 = vpack.c.bf16 %v1002_v13, %v994_v9  ;;  %v1083_v3 = vld [vmem:[#allocation7 + $0x17c8] sm:$0xff] }
 0x13a   :  { %v4190_v20 = vpack.c.bf16 %v748_v11, %v740_v10  ;;  %v828_v9 = vld [vmem:[#allocation7 + $0xfd0] sm:$0xff]  ;;  %v4016_v10 = vpack.c.bf16 %v1083_v3, %v1075_v2  ;;  %v1082_v11 = vld [vmem:[#allocation7 + $0x17c0] sm:$0xff]  ;;  %v845_v13 = vld [vmem:[#allocation7 + $0x1058] sm:$0xff] }
 0x13b   :  { %v1163_v2 = vld [vmem:[#allocation7 + $0x1a48] sm:$0xff] }
 0x13c   :  { %4171 = vmatpush1.bf16.msra.mxu0 %v4170_v22  ;;  %3979 = vmatpush1.bf16.msra.mxu1 %v3978_v23  ;;  %v4192_v22 = vpack.c.bf16 %v765_v15, %v757_v14  ;;  %v1010_v23 = vld [vmem:[#allocation7 + $0x1580] sm:$0xff]  ;;  %v1091_v14 = vld [vmem:[#allocation7 + $0x1808] sm:$0xff] }
 0x13d   :  { %4173 = vmatprep.subr.bf16.mxu0 %v4172_v25  ;;  %3981 = vmatprep.subr.bf16.mxu1 %v3980_v30  ;;  %v756_v25 = vld [vmem:[#allocation7 + $0xd90] sm:$0xff]  ;;  %v773_v30 = vld [vmem:[#allocation7 + $0xe18] sm:$0xff]  ;;  %v4002_v35 = vpack.c.bf16 %v1018_v29, %v1010_v23  ;;  %v1099_v15 = vld [vmem:[#allocation7 + $0x1848] sm:$0xff] }
 0x13e   :  { %v4194_v34 = vpack.c.bf16 %v764_v27, %v756_v25  ;;  %v844_v23 = vld [vmem:[#allocation7 + $0x1050] sm:$0xff]  ;;  %v4020_v25 = vpack.c.bf16 %v1099_v15, %v1091_v14  ;;  %v1098_v27 = vld [vmem:[#allocation7 + $0x1840] sm:$0xff]  ;;  %v861_v29 = vld [vmem:[#allocation7 + $0x10d8] sm:$0xff] }
 0x140   :  { %4175 = vmatpush1.bf16.msra.mxu0 %v4174_v36  ;;  %3983 = vmatpush1.bf16.msra.mxu1 %v3982_v37  ;;  %v4196_v36 = vpack.c.bf16 %v781_v31, %v773_v30  ;;  %v1026_v37 = vld [vmem:[#allocation7 + $0x1600] sm:$0xff]  ;;  %v1107_v30 = vld [vmem:[#allocation7 + $0x1888] sm:$0xff] }
 0x141   :  { %4177 = vmatprep.subr.bf16.mxu0 %v4176_v39  ;;  %3985 = vmatprep.subr.bf16.mxu1 %v3984_v43  ;;  %v772_v39 = vld [vmem:[#allocation7 + $0xe10] sm:$0xff]  ;;  %v789_v43 = vld [vmem:[#allocation7 + $0xe98] sm:$0xff]  ;;  %v4006_v47 = vpack.c.bf16 %v1034_v42, %v1026_v37  ;;  %v1115_v31 = vld [vmem:[#allocation7 + $0x18c8] sm:$0xff] }
 0x142   :  { %v4198_v46 = vpack.c.bf16 %v780_v40, %v772_v39  ;;  %v852_v37 = vld [vmem:[#allocation7 + $0x1090] sm:$0xff]  ;;  %v4024_v40 = vpack.c.bf16 %v1115_v31, %v1107_v30  ;;  %v869_v42 = vld [vmem:[#allocation7 + $0x1118] sm:$0xff] }
 0x143   :  { %v860_v39 = vld [vmem:[#allocation7 + $0x10d0] sm:$0xff] }
 0x144   :  { %4179 = vmatpush1.bf16.msra.mxu0 %v4178_v48  ;;  %3987 = vmatpush1.bf16.msra.mxu1 %v3986_v49  ;;  %v4200_v48 = vpack.c.bf16 %v797_v44, %v789_v43  ;;  %v1042_v49 = vld [vmem:[#allocation7 + $0x1680] sm:$0xff]  ;;  %v877_v43 = vld [vmem:[#allocation7 + $0x1158] sm:$0xff]  ;;  %v1123_v44 = vld [vmem:[#allocation7 + $0x1908] sm:$0xff] }
 0x145   :  { %4181 = vmatprep.subr.bf16.mxu0 %v4180_v50  ;;  %3989 = vmatprep.subr.bf16.mxu1 %v3988_v54  ;;  %v788_v50 = vld [vmem:[#allocation7 + $0xe90] sm:$0xff]  ;;  %v805_v54 = vld [vmem:[#allocation7 + $0xf18] sm:$0xff]  ;;  %v4010_v58 = vpack.c.bf16 %v1050_v53, %v1042_v49  ;;  %v1122_v49 = vld [vmem:[#allocation7 + $0x1900] sm:$0xff] }
 0x146   :  { %v4202_v57 = vpack.c.bf16 %v796_v51, %v788_v50  ;;  %v868_v50 = vld [vmem:[#allocation7 + $0x1110] sm:$0xff]  ;;  %v885_v53 = vld [vmem:[#allocation7 + $0x1198] sm:$0xff] }
 0x147   :  { %v876_v51 = vld [vmem:[#allocation7 + $0x1150] sm:$0xff] }
 0x148   :  { %4183 = vmatpush1.bf16.msra.mxu0 %v4182_v59  ;;  %3991 = vmatpush1.bf16.msra.mxu1 %v3990_v60  ;;  %v4204_v59 = vpack.c.bf16 %v813_v19, %v805_v54  ;;  %v1058_v60 = vld [vmem:[#allocation7 + $0x1700] sm:$0xff]  ;;  %v893_v54 = vld [vmem:[#allocation7 + $0x11d8] sm:$0xff]  ;;  %v1139_v19 = vld [vmem:[#allocation7 + $0x1988] sm:$0xff]  ;;  %v4222_v56 = vpack.c.bf16 %v876_v51, %v868_v50 }
 0x149   :  { %4185 = vmatprep.subr.bf16.mxu0 %v4184_v61  ;;  %3993 = vmatprep.subr.bf16.mxu1 %v3992_v0  ;;  %v804_v61 = vld [vmem:[#allocation7 + $0xf10] sm:$0xff]  ;;  %v821_v0 = vld [vmem:[#allocation7 + $0xf98] sm:$0xff]  ;;  %v4014_v5 = vpack.c.bf16 %v1066_v63, %v1058_v60  ;;  %v1210_v51 = vld [vmem:[#allocation7 + $0x1bc0] sm:$0xff] }
 0x14a   :  { %v4206_v4 = vpack.c.bf16 %v812_v26, %v804_v61  ;;  %v884_v60 = vld [vmem:[#allocation7 + $0x1190] sm:$0xff]  ;;  %v4032_v26 = vpack.c.bf16 %v1147_v55, %v1139_v19  ;;  %v901_v63 = vld [vmem:[#allocation7 + $0x1218] sm:$0xff] }
 0x14b   :  { %v892_v61 = vld [vmem:[#allocation7 + $0x11d0] sm:$0xff] }
 0x14c   :  { %4187 = vmatpush1.bf16.msra.mxu0 %v4186_v6  ;;  %3995 = vmatpush1.bf16.msra.mxu1 %v3994_v7  ;;  %v4208_v6 = vpack.c.bf16 %v829_v1, %v821_v0  ;;  %v1074_v7 = vld [vmem:[#allocation7 + $0x1780] sm:$0xff]  ;;  %v909_v0 = vld [vmem:[#allocation7 + $0x1258] sm:$0xff]  ;;  %v1155_v1 = vld [vmem:[#allocation7 + $0x1a08] sm:$0xff]  ;;  %v4226_v3 = vpack.c.bf16 %v892_v61, %v884_v60 }
 0x14d   :  { %4189 = vmatprep.subr.bf16.mxu0 %v4188_v8  ;;  %3997 = vmatprep.subr.bf16.mxu1 %v3996_v12  ;;  %v820_v8 = vld [vmem:[#allocation7 + $0xf90] sm:$0xff]  ;;  %v837_v12 = vld [vmem:[#allocation7 + $0x1018] sm:$0xff]  ;;  %v4018_v18 = vpack.c.bf16 %v1082_v11, %v1074_v7  ;;  %v1226_v61 = vld [vmem:[#allocation7 + $0x1c40] sm:$0xff] }
 0x14e   :  { %v4210_v16 = vpack.c.bf16 %v828_v9, %v820_v8  ;;  %v908_v7 = vld [vmem:[#allocation7 + $0x1250] sm:$0xff]  ;;  %v4036_v8 = vpack.c.bf16 %v1163_v2, %v1155_v1  ;;  %v1162_v9 = vld [vmem:[#allocation7 + $0x1a40] sm:$0xff]  ;;  %v925_v11 = vld [vmem:[#allocation7 + $0x12d8] sm:$0xff] }
 0x150   :  { %4191 = vmatpush1.bf16.msra.mxu0 %v4190_v20  ;;  %3999 = vmatpush1.bf16.msra.mxu1 %v3998_v21  ;;  %v4212_v20 = vpack.c.bf16 %v845_v13, %v837_v12  ;;  %v1090_v21 = vld [vmem:[#allocation7 + $0x1800] sm:$0xff]  ;;  %v1171_v12 = vld [vmem:[#allocation7 + $0x1a88] sm:$0xff] }
 0x151   :  { %4193 = vmatprep.subr.bf16.mxu0 %v4192_v22  ;;  %4001 = vmatprep.subr.bf16.mxu1 %v4000_v28  ;;  %v836_v22 = vld [vmem:[#allocation7 + $0x1010] sm:$0xff]  ;;  %v853_v28 = vld [vmem:[#allocation7 + $0x1098] sm:$0xff]  ;;  %v1179_v13 = vld [vmem:[#allocation7 + $0x1ac8] sm:$0xff] }
 0x152   :  { %v4214_v33 = vpack.c.bf16 %v844_v23, %v836_v22  ;;  %v4040_v22 = vpack.c.bf16 %v1179_v13, %v1171_v12  ;;  %v1178_v23 = vld [vmem:[#allocation7 + $0x1ac0] sm:$0xff] }
 0x154   :  { %4195 = vmatpush1.bf16.msra.mxu0 %v4194_v34  ;;  %4003 = vmatpush1.bf16.msra.mxu1 %v4002_v35  ;;  %v4022_v34 = vpack.c.bf16 %v1098_v27, %v1090_v21  ;;  %v4216_v35 = vpack.c.bf16 %v861_v29, %v853_v28  ;;  %v924_v21 = vld [vmem:[#allocation7 + $0x12d0] sm:$0xff]  ;;  %v941_v27 = vld [vmem:[#allocation7 + $0x1358] sm:$0xff]  ;;  %v1187_v28 = vld [vmem:[#allocation7 + $0x1b08] sm:$0xff] }
 0x155   :  { %4197 = vmatprep.subr.bf16.mxu0 %v4196_v36  ;;  %4005 = vmatprep.subr.bf16.mxu1 %v4004_v41  ;;  %v1106_v36 = vld [vmem:[#allocation7 + $0x1880] sm:$0xff]  ;;  %v1195_v29 = vld [vmem:[#allocation7 + $0x1b48] sm:$0xff] }
 0x156   :  { %v1114_v41 = vld [vmem:[#allocation7 + $0x18c0] sm:$0xff] }
 0x158   :  { %4199 = vmatpush1.bf16.msra.mxu0 %v4198_v46  ;;  %4007 = vmatpush1.bf16.msra.mxu1 %v4006_v47  ;;  %v4218_v46 = vpack.c.bf16 %v860_v39, %v852_v37  ;;  %v4026_v47 = vpack.c.bf16 %v1114_v41, %v1106_v36  ;;  %v940_v36 = vld [vmem:[#allocation7 + $0x1350] sm:$0xff]  ;;  %v4044_v37 = vpack.c.bf16 %v1195_v29, %v1187_v28  ;;  %v1194_v39 = vld [vmem:[#allocation7 + $0x1b40] sm:$0xff]  ;;  %v957_v41 = vld [vmem:[#allocation7 + $0x13d8] sm:$0xff] }
 0x159   :  { %4201 = vmatprep.subr.bf16.mxu0 %v4200_v48  ;;  %4009 = vmatprep.subr.bf16.mxu1 %v4008_v52  ;;  %v4220_v48 = vpack.c.bf16 %v877_v43, %v869_v42  ;;  %v1130_v52 = vld [vmem:[#allocation7 + $0x1940] sm:$0xff]  ;;  %v1203_v42 = vld [vmem:[#allocation7 + $0x1b88] sm:$0xff] }
 0x15a   :  { %v1211_v43 = vld [vmem:[#allocation7 + $0x1bc8] sm:$0xff] }
 0x15b   :  { %v4048_v50 = vpack.c.bf16 %v1211_v43, %v1203_v42 }
 0x15c   :  { %4203 = vmatpush1.bf16.msra.mxu0 %v4202_v57  ;;  %4011 = vmatpush1.bf16.msra.mxu1 %v4010_v58  ;;  %v4030_v57 = vpack.c.bf16 %v1130_v52, %v1122_v49  ;;  %v4224_v58 = vpack.c.bf16 %v893_v54, %v885_v53  ;;  %v956_v49 = vld [vmem:[#allocation7 + $0x13d0] sm:$0xff]  ;;  %v973_v52 = vld [vmem:[#allocation7 + $0x1458] sm:$0xff]  ;;  %v1219_v53 = vld [vmem:[#allocation7 + $0x1c08] sm:$0xff] }
 0x15d   :  { %4205 = vmatprep.subr.bf16.mxu0 %v4204_v59  ;;  %4013 = vmatprep.subr.bf16.mxu1 %v4012_v62  ;;  %v1138_v59 = vld [vmem:[#allocation7 + $0x1980] sm:$0xff]  ;;  %v1227_v54 = vld [vmem:[#allocation7 + $0x1c48] sm:$0xff] }
 0x15e   :  { %v1146_v62 = vld [vmem:[#allocation7 + $0x19c0] sm:$0xff]  ;;  %v4052_v60 = vpack.c.bf16 %v1227_v54, %v1219_v53 }
 0x160   :  { %4207 = vmatpush1.bf16.msra.mxu0 %v4206_v4  ;;  %4015 = vmatpush1.bf16.msra.mxu1 %v4014_v5  ;;  %v4228_v4 = vpack.c.bf16 %v909_v0, %v901_v63  ;;  %v1154_v5 = vld [vmem:[#allocation7 + $0x1a00] sm:$0xff]  ;;  %v1235_v63 = vld [vmem:[#allocation7 + $0x1c88] sm:$0xff] }
 0x161   :  { %4209 = vmatprep.subr.bf16.mxu0 %v4208_v6  ;;  %4017 = vmatprep.subr.bf16.mxu1 %v4016_v10  ;;  %v900_v6 = vld [vmem:[#allocation7 + $0x1210] sm:$0xff]  ;;  %v917_v10 = vld [vmem:[#allocation7 + $0x1298] sm:$0xff]  ;;  %v4038_v15 = vpack.c.bf16 %v1162_v9, %v1154_v5  ;;  %v1243_v0 = vld [vmem:[#allocation7 + $0x1cc8] sm:$0xff] }
 0x162   :  { %v4230_v14 = vpack.c.bf16 %v908_v7, %v900_v6  ;;  %v988_v5 = vld [vmem:[#allocation7 + $0x14d0] sm:$0xff]  ;;  %v4056_v6 = vpack.c.bf16 %v1243_v0, %v1235_v63  ;;  %v1242_v7 = vld [vmem:[#allocation7 + $0x1cc0] sm:$0xff]  ;;  %v1005_v9 = vld [vmem:[#allocation7 + $0x1558] sm:$0xff] }
 0x164   :  { %4211 = vmatpush1.bf16.msra.mxu0 %v4210_v16  ;;  %4019 = vmatpush1.bf16.msra.mxu1 %v4018_v18  ;;  %v4232_v16 = vpack.c.bf16 %v925_v11, %v917_v10  ;;  %v1170_v18 = vld [vmem:[#allocation7 + $0x1a80] sm:$0xff]  ;;  %v1251_v10 = vld [vmem:[#allocation7 + $0x1d08] sm:$0xff] }
 0x165   :  { %4213 = vmatprep.subr.bf16.mxu0 %v4212_v20  ;;  %4021 = vmatprep.subr.bf16.mxu1 %v4020_v25  ;;  %v916_v20 = vld [vmem:[#allocation7 + $0x1290] sm:$0xff]  ;;  %v933_v25 = vld [vmem:[#allocation7 + $0x1318] sm:$0xff]  ;;  %v4042_v31 = vpack.c.bf16 %v1178_v23, %v1170_v18  ;;  %v1259_v11 = vld [vmem:[#allocation7 + $0x1d48] sm:$0xff] }
 0x166   :  { %v4234_v30 = vpack.c.bf16 %v924_v21, %v916_v20  ;;  %v1004_v18 = vld [vmem:[#allocation7 + $0x1550] sm:$0xff]  ;;  %v4060_v20 = vpack.c.bf16 %v1259_v11, %v1251_v10  ;;  %v1258_v21 = vld [vmem:[#allocation7 + $0x1d40] sm:$0xff]  ;;  %v1021_v23 = vld [vmem:[#allocation7 + $0x15d8] sm:$0xff] }
 0x167   :  { %1808 = vmatmul.mubr.f32.vlgmr.msra.gmra.mrb[2].mxu0 %v5699_v24  ;;  %1595 = vmatmul.mubr.f32.vlgmr.msra.gmra.mrb[0].mxu1 %v5713_v32  ;;  %v4028_v24 = vpack.c.bf16 %v1131_v17, %v1123_v44 }
 0x168   :  { %4215 = vmatpush1.bf16.msra.mxu0 %v4214_v33  ;;  %4023 = vmatpush1.bf16.msra.mxu1 %v4022_v34  ;;  %v4236_v33 = vpack.c.bf16 %v941_v27, %v933_v25  ;;  %v1186_v34 = vld [vmem:[#allocation7 + $0x1b00] sm:$0xff]  ;;  %v1267_v25 = vld [vmem:[#allocation7 + $0x1d88] sm:$0xff] }
 0x169   :  { %4217 = vmatprep.subr.bf16.mxu0 %v4216_v35  ;;  %4025 = vmatprep.subr.bf16.mxu1 %v4024_v40  ;;  %v932_v35 = vld [vmem:[#allocation7 + $0x1310] sm:$0xff]  ;;  %v949_v40 = vld [vmem:[#allocation7 + $0x1398] sm:$0xff]  ;;  %v4046_v17 = vpack.c.bf16 %v1194_v39, %v1186_v34  ;;  %v1275_v27 = vld [vmem:[#allocation7 + $0x1dc8] sm:$0xff] }
 0x16a   :  { %1665 = vmatprep.mubr.f32.mxu1 %v5719_v45  ;;  %1878 = vmatprep.mubr.f32.mxu0 %v5705_v38  ;;  %v4034_v38 = vpack.c.bf16 %v1146_v62, %v1138_v59  ;;  %v4238_v44 = vpack.c.bf16 %v940_v36, %v932_v35  ;;  %v972_v59 = vld [vmem:[#allocation7 + $0x1450] sm:$0xff]  ;;  %v989_v62 = vld [vmem:[#allocation7 + $0x14d8] sm:$0xff]  ;;  %v4064_v35 = vpack.c.bf16 %v1275_v27, %v1267_v25  ;;  %v1274_v36 = vld [vmem:[#allocation7 + $0x1dc0] sm:$0xff] }
 0x16b   :  { %v1020_v34 = vld [vmem:[#allocation7 + $0x15d0] sm:$0xff]  ;;  %v1037_v39 = vld [vmem:[#allocation7 + $0x1658] sm:$0xff] }
 0x16c   :  { %4219 = vmatpush1.bf16.msra.mxu0 %v4218_v46  ;;  %4027 = vmatpush1.bf16.msra.mxu1 %v4026_v47  ;;  %v4240_v46 = vpack.c.bf16 %v957_v41, %v949_v40  ;;  %v1202_v47 = vld [vmem:[#allocation7 + $0x1b80] sm:$0xff]  ;;  %v1283_v40 = vld [vmem:[#allocation7 + $0x1e08] sm:$0xff] }
 0x16d   :  { %4221 = vmatprep.subr.bf16.mxu0 %v4220_v48  ;;  %4029 = vmatprep.subr.bf16.mxu1 %v4028_v24  ;;  %v948_v48 = vld [vmem:[#allocation7 + $0x1390] sm:$0xff]  ;;  %v965_v24 = vld [vmem:[#allocation7 + $0x1418] sm:$0xff]  ;;  %v4050_v55 = vpack.c.bf16 %v1210_v51, %v1202_v47  ;;  %v1291_v41 = vld [vmem:[#allocation7 + $0x1e48] sm:$0xff] }
 0x16e   :  { %v4242_v19 = vpack.c.bf16 %v956_v49, %v948_v48  ;;  %v1036_v47 = vld [vmem:[#allocation7 + $0x1650] sm:$0xff]  ;;  %v4068_v48 = vpack.c.bf16 %v1291_v41, %v1283_v40  ;;  %v1290_v49 = vld [vmem:[#allocation7 + $0x1e40] sm:$0xff]  ;;  %v1053_v51 = vld [vmem:[#allocation7 + $0x16d8] sm:$0xff] }
 0x16f   :  { %v5727_v40 = vld [vmem:[%s5883_s1 + $0x30] sm:$0xff] }
 0x170   :  { %4223 = vmatpush1.bf16.msra.mxu0 %v4222_v56  ;;  %4031 = vmatpush1.bf16.msra.mxu1 %v4030_v57  ;;  %v4244_v56 = vpack.c.bf16 %v973_v52, %v965_v24  ;;  %v1218_v57 = vld [vmem:[#allocation7 + $0x1c00] sm:$0xff]  ;;  %v1299_v24 = vld [vmem:[#allocation7 + $0x1e88] sm:$0xff] }
 0x171   :  { %4225 = vmatprep.subr.bf16.mxu0 %v4224_v58  ;;  %4033 = vmatprep.subr.bf16.mxu1 %v4032_v26  ;;  %v964_v58 = vld [vmem:[#allocation7 + $0x1410] sm:$0xff]  ;;  %v981_v26 = vld [vmem:[#allocation7 + $0x1498] sm:$0xff]  ;;  %v4054_v2 = vpack.c.bf16 %v1226_v61, %v1218_v57  ;;  %v1307_v52 = vld [vmem:[#allocation7 + $0x1ec8] sm:$0xff] }
 0x172   :  { %v4246_v1 = vpack.c.bf16 %v972_v59, %v964_v58  ;;  %v1052_v57 = vld [vmem:[#allocation7 + $0x16d0] sm:$0xff]  ;;  %v4072_v58 = vpack.c.bf16 %v1307_v52, %v1299_v24  ;;  %v1306_v59 = vld [vmem:[#allocation7 + $0x1ec0] sm:$0xff]  ;;  %v1069_v61 = vld [vmem:[#allocation7 + $0x1758] sm:$0xff] }
 0x173   :  { %v367_v24 = vld [vmem:[#allocation7 + $0x168] sm:$0xff] }
 0x174   :  { %4227 = vmatpush1.bf16.msra.mxu0 %v4226_v3  ;;  %4035 = vmatpush1.bf16.msra.mxu1 %v4034_v38  ;;  %v4248_v3 = vpack.c.bf16 %v989_v62, %v981_v26  ;;  %v1234_v38 = vld [vmem:[#allocation7 + $0x1c80] sm:$0xff]  ;;  %v1315_v26 = vld [vmem:[#allocation7 + $0x1f08] sm:$0xff] }
 0x175   :  { %4229 = vmatprep.subr.bf16.mxu0 %v4228_v4  ;;  %4037 = vmatprep.subr.bf16.mxu1 %v4036_v8  ;;  %v980_v4 = vld [vmem:[#allocation7 + $0x1490] sm:$0xff]  ;;  %v997_v8 = vld [vmem:[#allocation7 + $0x1518] sm:$0xff]  ;;  %v4058_v13 = vpack.c.bf16 %v1242_v7, %v1234_v38  ;;  %v1323_v62 = vld [vmem:[#allocation7 + $0x1f48] sm:$0xff] }
 0x176   :  { %v4250_v12 = vpack.c.bf16 %v988_v5, %v980_v4  ;;  %v1068_v38 = vld [vmem:[#allocation7 + $0x1750] sm:$0xff]  ;;  %v4076_v4 = vpack.c.bf16 %v1323_v62, %v1315_v26  ;;  %v1322_v5 = vld [vmem:[#allocation7 + $0x1f40] sm:$0xff]  ;;  %v1085_v7 = vld [vmem:[#allocation7 + $0x17d8] sm:$0xff] }
 0x177   :  { %v5735_v26 = vld [vmem:[%s5883_s1 + $0x8] sm:$0xff] }
 0x178   :  { %4231 = vmatpush1.bf16.msra.mxu0 %v4230_v14  ;;  %4039 = vmatpush1.bf16.msra.mxu1 %v4038_v15  ;;  %v4252_v14 = vpack.c.bf16 %v1005_v9, %v997_v8  ;;  %v1250_v15 = vld [vmem:[#allocation7 + $0x1d00] sm:$0xff]  ;;  %v1331_v8 = vld [vmem:[#allocation7 + $0x1f88] sm:$0xff] }
 0x179   :  { %4233 = vmatprep.subr.bf16.mxu0 %v4232_v16  ;;  %4041 = vmatprep.subr.bf16.mxu1 %v4040_v22  ;;  %v996_v16 = vld [vmem:[#allocation7 + $0x1510] sm:$0xff]  ;;  %v1013_v22 = vld [vmem:[#allocation7 + $0x1598] sm:$0xff]  ;;  %v4062_v29 = vpack.c.bf16 %v1258_v21, %v1250_v15  ;;  %v1339_v9 = vld [vmem:[#allocation7 + $0x1fc8] sm:$0xff] }
 0x17a   :  { %v4254_v28 = vpack.c.bf16 %v1004_v18, %v996_v16  ;;  %v1084_v15 = vld [vmem:[#allocation7 + $0x17d0] sm:$0xff]  ;;  %v4080_v16 = vpack.c.bf16 %v1339_v9, %v1331_v8  ;;  %v1338_v18 = vld [vmem:[#allocation7 + $0x1fc0] sm:$0xff]  ;;  %v1101_v21 = vld [vmem:[#allocation7 + $0x1858] sm:$0xff] }
 0x17c   :  { %4235 = vmatpush1.bf16.msra.mxu0 %v4234_v30  ;;  %4043 = vmatpush1.bf16.msra.mxu1 %v4042_v31  ;;  %v4256_v30 = vpack.c.bf16 %v1021_v23, %v1013_v22  ;;  %v1266_v31 = vld [vmem:[#allocation7 + $0x1d80] sm:$0xff]  ;;  %v327_v22 = vld [vmem:[#allocation7 + $0x28] sm:$0xff] }
 0x17d   :  { %4237 = vmatprep.subr.bf16.mxu0 %v4236_v33  ;;  %4045 = vmatprep.subr.bf16.mxu1 %v4044_v37  ;;  %v1012_v33 = vld [vmem:[#allocation7 + $0x1590] sm:$0xff]  ;;  %v1029_v37 = vld [vmem:[#allocation7 + $0x1618] sm:$0xff]  ;;  %v4066_v43 = vpack.c.bf16 %v1274_v36, %v1266_v31  ;;  %v335_v23 = vld [vmem:[#allocation7 + $0x68] sm:$0xff] }
 0x17e   :  { %v4258_v42 = vpack.c.bf16 %v1020_v34, %v1012_v33  ;;  %v326_v31 = vld [vmem:[#allocation7 + $0x20] sm:$0xff]  ;;  %v4340_v33 = vpack.c.bf16 %v335_v23, %v327_v22  ;;  %v1117_v36 = vld [vmem:[#allocation7 + $0x18d8] sm:$0xff] }
 0x17f   :  { %v334_v34 = vld [vmem:[#allocation7 + $0x60] sm:$0xff] }
 0x180   :  { %4239 = vmatpush1.bf16.msra.mxu0 %v4238_v44  ;;  %4047 = vmatpush1.bf16.msra.mxu1 %v4046_v17  ;;  %v4260_v44 = vpack.c.bf16 %v1037_v39, %v1029_v37  ;;  %v1282_v17 = vld [vmem:[#allocation7 + $0x1e00] sm:$0xff]  ;;  %v343_v37 = vld [vmem:[#allocation7 + $0xa8] sm:$0xff] }
 0x181   :  { %4241 = vmatprep.subr.bf16.mxu0 %v4240_v46  ;;  %4049 = vmatprep.subr.bf16.mxu1 %v4048_v50  ;;  %v1028_v46 = vld [vmem:[#allocation7 + $0x1610] sm:$0xff]  ;;  %v1045_v50 = vld [vmem:[#allocation7 + $0x1698] sm:$0xff]  ;;  %v4070_v54 = vpack.c.bf16 %v1290_v49, %v1282_v17  ;;  %v351_v39 = vld [vmem:[#allocation7 + $0xe8] sm:$0xff] }
 0x182   :  { %v4262_v53 = vpack.c.bf16 %v1036_v47, %v1028_v46  ;;  %v1116_v17 = vld [vmem:[#allocation7 + $0x18d0] sm:$0xff]  ;;  %v342_v46 = vld [vmem:[#allocation7 + $0xa0] sm:$0xff]  ;;  %v4344_v47 = vpack.c.bf16 %v351_v39, %v343_v37  ;;  %v1125_v49 = vld [vmem:[#allocation7 + $0x1918] sm:$0xff] }
 0x184   :  { %4243 = vmatpush1.bf16.msra.mxu0 %v4242_v19  ;;  %4051 = vmatpush1.bf16.msra.mxu1 %v4050_v55  ;;  %v4264_v19 = vpack.c.bf16 %v1053_v51, %v1045_v50  ;;  %v1298_v55 = vld [vmem:[#allocation7 + $0x1e80] sm:$0xff]  ;;  %v1133_v50 = vld [vmem:[#allocation7 + $0x1958] sm:$0xff]  ;;  %v359_v51 = vld [vmem:[#allocation7 + $0x128] sm:$0xff] }
 0x185   :  { %4245 = vmatprep.subr.bf16.mxu0 %v4244_v56  ;;  %4053 = vmatprep.subr.bf16.mxu1 %v4052_v60  ;;  %v1044_v56 = vld [vmem:[#allocation7 + $0x1690] sm:$0xff]  ;;  %v1061_v60 = vld [vmem:[#allocation7 + $0x1718] sm:$0xff]  ;;  %v4074_v0 = vpack.c.bf16 %v1306_v59, %v1298_v55 }
 0x186   :  { %v4266_v63 = vpack.c.bf16 %v1052_v57, %v1044_v56  ;;  %v1132_v55 = vld [vmem:[#allocation7 + $0x1950] sm:$0xff]  ;;  %v358_v56 = vld [vmem:[#allocation7 + $0x120] sm:$0xff]  ;;  %v4348_v57 = vpack.c.bf16 %v367_v24, %v359_v51  ;;  %v1141_v59 = vld [vmem:[#allocation7 + $0x1998] sm:$0xff] }
 0x187   :  { %v439_v51 = vld [vmem:[#allocation7 + $0x3a8] sm:$0xff] }
 0x188   :  { %4247 = vmatpush1.bf16.msra.mxu0 %v4246_v1  ;;  %4055 = vmatpush1.bf16.msra.mxu1 %v4054_v2  ;;  %v4268_v1 = vpack.c.bf16 %v1069_v61, %v1061_v60  ;;  %v1314_v2 = vld [vmem:[#allocation7 + $0x1f00] sm:$0xff]  ;;  %v1149_v60 = vld [vmem:[#allocation7 + $0x19d8] sm:$0xff]  ;;  %v383_v61 = vld [vmem:[#allocation7 + $0x1e8] sm:$0xff] }
 0x189   :  { %4249 = vmatprep.subr.bf16.mxu0 %v4248_v3  ;;  %4057 = vmatprep.subr.bf16.mxu1 %v4056_v6  ;;  %v1060_v3 = vld [vmem:[#allocation7 + $0x1710] sm:$0xff]  ;;  %v1077_v6 = vld [vmem:[#allocation7 + $0x1798] sm:$0xff]  ;;  %v4078_v11 = vpack.c.bf16 %v1322_v5, %v1314_v2  ;;  %v447_v24 = vld [vmem:[#allocation7 + $0x3e8] sm:$0xff] }
 0x18a   :  { %v4270_v10 = vpack.c.bf16 %v1068_v38, %v1060_v3  ;;  %v1148_v2 = vld [vmem:[#allocation7 + $0x19d0] sm:$0xff]  ;;  %v374_v3 = vld [vmem:[#allocation7 + $0x1a0] sm:$0xff]  ;;  %v1165_v5 = vld [vmem:[#allocation7 + $0x1a58] sm:$0xff] }
 0x18b   :  { %v382_v38 = vld [vmem:[#allocation7 + $0x1e0] sm:$0xff] }
 0x18c   :  { %4251 = vmatpush1.bf16.msra.mxu0 %v4250_v12  ;;  %4059 = vmatpush1.bf16.msra.mxu1 %v4058_v13  ;;  %v4272_v12 = vpack.c.bf16 %v1085_v7, %v1077_v6  ;;  %v1330_v13 = vld [vmem:[#allocation7 + $0x1f80] sm:$0xff]  ;;  %v391_v6 = vld [vmem:[#allocation7 + $0x228] sm:$0xff]  ;;  %v4354_v9 = vpack.c.bf16 %v382_v38, %v374_v3 }
 0x18d   :  { %4253 = vmatprep.subr.bf16.mxu0 %v4252_v14  ;;  %4061 = vmatprep.subr.bf16.mxu1 %v4060_v20  ;;  %v1076_v14 = vld [vmem:[#allocation7 + $0x1790] sm:$0xff]  ;;  %v1093_v20 = vld [vmem:[#allocation7 + $0x1818] sm:$0xff]  ;;  %v4082_v27 = vpack.c.bf16 %v1338_v18, %v1330_v13  ;;  %v399_v7 = vld [vmem:[#allocation7 + $0x268] sm:$0xff] }
 0x18e   :  { %v4274_v25 = vpack.c.bf16 %v1084_v15, %v1076_v14  ;;  %v390_v13 = vld [vmem:[#allocation7 + $0x220] sm:$0xff]  ;;  %v4356_v14 = vpack.c.bf16 %v399_v7, %v391_v6  ;;  %v1181_v18 = vld [vmem:[#allocation7 + $0x1ad8] sm:$0xff]  ;;  %v471_v6 = vld [vmem:[#allocation7 + $0x4a8] sm:$0xff] }
 0x18f   :  { %v398_v15 = vld [vmem:[#allocation7 + $0x260] sm:$0xff]  ;;  %v479_v7 = vld [vmem:[#allocation7 + $0x4e8] sm:$0xff] }
 0x190   :  { %4255 = vmatpush1.bf16.msra.mxu0 %v4254_v28  ;;  %4063 = vmatpush1.bf16.msra.mxu1 %v4062_v29  ;;  %v4276_v28 = vpack.c.bf16 %v1101_v21, %v1093_v20  ;;  %v1092_v29 = vld [vmem:[#allocation7 + $0x1810] sm:$0xff]  ;;  %v407_v20 = vld [vmem:[#allocation7 + $0x2a8] sm:$0xff]  ;;  %v4358_v23 = vpack.c.bf16 %v398_v15, %v390_v13  ;;  %v454_v3 = vld [vmem:[#allocation7 + $0x420] sm:$0xff] }
 0x191   :  { %4257 = vmatprep.subr.bf16.mxu0 %v4256_v30  ;;  %4065 = vmatprep.subr.bf16.mxu1 %v4064_v35  ;;  %v1100_v30 = vld [vmem:[#allocation7 + $0x1850] sm:$0xff]  ;;  %v1109_v35 = vld [vmem:[#allocation7 + $0x1898] sm:$0xff]  ;;  %v415_v21 = vld [vmem:[#allocation7 + $0x2e8] sm:$0xff] }
 0x192   :  { %v4278_v41 = vpack.c.bf16 %v1100_v30, %v1092_v29  ;;  %v406_v29 = vld [vmem:[#allocation7 + $0x2a0] sm:$0xff]  ;;  %v4360_v30 = vpack.c.bf16 %v415_v21, %v407_v20  ;;  %v487_v20 = vld [vmem:[#allocation7 + $0x528] sm:$0xff] }
 0x193   :  { %v462_v38 = vld [vmem:[#allocation7 + $0x460] sm:$0xff]  ;;  %v495_v21 = vld [vmem:[#allocation7 + $0x568] sm:$0xff] }
 0x194   :  { %4259 = vmatpush1.bf16.msra.mxu0 %v4258_v42  ;;  %4067 = vmatpush1.bf16.msra.mxu1 %v4066_v43  ;;  %v4342_v42 = vpack.c.bf16 %v334_v34, %v326_v31  ;;  %v4280_v43 = vpack.c.bf16 %v1117_v36, %v1109_v35  ;;  %v414_v31 = vld [vmem:[#allocation7 + $0x2e0] sm:$0xff]  ;;  %v1197_v34 = vld [vmem:[#allocation7 + $0x1b58] sm:$0xff]  ;;  %v423_v35 = vld [vmem:[#allocation7 + $0x328] sm:$0xff] }
 0x195   :  { %4261 = vmatprep.subr.bf16.mxu0 %v4260_v44  ;;  %4069 = vmatprep.subr.bf16.mxu1 %v4068_v48  ;;  %v1108_v44 = vld [vmem:[#allocation7 + $0x1890] sm:$0xff]  ;;  %v350_v48 = vld [vmem:[#allocation7 + $0xe0] sm:$0xff]  ;;  %v431_v36 = vld [vmem:[#allocation7 + $0x368] sm:$0xff]  ;;  %v4362_v39 = vpack.c.bf16 %v414_v31, %v406_v29 }
 0x196   :  { %v4282_v52 = vpack.c.bf16 %v1116_v17, %v1108_v44  ;;  %v422_v44 = vld [vmem:[#allocation7 + $0x320] sm:$0xff] }
 0x197   :  { %v470_v13 = vld [vmem:[#allocation7 + $0x4a0] sm:$0xff] }
 0x198   :  { %4263 = vmatpush1.bf16.msra.mxu0 %v4262_v53  ;;  %4071 = vmatpush1.bf16.msra.mxu1 %v4070_v54  ;;  %v4346_v53 = vpack.c.bf16 %v350_v48, %v342_v46  ;;  %v4284_v54 = vpack.c.bf16 %v1133_v50, %v1125_v49  ;;  %v4364_v46 = vpack.c.bf16 %v431_v36, %v423_v35  ;;  %v1205_v48 = vld [vmem:[#allocation7 + $0x1b98] sm:$0xff]  ;;  %v478_v15 = vld [vmem:[#allocation7 + $0x4e0] sm:$0xff]  ;;  %v503_v35 = vld [vmem:[#allocation7 + $0x5a8] sm:$0xff] }
 0x199   :  { %4265 = vmatprep.subr.bf16.mxu0 %v4264_v19  ;;  %4073 = vmatprep.subr.bf16.mxu1 %v4072_v58  ;;  %v1124_v19 = vld [vmem:[#allocation7 + $0x1910] sm:$0xff]  ;;  %v366_v58 = vld [vmem:[#allocation7 + $0x160] sm:$0xff]  ;;  %v1213_v49 = vld [vmem:[#allocation7 + $0x1bd8] sm:$0xff] }
 0x19a   :  { %v4286_v62 = vpack.c.bf16 %v1132_v55, %v1124_v19  ;;  %v1204_v19 = vld [vmem:[#allocation7 + $0x1b90] sm:$0xff]  ;;  %v486_v29 = vld [vmem:[#allocation7 + $0x520] sm:$0xff]  ;;  %v511_v36 = vld [vmem:[#allocation7 + $0x5e8] sm:$0xff] }
 0x19b   :  { %v1212_v55 = vld [vmem:[#allocation7 + $0x1bd0] sm:$0xff]  ;;  %v494_v31 = vld [vmem:[#allocation7 + $0x560] sm:$0xff] }
 0x19c   :  { %4267 = vmatpush1.bf16.msra.mxu0 %v4266_v63  ;;  %4075 = vmatpush1.bf16.msra.mxu1 %v4074_v0  ;;  %v4350_v63 = vpack.c.bf16 %v366_v58, %v358_v56  ;;  %v4288_v0 = vpack.c.bf16 %v1149_v60, %v1141_v59  ;;  %v438_v56 = vld [vmem:[#allocation7 + $0x3a0] sm:$0xff]  ;;  %v1221_v59 = vld [vmem:[#allocation7 + $0x1c18] sm:$0xff] }
 0x19d   :  { %4269 = vmatprep.subr.bf16.mxu0 %v4268_v1  ;;  %4077 = vmatprep.subr.bf16.mxu1 %v4076_v4  ;;  %v1140_v1 = vld [vmem:[#allocation7 + $0x1990] sm:$0xff]  ;;  %v1157_v4 = vld [vmem:[#allocation7 + $0x1a18] sm:$0xff]  ;;  %v446_v58 = vld [vmem:[#allocation7 + $0x3e0] sm:$0xff] }
 0x19e   :  { %v4290_v8 = vpack.c.bf16 %v1148_v2, %v1140_v1  ;;  %v1229_v60 = vld [vmem:[#allocation7 + $0x1c58] sm:$0xff]  ;;  %v1220_v1 = vld [vmem:[#allocation7 + $0x1c10] sm:$0xff] }
 0x19f   :  { %v1228_v2 = vld [vmem:[#allocation7 + $0x1c50] sm:$0xff] }
 0x1a0   :  { %4271 = vmatpush1.bf16.msra.mxu0 %v4270_v10  ;;  %4079 = vmatpush1.bf16.msra.mxu1 %v4078_v11  ;;  %v4292_v10 = vpack.c.bf16 %v1165_v5, %v1157_v4  ;;  %v1156_v11 = vld [vmem:[#allocation7 + $0x1a10] sm:$0xff]  ;;  %v1237_v4 = vld [vmem:[#allocation7 + $0x1c98] sm:$0xff] }
 0x1a1   :  { %4273 = vmatprep.subr.bf16.mxu0 %v4272_v12  ;;  %4081 = vmatprep.subr.bf16.mxu1 %v4080_v16  ;;  %v1164_v12 = vld [vmem:[#allocation7 + $0x1a50] sm:$0xff]  ;;  %v1173_v16 = vld [vmem:[#allocation7 + $0x1a98] sm:$0xff] }
 0x1a2   :  { %v4294_v22 = vpack.c.bf16 %v1164_v12, %v1156_v11  ;;  %v1245_v5 = vld [vmem:[#allocation7 + $0x1cd8] sm:$0xff]  ;;  %v1236_v11 = vld [vmem:[#allocation7 + $0x1c90] sm:$0xff] }
 0x1a3   :  { %v1244_v12 = vld [vmem:[#allocation7 + $0x1cd0] sm:$0xff] }
 0x1a4   :  { %4275 = vmatpush1.bf16.msra.mxu0 %v4274_v25  ;;  %4083 = vmatpush1.bf16.msra.mxu1 %v4082_v27  ;;  %v4296_v25 = vpack.c.bf16 %v1181_v18, %v1173_v16  ;;  %v1172_v27 = vld [vmem:[#allocation7 + $0x1a90] sm:$0xff]  ;;  %v1253_v16 = vld [vmem:[#allocation7 + $0x1d18] sm:$0xff] }
 0x1a5   :  { %4277 = vmatprep.subr.bf16.mxu0 %v4276_v28  ;;  %4341 = vmatprep.subr.bf16.mxu1 %v4340_v33  ;;  %v1180_v28 = vld [vmem:[#allocation7 + $0x1ad0] sm:$0xff]  ;;  %v1189_v33 = vld [vmem:[#allocation7 + $0x1b18] sm:$0xff] }
 0x1a6   :  { %v4298_v37 = vpack.c.bf16 %v1180_v28, %v1172_v27  ;;  %v1261_v18 = vld [vmem:[#allocation7 + $0x1d58] sm:$0xff]  ;;  %v1252_v27 = vld [vmem:[#allocation7 + $0x1d10] sm:$0xff] }
 0x1a7   :  { %1879 = vmatmul.mubr.f32.vlgmr.msra.gmra.mrb[2].mxu0 %v5713_v32  ;;  %1666 = vmatmul.mubr.f32.vlgmr.msra.gmra.mrb[0].mxu1 %v5727_v40  ;;  %v375_v32 = vld [vmem:[#allocation7 + $0x1a8] sm:$0xff]  ;;  %v1260_v28 = vld [vmem:[#allocation7 + $0x1d50] sm:$0xff] }
 0x1a8   :  { %4279 = vmatpush1.bf16.msra.mxu0 %v4278_v41  ;;  %4343 = vmatpush1.bf16.msra.mxu1 %v4342_v42  ;;  %v4300_v41 = vpack.c.bf16 %v1197_v34, %v1189_v33  ;;  %v1188_v42 = vld [vmem:[#allocation7 + $0x1b10] sm:$0xff]  ;;  %v1269_v33 = vld [vmem:[#allocation7 + $0x1d98] sm:$0xff] }
 0x1a9   :  { %4281 = vmatprep.subr.bf16.mxu0 %v4280_v43  ;;  %4345 = vmatprep.subr.bf16.mxu1 %v4344_v47  ;;  %v1196_v43 = vld [vmem:[#allocation7 + $0x1b50] sm:$0xff]  ;;  %v430_v47 = vld [vmem:[#allocation7 + $0x360] sm:$0xff]  ;;  %v1277_v34 = vld [vmem:[#allocation7 + $0x1dd8] sm:$0xff] }
 0x1aa   :  { %1949 = vmatprep.mubr.f32.mxu0 %v5719_v45  ;;  %2020 = vmatprep.mubr.f32.mxu1 %v5735_v26  ;;  %v4352_v45 = vpack.c.bf16 %v383_v61, %v375_v32  ;;  %v455_v32 = vld [vmem:[#allocation7 + $0x428] sm:$0xff] }
 0x1ab   :  { %v463_v61 = vld [vmem:[#allocation7 + $0x468] sm:$0xff] }
 0x1ac   :  { %4283 = vmatpush1.bf16.msra.mxu0 %v4282_v52  ;;  %4347 = vmatpush1.bf16.msra.mxu1 %v4346_v53  ;;  %v4302_v52 = vpack.c.bf16 %v1196_v43, %v1188_v42  ;;  %v4366_v53 = vpack.c.bf16 %v430_v47, %v422_v44  ;;  %v1268_v42 = vld [vmem:[#allocation7 + $0x1d90] sm:$0xff]  ;;  %v502_v44 = vld [vmem:[#allocation7 + $0x5a0] sm:$0xff] }
 0x1ad   :  { %4285 = vmatprep.subr.bf16.mxu0 %v4284_v54  ;;  %4349 = vmatprep.subr.bf16.mxu1 %v4348_v57  ;;  %v4304_v54 = vpack.c.bf16 %v1213_v49, %v1205_v48  ;;  %v4368_v57 = vpack.c.bf16 %v447_v24, %v439_v51  ;;  %v1276_v43 = vld [vmem:[#allocation7 + $0x1dd0] sm:$0xff]  ;;  %v510_v47 = vld [vmem:[#allocation7 + $0x5e0] sm:$0xff]  ;;  %v1285_v48 = vld [vmem:[#allocation7 + $0x1e18] sm:$0xff] }
 0x1ae   :  { %v1293_v49 = vld [vmem:[#allocation7 + $0x1e58] sm:$0xff]  ;;  %v519_v51 = vld [vmem:[#allocation7 + $0x628] sm:$0xff] }
 0x1af   :  { %v527_v24 = vld [vmem:[#allocation7 + $0x668] sm:$0xff] }
 0x1b0   :  { %4287 = vmatpush1.bf16.msra.mxu0 %v4286_v62  ;;  %4351 = vmatpush1.bf16.msra.mxu1 %v4350_v63  ;;  %v4306_v62 = vpack.c.bf16 %v1212_v55, %v1204_v19  ;;  %v4370_v63 = vpack.c.bf16 %v446_v58, %v438_v56  ;;  %v1284_v19 = vld [vmem:[#allocation7 + $0x1e10] sm:$0xff]  ;;  %v518_v56 = vld [vmem:[#allocation7 + $0x620] sm:$0xff] }
 0x1b1   :  { %4289 = vmatprep.subr.bf16.mxu0 %v4288_v0  ;;  %4353 = vmatprep.subr.bf16.mxu1 %v4352_v45  ;;  %v4308_v0 = vpack.c.bf16 %v1229_v60, %v1221_v59  ;;  %v4372_v45 = vpack.c.bf16 %v463_v61, %v455_v32  ;;  %v1292_v55 = vld [vmem:[#allocation7 + $0x1e50] sm:$0xff]  ;;  %v526_v58 = vld [vmem:[#allocation7 + $0x660] sm:$0xff]  ;;  %v1301_v59 = vld [vmem:[#allocation7 + $0x1e98] sm:$0xff] }
 0x1b2   :  { %v1309_v60 = vld [vmem:[#allocation7 + $0x1ed8] sm:$0xff]  ;;  %v535_v32 = vld [vmem:[#allocation7 + $0x6a8] sm:$0xff] }
 0x1b3   :  { %v543_v61 = vld [vmem:[#allocation7 + $0x6e8] sm:$0xff] }
 0x1b4   :  { %4291 = vmatpush1.bf16.msra.mxu0 %v4290_v8  ;;  %4355 = vmatpush1.bf16.msra.mxu1 %v4354_v9  ;;  %v4310_v8 = vpack.c.bf16 %v1228_v2, %v1220_v1  ;;  %v4374_v9 = vpack.c.bf16 %v462_v38, %v454_v3  ;;  %v1300_v1 = vld [vmem:[#allocation7 + $0x1e90] sm:$0xff]  ;;  %v534_v3 = vld [vmem:[#allocation7 + $0x6a0] sm:$0xff] }
 0x1b5   :  { %4293 = vmatprep.subr.bf16.mxu0 %v4292_v10  ;;  %4357 = vmatprep.subr.bf16.mxu1 %v4356_v14  ;;  %v4312_v10 = vpack.c.bf16 %v1245_v5, %v1237_v4  ;;  %v4376_v14 = vpack.c.bf16 %v479_v7, %v471_v6  ;;  %v1308_v2 = vld [vmem:[#allocation7 + $0x1ed0] sm:$0xff]  ;;  %v542_v38 = vld [vmem:[#allocation7 + $0x6e0] sm:$0xff]  ;;  %v1317_v4 = vld [vmem:[#allocation7 + $0x1f18] sm:$0xff] }
 0x1b6   :  { %v1325_v5 = vld [vmem:[#allocation7 + $0x1f58] sm:$0xff]  ;;  %v551_v6 = vld [vmem:[#allocation7 + $0x728] sm:$0xff] }
 0x1b7   :  { %v559_v7 = vld [vmem:[#allocation7 + $0x768] sm:$0xff] }
 0x1b8   :  { %4295 = vmatpush1.bf16.msra.mxu0 %v4294_v22  ;;  %4359 = vmatpush1.bf16.msra.mxu1 %v4358_v23  ;;  %v4314_v22 = vpack.c.bf16 %v1244_v12, %v1236_v11  ;;  %v4378_v23 = vpack.c.bf16 %v478_v15, %v470_v13  ;;  %v1316_v11 = vld [vmem:[#allocation7 + $0x1f10] sm:$0xff]  ;;  %v550_v13 = vld [vmem:[#allocation7 + $0x720] sm:$0xff] }
 0x1b9   :  { %4297 = vmatprep.subr.bf16.mxu0 %v4296_v25  ;;  %4361 = vmatprep.subr.bf16.mxu1 %v4360_v30  ;;  %v4316_v25 = vpack.c.bf16 %v1261_v18, %v1253_v16  ;;  %v4380_v30 = vpack.c.bf16 %v495_v21, %v487_v20  ;;  %v1324_v12 = vld [vmem:[#allocation7 + $0x1f50] sm:$0xff]  ;;  %v558_v15 = vld [vmem:[#allocation7 + $0x760] sm:$0xff]  ;;  %v1333_v16 = vld [vmem:[#allocation7 + $0x1f98] sm:$0xff] }
 0x1ba   :  { %v5738_v17 = vpop.f32.mrb[0].mxu0  ;;  %v1341_v18 = vld [vmem:[#allocation7 + $0x1fd8] sm:$0xff]  ;;  %v567_v20 = vld [vmem:[#allocation7 + $0x7a8] sm:$0xff] }
 0x1bb   :  { %v5740_v50 = vpop.f32.mrb[1].mxu0  ;;  %v575_v21 = vld [vmem:[#allocation7 + $0x7e8] sm:$0xff] }
 0x1bc   :  { %4299 = vmatpush1.bf16.msra.mxu0 %v4298_v37  ;;  %4363 = vmatpush1.bf16.msra.mxu1 %v4362_v39  ;;  %v4318_v37 = vpack.c.bf16 %v1260_v28, %v1252_v27  ;;  %v4382_v39 = vpack.c.bf16 %v494_v31, %v486_v29  ;;  %v1332_v27 = vld [vmem:[#allocation7 + $0x1f90] sm:$0xff]  ;;  %v566_v29 = vld [vmem:[#allocation7 + $0x7a0] sm:$0xff] }
 0x1bd   :  { %4301 = vmatprep.subr.bf16.mxu0 %v4300_v41  ;;  %4365 = vmatprep.subr.bf16.mxu1 %v4364_v46  ;;  %v4320_v41 = vpack.c.bf16 %v1277_v34, %v1269_v33  ;;  %v4384_v46 = vpack.c.bf16 %v511_v36, %v503_v35  ;;  %v1340_v28 = vld [vmem:[#allocation7 + $0x1fd0] sm:$0xff]  ;;  %v574_v31 = vld [vmem:[#allocation7 + $0x7e0] sm:$0xff]  ;;  %v329_v33 = vld [vmem:[#allocation7 + $0x38] sm:$0xff] }
 0x1be   :  { %v337_v34 = vld [vmem:[#allocation7 + $0x78] sm:$0xff]  ;;  %v583_v35 = vld [vmem:[#allocation7 + $0x828] sm:$0xff] }
 0x1bf   :  { %v591_v36 = vld [vmem:[#allocation7 + $0x868] sm:$0xff] }
 0x1c0   :  { %4303 = vmatpush1.bf16.msra.mxu0 %v4302_v52  ;;  %4367 = vmatpush1.bf16.msra.mxu1 %v4366_v53  ;;  %v4322_v52 = vpack.c.bf16 %v1276_v43, %v1268_v42  ;;  %v4386_v53 = vpack.c.bf16 %v510_v47, %v502_v44  ;;  %v582_v42 = vld [vmem:[#allocation7 + $0x820] sm:$0xff]  ;;  %v328_v43 = vld [vmem:[#allocation7 + $0x30] sm:$0xff] }
 0x1c1   :  { %4305 = vmatprep.subr.bf16.mxu0 %v4304_v54  ;;  %4369 = vmatprep.subr.bf16.mxu1 %v4368_v57  ;;  %v4324_v54 = vpack.c.bf16 %v1293_v49, %v1285_v48  ;;  %v4388_v57 = vpack.c.bf16 %v527_v24, %v519_v51  ;;  %v336_v44 = vld [vmem:[#allocation7 + $0x70] sm:$0xff]  ;;  %v590_v47 = vld [vmem:[#allocation7 + $0x860] sm:$0xff]  ;;  %v345_v48 = vld [vmem:[#allocation7 + $0xb8] sm:$0xff] }
 0x1c2   :  { %v353_v49 = vld [vmem:[#allocation7 + $0xf8] sm:$0xff]  ;;  %v599_v51 = vld [vmem:[#allocation7 + $0x8a8] sm:$0xff] }
 0x1c3   :  { %v607_v24 = vld [vmem:[#allocation7 + $0x8e8] sm:$0xff] }
 0x1c4   :  { %4307 = vmatpush1.bf16.msra.mxu0 %v4306_v62  ;;  %4371 = vmatpush1.bf16.msra.mxu1 %v4370_v63  ;;  %v4326_v62 = vpack.c.bf16 %v1292_v55, %v1284_v19  ;;  %v4390_v63 = vpack.c.bf16 %v526_v58, %v518_v56  ;;  %v598_v19 = vld [vmem:[#allocation7 + $0x8a0] sm:$0xff]  ;;  %v344_v55 = vld [vmem:[#allocation7 + $0xb0] sm:$0xff] }
 0x1c5   :  { %4309 = vmatprep.subr.bf16.mxu0 %v4308_v0  ;;  %4373 = vmatprep.subr.bf16.mxu1 %v4372_v45  ;;  %v4328_v0 = vpack.c.bf16 %v1309_v60, %v1301_v59  ;;  %v4392_v45 = vpack.c.bf16 %v543_v61, %v535_v32  ;;  %v352_v56 = vld [vmem:[#allocation7 + $0xf0] sm:$0xff]  ;;  %v606_v58 = vld [vmem:[#allocation7 + $0x8e0] sm:$0xff]  ;;  %v361_v59 = vld [vmem:[#allocation7 + $0x138] sm:$0xff] }
 0x1c6   :  { %v369_v60 = vld [vmem:[#allocation7 + $0x178] sm:$0xff]  ;;  %v615_v32 = vld [vmem:[#allocation7 + $0x928] sm:$0xff] }
 0x1c7   :  { %v623_v61 = vld [vmem:[#allocation7 + $0x968] sm:$0xff] }
 0x1c8   :  { %4311 = vmatpush1.bf16.msra.mxu0 %v4310_v8  ;;  %4375 = vmatpush1.bf16.msra.mxu1 %v4374_v9  ;;  %v4330_v8 = vpack.c.bf16 %v1308_v2, %v1300_v1  ;;  %v4394_v9 = vpack.c.bf16 %v542_v38, %v534_v3  ;;  %v4604_v1 = vpack.c.bf16 %v369_v60, %v361_v59  ;;  %v614_v2 = vld [vmem:[#allocation7 + $0x920] sm:$0xff]  ;;  %v360_v3 = vld [vmem:[#allocation7 + $0x130] sm:$0xff]  ;;  %v441_v59 = vld [vmem:[#allocation7 + $0x3b8] sm:$0xff] }
 0x1c9   :  { %4313 = vmatprep.subr.bf16.mxu0 %v4312_v10  ;;  %4377 = vmatprep.subr.bf16.mxu1 %v4376_v14  ;;  %v4332_v10 = vpack.c.bf16 %v1325_v5, %v1317_v4  ;;  %v4396_v14 = vpack.c.bf16 %v559_v7, %v551_v6  ;;  %v622_v38 = vld [vmem:[#allocation7 + $0x960] sm:$0xff]  ;;  %v377_v4 = vld [vmem:[#allocation7 + $0x1b8] sm:$0xff]  ;;  %v631_v7 = vld [vmem:[#allocation7 + $0x9a8] sm:$0xff] }
 0x1ca   :  { %v385_v5 = vld [vmem:[#allocation7 + $0x1f8] sm:$0xff] }
 0x1cb   :  { %v5752_v6 = vld [vmem:[%s5883_s1 + $0x18] sm:$0xff] }
 0x1cc   :  { %4315 = vmatpush1.bf16.msra.mxu0 %v4314_v22  ;;  %4379 = vmatpush1.bf16.msra.mxu1 %v4378_v23  ;;  %v4334_v22 = vpack.c.bf16 %v1324_v12, %v1316_v11  ;;  %v4398_v23 = vpack.c.bf16 %v558_v15, %v550_v13  ;;  %v4608_v11 = vpack.c.bf16 %v385_v5, %v377_v4  ;;  %v630_v12 = vld [vmem:[#allocation7 + $0x9a0] sm:$0xff]  ;;  %v376_v13 = vld [vmem:[#allocation7 + $0x1b0] sm:$0xff]  ;;  %v449_v60 = vld [vmem:[#allocation7 + $0x3f8] sm:$0xff] }
 0x1cd   :  { %4317 = vmatprep.subr.bf16.mxu0 %v4316_v25  ;;  %4381 = vmatprep.subr.bf16.mxu1 %v4380_v30  ;;  %v4336_v25 = vpack.c.bf16 %v1341_v18, %v1333_v16  ;;  %v4400_v30 = vpack.c.bf16 %v575_v21, %v567_v20  ;;  %v638_v16 = vld [vmem:[#allocation7 + $0x9e0] sm:$0xff]  ;;  %v393_v18 = vld [vmem:[#allocation7 + $0x238] sm:$0xff]  ;;  %v647_v21 = vld [vmem:[#allocation7 + $0xa28] sm:$0xff] }
 0x1ce   :  { %v401_v20 = vld [vmem:[#allocation7 + $0x278] sm:$0xff] }
 0x1cf   :  { %v457_v4 = vld [vmem:[#allocation7 + $0x438] sm:$0xff] }
 0x1d0   :  { %4319 = vmatpush1.bf16.msra.mxu0 %v4318_v37  ;;  %4383 = vmatpush1.bf16.msra.mxu1 %v4382_v39  ;;  %v4338_v37 = vpack.c.bf16 %v1340_v28, %v1332_v27  ;;  %v4402_v39 = vpack.c.bf16 %v574_v31, %v566_v29  ;;  %v646_v27 = vld [vmem:[#allocation7 + $0xa20] sm:$0xff]  ;;  %v392_v28 = vld [vmem:[#allocation7 + $0x230] sm:$0xff]  ;;  %v465_v5 = vld [vmem:[#allocation7 + $0x478] sm:$0xff] }
 0x1d1   :  { %4321 = vmatprep.subr.bf16.mxu0 %v4320_v41  ;;  %4385 = vmatprep.subr.bf16.mxu1 %v4384_v46  ;;  %v4596_v41 = vpack.c.bf16 %v337_v34, %v329_v33  ;;  %v4404_v46 = vpack.c.bf16 %v591_v36, %v583_v35  ;;  %v400_v29 = vld [vmem:[#allocation7 + $0x270] sm:$0xff]  ;;  %v654_v31 = vld [vmem:[#allocation7 + $0xa60] sm:$0xff]  ;;  %v409_v33 = vld [vmem:[#allocation7 + $0x2b8] sm:$0xff] }
 0x1d2   :  { %v417_v34 = vld [vmem:[#allocation7 + $0x2f8] sm:$0xff]  ;;  %v663_v35 = vld [vmem:[#allocation7 + $0xaa8] sm:$0xff] }
 0x1d3   :  { %v671_v36 = vld [vmem:[#allocation7 + $0xae8] sm:$0xff] }
 0x1d4   :  { %4323 = vmatpush1.bf16.msra.mxu0 %v4322_v52  ;;  %4387 = vmatpush1.bf16.msra.mxu1 %v4386_v53  ;;  %v4598_v52 = vpack.c.bf16 %v336_v44, %v328_v43  ;;  %v4406_v53 = vpack.c.bf16 %v590_v47, %v582_v42  ;;  %v662_v42 = vld [vmem:[#allocation7 + $0xaa0] sm:$0xff]  ;;  %v408_v43 = vld [vmem:[#allocation7 + $0x2b0] sm:$0xff] }
 0x1d5   :  { %4325 = vmatprep.subr.bf16.mxu0 %v4324_v54  ;;  %4389 = vmatprep.subr.bf16.mxu1 %v4388_v57  ;;  %v4600_v54 = vpack.c.bf16 %v353_v49, %v345_v48  ;;  %v4408_v57 = vpack.c.bf16 %v607_v24, %v599_v51  ;;  %v416_v44 = vld [vmem:[#allocation7 + $0x2f0] sm:$0xff]  ;;  %v670_v47 = vld [vmem:[#allocation7 + $0xae0] sm:$0xff]  ;;  %v425_v48 = vld [vmem:[#allocation7 + $0x338] sm:$0xff] }
 0x1d6   :  { %v433_v49 = vld [vmem:[#allocation7 + $0x378] sm:$0xff]  ;;  %v679_v51 = vld [vmem:[#allocation7 + $0xb28] sm:$0xff] }
 0x1d7   :  { %v687_v24 = vld [vmem:[#allocation7 + $0xb68] sm:$0xff] }
 0x1d8   :  { %4327 = vmatpush1.bf16.msra.mxu0 %v4326_v62  ;;  %4391 = vmatpush1.bf16.msra.mxu1 %v4390_v63  ;;  %v5746_v62 = vld [vmem:[%s5883_s1] sm:$0xff]  ;;  %v4602_v63 = vpack.c.bf16 %v352_v56, %v344_v55  ;;  %v424_v55 = vld [vmem:[#allocation7 + $0x330] sm:$0xff] }
 0x1d9   :  { %4329 = vmatprep.subr.bf16.mxu0 %v4328_v0  ;;  %4393 = vmatprep.subr.bf16.mxu1 %v4392_v45  ;;  %v4410_v0 = vpack.c.bf16 %v606_v58, %v598_v19  ;;  %v368_v45 = vld [vmem:[#allocation7 + $0x170] sm:$0xff]  ;;  %v678_v19 = vld [vmem:[#allocation7 + $0xb20] sm:$0xff] }
 0x1da   :  { %v432_v56 = vld [vmem:[#allocation7 + $0x370] sm:$0xff]  ;;  %v686_v58 = vld [vmem:[#allocation7 + $0xb60] sm:$0xff] }
 0x1dc   :  { %4331 = vmatpush1.bf16.msra.mxu0 %v4330_v8  ;;  %4395 = vmatpush1.bf16.msra.mxu1 %v4394_v9  ;;  %v639_v8 = vld [vmem:[#allocation7 + $0x9e8] sm:$0xff]  ;;  %v4606_v9 = vpack.c.bf16 %v368_v45, %v360_v3  ;;  %v440_v3 = vld [vmem:[#allocation7 + $0x3b0] sm:$0xff] }
 0x1dd   :  { %4333 = vmatprep.subr.bf16.mxu0 %v4332_v10  ;;  %4397 = vmatprep.subr.bf16.mxu1 %v4396_v14  ;;  %v4414_v10 = vpack.c.bf16 %v622_v38, %v614_v2  ;;  %v384_v14 = vld [vmem:[#allocation7 + $0x1f0] sm:$0xff]  ;;  %v4416_v15 = vpack.c.bf16 %v639_v8, %v631_v7  ;;  %v694_v2 = vld [vmem:[#allocation7 + $0xba0] sm:$0xff]  ;;  %v711_v7 = vld [vmem:[#allocation7 + $0xc28] sm:$0xff] }
 0x1de   :  { %v448_v45 = vld [vmem:[#allocation7 + $0x3f0] sm:$0xff]  ;;  %v702_v38 = vld [vmem:[#allocation7 + $0xbe0] sm:$0xff]  ;;  %v719_v8 = vld [vmem:[#allocation7 + $0xc68] sm:$0xff] }
 0x1e0   :  { %4335 = vmatpush1.bf16.msra.mxu0 %v4334_v22  ;;  %4399 = vmatpush1.bf16.msra.mxu1 %v4398_v23  ;;  %v655_v22 = vld [vmem:[#allocation7 + $0xa68] sm:$0xff]  ;;  %v4610_v23 = vpack.c.bf16 %v384_v14, %v376_v13  ;;  %v456_v13 = vld [vmem:[#allocation7 + $0x430] sm:$0xff] }
 0x1e1   :  { %4337 = vmatprep.subr.bf16.mxu0 %v4336_v25  ;;  %4401 = vmatprep.subr.bf16.mxu1 %v4400_v30  ;;  %v4612_v25 = vpack.c.bf16 %v401_v20, %v393_v18  ;;  %v4420_v30 = vpack.c.bf16 %v655_v22, %v647_v21  ;;  %v464_v14 = vld [vmem:[#allocation7 + $0x470] sm:$0xff]  ;;  %v473_v18 = vld [vmem:[#allocation7 + $0x4b8] sm:$0xff]  ;;  %v727_v21 = vld [vmem:[#allocation7 + $0xca8] sm:$0xff] }
 0x1e2   :  { %v481_v20 = vld [vmem:[#allocation7 + $0x4f8] sm:$0xff]  ;;  %v735_v22 = vld [vmem:[#allocation7 + $0xce8] sm:$0xff] }
 0x1e4   :  { %4339 = vmatpush1.bf16.msra.mxu0 %v4338_v37  ;;  %4403 = vmatpush1.bf16.msra.mxu1 %v4402_v39  ;;  %v4614_v37 = vpack.c.bf16 %v400_v29, %v392_v28  ;;  %v4422_v39 = vpack.c.bf16 %v654_v31, %v646_v27  ;;  %v726_v27 = vld [vmem:[#allocation7 + $0xca0] sm:$0xff]  ;;  %v472_v28 = vld [vmem:[#allocation7 + $0x4b0] sm:$0xff] }
 0x1e5   :  { %4597 = vmatprep.subr.bf16.mxu0 %v4596_v41  ;;  %4405 = vmatprep.subr.bf16.mxu1 %v4404_v46  ;;  %v4616_v41 = vpack.c.bf16 %v417_v34, %v409_v33  ;;  %v4424_v46 = vpack.c.bf16 %v671_v36, %v663_v35  ;;  %v480_v29 = vld [vmem:[#allocation7 + $0x4f0] sm:$0xff]  ;;  %v734_v31 = vld [vmem:[#allocation7 + $0xce0] sm:$0xff]  ;;  %v489_v33 = vld [vmem:[#allocation7 + $0x538] sm:$0xff] }
 0x1e6   :  { %v497_v34 = vld [vmem:[#allocation7 + $0x578] sm:$0xff]  ;;  %v743_v35 = vld [vmem:[#allocation7 + $0xd28] sm:$0xff] }
 0x1e7   :  { %1950 = vmatmul.mubr.f32.vlgmr.msra.gmra.mrb[2].mxu0 %v5727_v40  ;;  %2021 = vmatmul.mubr.f32.vlgmr.msra.gmra.mrb[2].mxu1 %v5746_v62  ;;  %v4412_v40 = vpack.c.bf16 %v623_v61, %v615_v32  ;;  %v695_v32 = vld [vmem:[#allocation7 + $0xba8] sm:$0xff] }
 0x1e8   :  { %4599 = vmatpush1.bf16.msra.mxu0 %v4598_v52  ;;  %4407 = vmatpush1.bf16.msra.mxu1 %v4406_v53  ;;  %v4618_v52 = vpack.c.bf16 %v416_v44, %v408_v43  ;;  %v4426_v53 = vpack.c.bf16 %v670_v47, %v662_v42  ;;  %v703_v61 = vld [vmem:[#allocation7 + $0xbe8] sm:$0xff]  ;;  %v742_v42 = vld [vmem:[#allocation7 + $0xd20] sm:$0xff]  ;;  %v488_v43 = vld [vmem:[#allocation7 + $0x530] sm:$0xff] }
 0x1e9   :  { %4601 = vmatprep.subr.bf16.mxu0 %v4600_v54  ;;  %4409 = vmatprep.subr.bf16.mxu1 %v4408_v57  ;;  %v4620_v54 = vpack.c.bf16 %v433_v49, %v425_v48  ;;  %v4428_v57 = vpack.c.bf16 %v687_v24, %v679_v51  ;;  %v751_v36 = vld [vmem:[#allocation7 + $0xd68] sm:$0xff]  ;;  %v496_v44 = vld [vmem:[#allocation7 + $0x570] sm:$0xff]  ;;  %v750_v47 = vld [vmem:[#allocation7 + $0xd60] sm:$0xff] }
 0x1ea   :  { %2091 = vmatprep.mubr.f32.mxu1 %v5752_v6  ;;  %2304 = vmatprep.mubr.f32.mxu0 %v5735_v26  ;;  %v4418_v26 = vpack.c.bf16 %v638_v16, %v630_v12  ;;  %v710_v12 = vld [vmem:[#allocation7 + $0xc20] sm:$0xff]  ;;  %v505_v48 = vld [vmem:[#allocation7 + $0x5b8] sm:$0xff]  ;;  %v759_v51 = vld [vmem:[#allocation7 + $0xda8] sm:$0xff] }
 0x1eb   :  { %v718_v16 = vld [vmem:[#allocation7 + $0xc60] sm:$0xff]  ;;  %v513_v49 = vld [vmem:[#allocation7 + $0x5f8] sm:$0xff]  ;;  %v767_v24 = vld [vmem:[#allocation7 + $0xde8] sm:$0xff] }
 0x1ec   :  { %4603 = vmatpush1.bf16.msra.mxu0 %v4602_v63  ;;  %4411 = vmatpush1.bf16.msra.mxu1 %v4410_v0  ;;  %v4622_v63 = vpack.c.bf16 %v432_v56, %v424_v55  ;;  %v4430_v0 = vpack.c.bf16 %v686_v58, %v678_v19  ;;  %v758_v19 = vld [vmem:[#allocation7 + $0xda0] sm:$0xff]  ;;  %v504_v55 = vld [vmem:[#allocation7 + $0x5b0] sm:$0xff] }
 0x1ed   :  { %4605 = vmatprep.subr.bf16.mxu0 %v4604_v1  ;;  %4413 = vmatprep.subr.bf16.mxu1 %v4412_v40  ;;  %v4624_v1 = vpack.c.bf16 %v449_v60, %v441_v59  ;;  %v4432_v40 = vpack.c.bf16 %v703_v61, %v695_v32  ;;  %v512_v56 = vld [vmem:[#allocation7 + $0x5f0] sm:$0xff]  ;;  %v766_v58 = vld [vmem:[#allocation7 + $0xde0] sm:$0xff]  ;;  %v521_v59 = vld [vmem:[#allocation7 + $0x638] sm:$0xff] }
 0x1ee   :  { %v529_v60 = vld [vmem:[#allocation7 + $0x678] sm:$0xff]  ;;  %v775_v32 = vld [vmem:[#allocation7 + $0xe28] sm:$0xff] }
 0x1ef   :  { %v783_v61 = vld [vmem:[#allocation7 + $0xe68] sm:$0xff] }
 0x1f0   :  { %4607 = vmatpush1.bf16.msra.mxu0 %v4606_v9  ;;  %4415 = vmatpush1.bf16.msra.mxu1 %v4414_v10  ;;  %v4626_v9 = vpack.c.bf16 %v448_v45, %v440_v3  ;;  %v4434_v10 = vpack.c.bf16 %v702_v38, %v694_v2  ;;  %v774_v2 = vld [vmem:[#allocation7 + $0xe20] sm:$0xff]  ;;  %v520_v3 = vld [vmem:[#allocation7 + $0x630] sm:$0xff] }
 0x1f1   :  { %4609 = vmatprep.subr.bf16.mxu0 %v4608_v11  ;;  %4417 = vmatprep.subr.bf16.mxu1 %v4416_v15  ;;  %v4628_v11 = vpack.c.bf16 %v465_v5, %v457_v4  ;;  %v4436_v15 = vpack.c.bf16 %v719_v8, %v711_v7  ;;  %v528_v45 = vld [vmem:[#allocation7 + $0x670] sm:$0xff]  ;;  %v782_v38 = vld [vmem:[#allocation7 + $0xe60] sm:$0xff]  ;;  %v537_v4 = vld [vmem:[#allocation7 + $0x6b8] sm:$0xff] }
 0x1f2   :  { %v545_v5 = vld [vmem:[#allocation7 + $0x6f8] sm:$0xff]  ;;  %v791_v7 = vld [vmem:[#allocation7 + $0xea8] sm:$0xff] }
 0x1f3   :  { %v799_v8 = vld [vmem:[#allocation7 + $0xee8] sm:$0xff] }
 0x1f4   :  { %4611 = vmatpush1.bf16.msra.mxu0 %v4610_v23  ;;  %4419 = vmatpush1.bf16.msra.mxu1 %v4418_v26  ;;  %v4630_v23 = vpack.c.bf16 %v464_v14, %v456_v13  ;;  %v4438_v26 = vpack.c.bf16 %v718_v16, %v710_v12  ;;  %v790_v12 = vld [vmem:[#allocation7 + $0xea0] sm:$0xff]  ;;  %v536_v13 = vld [vmem:[#allocation7 + $0x6b0] sm:$0xff] }
 0x1f5   :  { %4613 = vmatprep.subr.bf16.mxu0 %v4612_v25  ;;  %4421 = vmatprep.subr.bf16.mxu1 %v4420_v30  ;;  %v4632_v25 = vpack.c.bf16 %v481_v20, %v473_v18  ;;  %v4440_v30 = vpack.c.bf16 %v735_v22, %v727_v21  ;;  %v544_v14 = vld [vmem:[#allocation7 + $0x6f0] sm:$0xff]  ;;  %v798_v16 = vld [vmem:[#allocation7 + $0xee0] sm:$0xff]  ;;  %v553_v18 = vld [vmem:[#allocation7 + $0x738] sm:$0xff] }
 0x1f6   :  { %v561_v20 = vld [vmem:[#allocation7 + $0x778] sm:$0xff]  ;;  %v807_v21 = vld [vmem:[#allocation7 + $0xf28] sm:$0xff] }
 0x1f7   :  { %v815_v22 = vld [vmem:[#allocation7 + $0xf68] sm:$0xff] }
 0x1f8   :  { %4615 = vmatpush1.bf16.msra.mxu0 %v4614_v37  ;;  %4423 = vmatpush1.bf16.msra.mxu1 %v4422_v39  ;;  %v4634_v37 = vpack.c.bf16 %v480_v29, %v472_v28  ;;  %v4442_v39 = vpack.c.bf16 %v734_v31, %v726_v27  ;;  %v806_v27 = vld [vmem:[#allocation7 + $0xf20] sm:$0xff]  ;;  %v552_v28 = vld [vmem:[#allocation7 + $0x730] sm:$0xff] }
 0x1f9   :  { %4617 = vmatprep.subr.bf16.mxu0 %v4616_v41  ;;  %4425 = vmatprep.subr.bf16.mxu1 %v4424_v46  ;;  %v4636_v41 = vpack.c.bf16 %v497_v34, %v489_v33  ;;  %v4444_v46 = vpack.c.bf16 %v751_v36, %v743_v35  ;;  %v560_v29 = vld [vmem:[#allocation7 + $0x770] sm:$0xff]  ;;  %v814_v31 = vld [vmem:[#allocation7 + $0xf60] sm:$0xff]  ;;  %v569_v33 = vld [vmem:[#allocation7 + $0x7b8] sm:$0xff] }
 0x1fa   :  { %v577_v34 = vld [vmem:[#allocation7 + $0x7f8] sm:$0xff]  ;;  %v823_v35 = vld [vmem:[#allocation7 + $0xfa8] sm:$0xff] }
 0x1fb   :  { %v831_v36 = vld [vmem:[#allocation7 + $0xfe8] sm:$0xff] }
 0x1fc   :  { %4619 = vmatpush1.bf16.msra.mxu0 %v4618_v52  ;;  %4427 = vmatpush1.bf16.msra.mxu1 %v4426_v53  ;;  %v4638_v52 = vpack.c.bf16 %v496_v44, %v488_v43  ;;  %v4446_v53 = vpack.c.bf16 %v750_v47, %v742_v42  ;;  %v822_v42 = vld [vmem:[#allocation7 + $0xfa0] sm:$0xff]  ;;  %v568_v43 = vld [vmem:[#allocation7 + $0x7b0] sm:$0xff] }
 0x1fd   :  { %4621 = vmatprep.subr.bf16.mxu0 %v4620_v54  ;;  %4429 = vmatprep.subr.bf16.mxu1 %v4428_v57  ;;  %v4640_v54 = vpack.c.bf16 %v513_v49, %v505_v48  ;;  %v4448_v57 = vpack.c.bf16 %v767_v24, %v759_v51  ;;  %v576_v44 = vld [vmem:[#allocation7 + $0x7f0] sm:$0xff]  ;;  %v830_v47 = vld [vmem:[#allocation7 + $0xfe0] sm:$0xff]  ;;  %v585_v48 = vld [vmem:[#allocation7 + $0x838] sm:$0xff] }
 0x1fe   :  { %v593_v49 = vld [vmem:[#allocation7 + $0x878] sm:$0xff]  ;;  %v839_v51 = vld [vmem:[#allocation7 + $0x1028] sm:$0xff] }
 0x1ff   :  { %v847_v24 = vld [vmem:[#allocation7 + $0x1068] sm:$0xff] }
 0x200   :  { %4623 = vmatpush1.bf16.msra.mxu0 %v4622_v63  ;;  %4431 = vmatpush1.bf16.msra.mxu1 %v4430_v0  ;;  %v4642_v63 = vpack.c.bf16 %v512_v56, %v504_v55  ;;  %v4450_v0 = vpack.c.bf16 %v766_v58, %v758_v19  ;;  %v838_v19 = vld [vmem:[#allocation7 + $0x1020] sm:$0xff]  ;;  %v584_v55 = vld [vmem:[#allocation7 + $0x830] sm:$0xff] }
 0x201   :  { %4625 = vmatprep.subr.bf16.mxu0 %v4624_v1  ;;  %4433 = vmatprep.subr.bf16.mxu1 %v4432_v40  ;;  %v4644_v1 = vpack.c.bf16 %v529_v60, %v521_v59  ;;  %v4452_v40 = vpack.c.bf16 %v783_v61, %v775_v32  ;;  %v592_v56 = vld [vmem:[#allocation7 + $0x870] sm:$0xff]  ;;  %v846_v58 = vld [vmem:[#allocation7 + $0x1060] sm:$0xff]  ;;  %v601_v59 = vld [vmem:[#allocation7 + $0x8b8] sm:$0xff] }
 0x202   :  { %v609_v60 = vld [vmem:[#allocation7 + $0x8f8] sm:$0xff]  ;;  %v855_v32 = vld [vmem:[#allocation7 + $0x10a8] sm:$0xff] }
 0x203   :  { %v863_v61 = vld [vmem:[#allocation7 + $0x10e8] sm:$0xff] }
 0x204   :  { %4627 = vmatpush1.bf16.msra.mxu0 %v4626_v9  ;;  %4435 = vmatpush1.bf16.msra.mxu1 %v4434_v10  ;;  %v4646_v9 = vpack.c.bf16 %v528_v45, %v520_v3  ;;  %v4454_v10 = vpack.c.bf16 %v782_v38, %v774_v2  ;;  %v854_v2 = vld [vmem:[#allocation7 + $0x10a0] sm:$0xff]  ;;  %v600_v3 = vld [vmem:[#allocation7 + $0x8b0] sm:$0xff] }
 0x205   :  { %4629 = vmatprep.subr.bf16.mxu0 %v4628_v11  ;;  %4437 = vmatprep.subr.bf16.mxu1 %v4436_v15  ;;  %v4648_v11 = vpack.c.bf16 %v545_v5, %v537_v4  ;;  %v4456_v15 = vpack.c.bf16 %v799_v8, %v791_v7  ;;  %v608_v45 = vld [vmem:[#allocation7 + $0x8f0] sm:$0xff]  ;;  %v862_v38 = vld [vmem:[#allocation7 + $0x10e0] sm:$0xff]  ;;  %v617_v4 = vld [vmem:[#allocation7 + $0x938] sm:$0xff] }
 0x206   :  { %v625_v5 = vld [vmem:[#allocation7 + $0x978] sm:$0xff]  ;;  %v871_v7 = vld [vmem:[#allocation7 + $0x1128] sm:$0xff] }
 0x207   :  { %v879_v8 = vld [vmem:[#allocation7 + $0x1168] sm:$0xff] }
 0x208   :  { %4631 = vmatpush1.bf16.msra.mxu0 %v4630_v23  ;;  %4439 = vmatpush1.bf16.msra.mxu1 %v4438_v26  ;;  %v4650_v23 = vpack.c.bf16 %v544_v14, %v536_v13  ;;  %v4458_v26 = vpack.c.bf16 %v798_v16, %v790_v12  ;;  %v4668_v12 = vpack.c.bf16 %v625_v5, %v617_v4  ;;  %v870_v13 = vld [vmem:[#allocation7 + $0x1120] sm:$0xff]  ;;  %v616_v14 = vld [vmem:[#allocation7 + $0x930] sm:$0xff]  ;;  %v697_v4 = vld [vmem:[#allocation7 + $0xbb8] sm:$0xff] }
 0x209   :  { %4633 = vmatprep.subr.bf16.mxu0 %v4632_v25  ;;  %4441 = vmatprep.subr.bf16.mxu1 %v4440_v30  ;;  %v4652_v25 = vpack.c.bf16 %v561_v20, %v553_v18  ;;  %v4460_v30 = vpack.c.bf16 %v815_v22, %v807_v21  ;;  %v878_v16 = vld [vmem:[#allocation7 + $0x1160] sm:$0xff]  ;;  %v633_v18 = vld [vmem:[#allocation7 + $0x9b8] sm:$0xff]  ;;  %v887_v22 = vld [vmem:[#allocation7 + $0x11a8] sm:$0xff] }
 0x20a   :  { %v641_v20 = vld [vmem:[#allocation7 + $0x9f8] sm:$0xff]  ;;  %v5766_v21 = vld [vmem:[%s5883_s1 + $0x28] sm:$0xff] }
 0x20b   :  { %v705_v5 = vld [vmem:[#allocation7 + $0xbf8] sm:$0xff] }
 0x20c   :  { %4635 = vmatpush1.bf16.msra.mxu0 %v4634_v37  ;;  %4443 = vmatpush1.bf16.msra.mxu1 %v4442_v39  ;;  %v4654_v37 = vpack.c.bf16 %v560_v29, %v552_v28  ;;  %v4462_v39 = vpack.c.bf16 %v814_v31, %v806_v27  ;;  %v4672_v27 = vpack.c.bf16 %v641_v20, %v633_v18  ;;  %v886_v28 = vld [vmem:[#allocation7 + $0x11a0] sm:$0xff]  ;;  %v632_v29 = vld [vmem:[#allocation7 + $0x9b0] sm:$0xff]  ;;  %v713_v18 = vld [vmem:[#allocation7 + $0xc38] sm:$0xff] }
 0x20d   :  { %4637 = vmatprep.subr.bf16.mxu0 %v4636_v41  ;;  %4445 = vmatprep.subr.bf16.mxu1 %v4444_v46  ;;  %v4656_v41 = vpack.c.bf16 %v577_v34, %v569_v33  ;;  %v4464_v46 = vpack.c.bf16 %v831_v36, %v823_v35  ;;  %v894_v33 = vld [vmem:[#allocation7 + $0x11e0] sm:$0xff]  ;;  %v649_v34 = vld [vmem:[#allocation7 + $0xa38] sm:$0xff]  ;;  %v903_v36 = vld [vmem:[#allocation7 + $0x1228] sm:$0xff] }
 0x20e   :  { %v657_v35 = vld [vmem:[#allocation7 + $0xa78] sm:$0xff] }
 0x20f   :  { %v721_v20 = vld [vmem:[#allocation7 + $0xc78] sm:$0xff] }
 0x210   :  { %4639 = vmatpush1.bf16.msra.mxu0 %v4638_v52  ;;  %4447 = vmatpush1.bf16.msra.mxu1 %v4446_v53  ;;  %v4658_v52 = vpack.c.bf16 %v576_v44, %v568_v43  ;;  %v4466_v53 = vpack.c.bf16 %v830_v47, %v822_v42  ;;  %v902_v42 = vld [vmem:[#allocation7 + $0x1220] sm:$0xff]  ;;  %v648_v43 = vld [vmem:[#allocation7 + $0xa30] sm:$0xff] }
 0x211   :  { %4641 = vmatprep.subr.bf16.mxu0 %v4640_v54  ;;  %4449 = vmatprep.subr.bf16.mxu1 %v4448_v57  ;;  %v4660_v54 = vpack.c.bf16 %v593_v49, %v585_v48  ;;  %v4468_v57 = vpack.c.bf16 %v847_v24, %v839_v51  ;;  %v656_v44 = vld [vmem:[#allocation7 + $0xa70] sm:$0xff]  ;;  %v910_v47 = vld [vmem:[#allocation7 + $0x1260] sm:$0xff]  ;;  %v665_v48 = vld [vmem:[#allocation7 + $0xab8] sm:$0xff] }
 0x212   :  { %v673_v49 = vld [vmem:[#allocation7 + $0xaf8] sm:$0xff]  ;;  %v919_v51 = vld [vmem:[#allocation7 + $0x12a8] sm:$0xff] }
 0x213   :  { %v927_v24 = vld [vmem:[#allocation7 + $0x12e8] sm:$0xff] }
 0x214   :  { %4643 = vmatpush1.bf16.msra.mxu0 %v4642_v63  ;;  %4451 = vmatpush1.bf16.msra.mxu1 %v4450_v0  ;;  %v4662_v63 = vpack.c.bf16 %v592_v56, %v584_v55  ;;  %v4470_v0 = vpack.c.bf16 %v846_v58, %v838_v19  ;;  %v918_v19 = vld [vmem:[#allocation7 + $0x12a0] sm:$0xff]  ;;  %v664_v55 = vld [vmem:[#allocation7 + $0xab0] sm:$0xff] }
 0x215   :  { %4645 = vmatprep.subr.bf16.mxu0 %v4644_v1  ;;  %4453 = vmatprep.subr.bf16.mxu1 %v4452_v40  ;;  %v4664_v1 = vpack.c.bf16 %v609_v60, %v601_v59  ;;  %v4472_v40 = vpack.c.bf16 %v863_v61, %v855_v32  ;;  %v672_v56 = vld [vmem:[#allocation7 + $0xaf0] sm:$0xff]  ;;  %v926_v58 = vld [vmem:[#allocation7 + $0x12e0] sm:$0xff]  ;;  %v681_v59 = vld [vmem:[#allocation7 + $0xb38] sm:$0xff] }
 0x216   :  { %v689_v60 = vld [vmem:[#allocation7 + $0xb78] sm:$0xff]  ;;  %v935_v32 = vld [vmem:[#allocation7 + $0x1328] sm:$0xff] }
 0x217   :  { %v943_v61 = vld [vmem:[#allocation7 + $0x1368] sm:$0xff] }
 0x218   :  { %4647 = vmatpush1.bf16.msra.mxu0 %v4646_v9  ;;  %4455 = vmatpush1.bf16.msra.mxu1 %v4454_v10  ;;  %v5760_v9 = vld [vmem:[%s5883_s1 + $0x10] sm:$0xff]  ;;  %v4666_v10 = vpack.c.bf16 %v608_v45, %v600_v3 }
 0x219   :  { %4649 = vmatprep.subr.bf16.mxu0 %v4648_v11  ;;  %4457 = vmatprep.subr.bf16.mxu1 %v4456_v15  ;;  %v4474_v11 = vpack.c.bf16 %v862_v38, %v854_v2  ;;  %v624_v15 = vld [vmem:[#allocation7 + $0x970] sm:$0xff]  ;;  %v934_v2 = vld [vmem:[#allocation7 + $0x1320] sm:$0xff] }
 0x21a   :  { %v680_v3 = vld [vmem:[#allocation7 + $0xb30] sm:$0xff]  ;;  %v942_v38 = vld [vmem:[#allocation7 + $0x1360] sm:$0xff] }
 0x21b   :  { %v688_v45 = vld [vmem:[#allocation7 + $0xb70] sm:$0xff] }
 0x21c   :  { %4651 = vmatpush1.bf16.msra.mxu0 %v4650_v23  ;;  %4459 = vmatpush1.bf16.msra.mxu1 %v4458_v26  ;;  %v895_v23 = vld [vmem:[#allocation7 + $0x11e8] sm:$0xff]  ;;  %v4670_v26 = vpack.c.bf16 %v624_v15, %v616_v14  ;;  %v696_v14 = vld [vmem:[#allocation7 + $0xbb0] sm:$0xff] }
 0x21d   :  { %4653 = vmatprep.subr.bf16.mxu0 %v4652_v25  ;;  %4461 = vmatprep.subr.bf16.mxu1 %v4460_v30  ;;  %v4478_v25 = vpack.c.bf16 %v878_v16, %v870_v13  ;;  %v640_v30 = vld [vmem:[#allocation7 + $0x9f0] sm:$0xff]  ;;  %v4480_v31 = vpack.c.bf16 %v895_v23, %v887_v22  ;;  %v950_v13 = vld [vmem:[#allocation7 + $0x13a0] sm:$0xff]  ;;  %v967_v22 = vld [vmem:[#allocation7 + $0x1428] sm:$0xff] }
 0x21e   :  { %v704_v15 = vld [vmem:[#allocation7 + $0xbf0] sm:$0xff]  ;;  %v958_v16 = vld [vmem:[#allocation7 + $0x13e0] sm:$0xff]  ;;  %v975_v23 = vld [vmem:[#allocation7 + $0x1468] sm:$0xff] }
 0x220   :  { %4655 = vmatpush1.bf16.msra.mxu0 %v4654_v37  ;;  %4463 = vmatpush1.bf16.msra.mxu1 %v4462_v39  ;;  %v911_v37 = vld [vmem:[#allocation7 + $0x1268] sm:$0xff]  ;;  %v4674_v39 = vpack.c.bf16 %v640_v30, %v632_v29  ;;  %v712_v29 = vld [vmem:[#allocation7 + $0xc30] sm:$0xff] }
 0x221   :  { %4657 = vmatprep.subr.bf16.mxu0 %v4656_v41  ;;  %4465 = vmatprep.subr.bf16.mxu1 %v4464_v46  ;;  %v4676_v41 = vpack.c.bf16 %v657_v35, %v649_v34  ;;  %v4484_v46 = vpack.c.bf16 %v911_v37, %v903_v36  ;;  %v720_v30 = vld [vmem:[#allocation7 + $0xc70] sm:$0xff]  ;;  %v729_v34 = vld [vmem:[#allocation7 + $0xcb8] sm:$0xff]  ;;  %v983_v36 = vld [vmem:[#allocation7 + $0x14a8] sm:$0xff] }
 0x222   :  { %v737_v35 = vld [vmem:[#allocation7 + $0xcf8] sm:$0xff]  ;;  %v991_v37 = vld [vmem:[#allocation7 + $0x14e8] sm:$0xff] }
 0x224   :  { %4659 = vmatpush1.bf16.msra.mxu0 %v4658_v52  ;;  %4467 = vmatpush1.bf16.msra.mxu1 %v4466_v53  ;;  %v4678_v52 = vpack.c.bf16 %v656_v44, %v648_v43  ;;  %v4486_v53 = vpack.c.bf16 %v910_v47, %v902_v42  ;;  %v982_v42 = vld [vmem:[#allocation7 + $0x14a0] sm:$0xff]  ;;  %v728_v43 = vld [vmem:[#allocation7 + $0xcb0] sm:$0xff] }
 0x225   :  { %4661 = vmatprep.subr.bf16.mxu0 %v4660_v54  ;;  %4469 = vmatprep.subr.bf16.mxu1 %v4468_v57  ;;  %v4680_v54 = vpack.c.bf16 %v673_v49, %v665_v48  ;;  %v4488_v57 = vpack.c.bf16 %v927_v24, %v919_v51  ;;  %v736_v44 = vld [vmem:[#allocation7 + $0xcf0] sm:$0xff]  ;;  %v990_v47 = vld [vmem:[#allocation7 + $0x14e0] sm:$0xff]  ;;  %v745_v48 = vld [vmem:[#allocation7 + $0xd38] sm:$0xff] }
 0x226   :  { %v753_v49 = vld [vmem:[#allocation7 + $0xd78] sm:$0xff]  ;;  %v999_v51 = vld [vmem:[#allocation7 + $0x1528] sm:$0xff] }
 0x227   :  { %2305 = vmatmul.mubr.f32.vlgmr.msra.gmra.mrb[4].mxu0 %v5746_v62  ;;  %2092 = vmatmul.mubr.f32.vlgmr.msra.gmra.mrb[2].mxu1 %v5760_v9  ;;  %v4476_v62 = vpack.c.bf16 %v879_v8, %v871_v7  ;;  %v951_v7 = vld [vmem:[#allocation7 + $0x13a8] sm:$0xff] }
 0x228   :  { %4663 = vmatpush1.bf16.msra.mxu0 %v4662_v63  ;;  %4471 = vmatpush1.bf16.msra.mxu1 %v4470_v0  ;;  %v4682_v63 = vpack.c.bf16 %v672_v56, %v664_v55  ;;  %v4490_v0 = vpack.c.bf16 %v926_v58, %v918_v19  ;;  %v959_v8 = vld [vmem:[#allocation7 + $0x13e8] sm:$0xff]  ;;  %v998_v19 = vld [vmem:[#allocation7 + $0x1520] sm:$0xff]  ;;  %v744_v55 = vld [vmem:[#allocation7 + $0xd30] sm:$0xff] }
 0x229   :  { %4665 = vmatprep.subr.bf16.mxu0 %v4664_v1  ;;  %4473 = vmatprep.subr.bf16.mxu1 %v4472_v40  ;;  %v4684_v1 = vpack.c.bf16 %v689_v60, %v681_v59  ;;  %v4492_v40 = vpack.c.bf16 %v943_v61, %v935_v32  ;;  %v1007_v24 = vld [vmem:[#allocation7 + $0x1568] sm:$0xff]  ;;  %v752_v56 = vld [vmem:[#allocation7 + $0xd70] sm:$0xff]  ;;  %v1006_v58 = vld [vmem:[#allocation7 + $0x1560] sm:$0xff] }
 0x22a   :  { %2162 = vmatprep.mubr.f32.mxu1 %v5766_v21  ;;  %2375 = vmatprep.mubr.f32.mxu0 %v5752_v6  ;;  %v4482_v6 = vpack.c.bf16 %v894_v33, %v886_v28  ;;  %v966_v28 = vld [vmem:[#allocation7 + $0x1420] sm:$0xff]  ;;  %v761_v59 = vld [vmem:[#allocation7 + $0xdb8] sm:$0xff]  ;;  %v1015_v32 = vld [vmem:[#allocation7 + $0x15a8] sm:$0xff] }
 0x22b   :  { %v974_v33 = vld [vmem:[#allocation7 + $0x1460] sm:$0xff]  ;;  %v769_v60 = vld [vmem:[#allocation7 + $0xdf8] sm:$0xff]  ;;  %v1023_v61 = vld [vmem:[#allocation7 + $0x15e8] sm:$0xff] }
 0x22c   :  { %4667 = vmatpush1.bf16.msra.mxu0 %v4666_v10  ;;  %4475 = vmatpush1.bf16.msra.mxu1 %v4474_v11  ;;  %v4686_v10 = vpack.c.bf16 %v688_v45, %v680_v3  ;;  %v4494_v11 = vpack.c.bf16 %v942_v38, %v934_v2  ;;  %v1014_v2 = vld [vmem:[#allocation7 + $0x15a0] sm:$0xff]  ;;  %v760_v3 = vld [vmem:[#allocation7 + $0xdb0] sm:$0xff] }
 0x22d   :  { %4669 = vmatprep.subr.bf16.mxu0 %v4668_v12  ;;  %4477 = vmatprep.subr.bf16.mxu1 %v4476_v62  ;;  %v4688_v12 = vpack.c.bf16 %v705_v5, %v697_v4  ;;  %v4496_v62 = vpack.c.bf16 %v959_v8, %v951_v7  ;;  %v768_v45 = vld [vmem:[#allocation7 + $0xdf0] sm:$0xff]  ;;  %v1022_v38 = vld [vmem:[#allocation7 + $0x15e0] sm:$0xff]  ;;  %v777_v4 = vld [vmem:[#allocation7 + $0xe38] sm:$0xff] }
 0x22e   :  { %v785_v5 = vld [vmem:[#allocation7 + $0xe78] sm:$0xff]  ;;  %v1031_v7 = vld [vmem:[#allocation7 + $0x1628] sm:$0xff] }
 0x22f   :  { %v1039_v8 = vld [vmem:[#allocation7 + $0x1668] sm:$0xff] }
 0x230   :  { %4671 = vmatpush1.bf16.msra.mxu0 %v4670_v26  ;;  %4479 = vmatpush1.bf16.msra.mxu1 %v4478_v25  ;;  %v4690_v26 = vpack.c.bf16 %v704_v15, %v696_v14  ;;  %v4498_v25 = vpack.c.bf16 %v958_v16, %v950_v13  ;;  %v1030_v13 = vld [vmem:[#allocation7 + $0x1620] sm:$0xff]  ;;  %v776_v14 = vld [vmem:[#allocation7 + $0xe30] sm:$0xff] }
 0x231   :  { %4673 = vmatprep.subr.bf16.mxu0 %v4672_v27  ;;  %4481 = vmatprep.subr.bf16.mxu1 %v4480_v31  ;;  %v4692_v27 = vpack.c.bf16 %v721_v20, %v713_v18  ;;  %v4500_v31 = vpack.c.bf16 %v975_v23, %v967_v22  ;;  %v784_v15 = vld [vmem:[#allocation7 + $0xe70] sm:$0xff]  ;;  %v1038_v16 = vld [vmem:[#allocation7 + $0x1660] sm:$0xff]  ;;  %v793_v18 = vld [vmem:[#allocation7 + $0xeb8] sm:$0xff] }
 0x232   :  { %v801_v20 = vld [vmem:[#allocation7 + $0xef8] sm:$0xff]  ;;  %v1047_v22 = vld [vmem:[#allocation7 + $0x16a8] sm:$0xff] }
 0x233   :  { %v1055_v23 = vld [vmem:[#allocation7 + $0x16e8] sm:$0xff] }
 0x234   :  { %4675 = vmatpush1.bf16.msra.mxu0 %v4674_v39  ;;  %4483 = vmatpush1.bf16.msra.mxu1 %v4482_v6  ;;  %v4694_v39 = vpack.c.bf16 %v720_v30, %v712_v29  ;;  %v4502_v6 = vpack.c.bf16 %v974_v33, %v966_v28  ;;  %v1046_v28 = vld [vmem:[#allocation7 + $0x16a0] sm:$0xff]  ;;  %v792_v29 = vld [vmem:[#allocation7 + $0xeb0] sm:$0xff] }
 0x235   :  { %4677 = vmatprep.subr.bf16.mxu0 %v4676_v41  ;;  %4485 = vmatprep.subr.bf16.mxu1 %v4484_v46  ;;  %v4696_v41 = vpack.c.bf16 %v737_v35, %v729_v34  ;;  %v4504_v46 = vpack.c.bf16 %v991_v37, %v983_v36  ;;  %v800_v30 = vld [vmem:[#allocation7 + $0xef0] sm:$0xff]  ;;  %v1054_v33 = vld [vmem:[#allocation7 + $0x16e0] sm:$0xff]  ;;  %v809_v34 = vld [vmem:[#allocation7 + $0xf38] sm:$0xff] }
 0x236   :  { %v817_v35 = vld [vmem:[#allocation7 + $0xf78] sm:$0xff]  ;;  %v1063_v36 = vld [vmem:[#allocation7 + $0x1728] sm:$0xff] }
 0x237   :  { %v1071_v37 = vld [vmem:[#allocation7 + $0x1768] sm:$0xff] }
 0x238   :  { %4679 = vmatpush1.bf16.msra.mxu0 %v4678_v52  ;;  %4487 = vmatpush1.bf16.msra.mxu1 %v4486_v53  ;;  %v4698_v52 = vpack.c.bf16 %v736_v44, %v728_v43  ;;  %v4506_v53 = vpack.c.bf16 %v990_v47, %v982_v42  ;;  %v1062_v42 = vld [vmem:[#allocation7 + $0x1720] sm:$0xff]  ;;  %v808_v43 = vld [vmem:[#allocation7 + $0xf30] sm:$0xff] }
 0x239   :  { %4681 = vmatprep.subr.bf16.mxu0 %v4680_v54  ;;  %4489 = vmatprep.subr.bf16.mxu1 %v4488_v57  ;;  %v4700_v54 = vpack.c.bf16 %v753_v49, %v745_v48  ;;  %v4508_v57 = vpack.c.bf16 %v1007_v24, %v999_v51  ;;  %v816_v44 = vld [vmem:[#allocation7 + $0xf70] sm:$0xff]  ;;  %v1070_v47 = vld [vmem:[#allocation7 + $0x1760] sm:$0xff]  ;;  %v825_v48 = vld [vmem:[#allocation7 + $0xfb8] sm:$0xff] }
 0x23a   :  { %v833_v49 = vld [vmem:[#allocation7 + $0xff8] sm:$0xff]  ;;  %v1079_v51 = vld [vmem:[#allocation7 + $0x17a8] sm:$0xff] }
 0x23b   :  { %v1087_v24 = vld [vmem:[#allocation7 + $0x17e8] sm:$0xff] }
 0x23c   :  { %4683 = vmatpush1.bf16.msra.mxu0 %v4682_v63  ;;  %4491 = vmatpush1.bf16.msra.mxu1 %v4490_v0  ;;  %v4702_v63 = vpack.c.bf16 %v752_v56, %v744_v55  ;;  %v4510_v0 = vpack.c.bf16 %v1006_v58, %v998_v19  ;;  %v1078_v19 = vld [vmem:[#allocation7 + $0x17a0] sm:$0xff]  ;;  %v824_v55 = vld [vmem:[#allocation7 + $0xfb0] sm:$0xff] }
 0x23d   :  { %4685 = vmatprep.subr.bf16.mxu0 %v4684_v1  ;;  %4493 = vmatprep.subr.bf16.mxu1 %v4492_v40  ;;  %v4704_v1 = vpack.c.bf16 %v769_v60, %v761_v59  ;;  %v4512_v40 = vpack.c.bf16 %v1023_v61, %v1015_v32  ;;  %v832_v56 = vld [vmem:[#allocation7 + $0xff0] sm:$0xff]  ;;  %v1086_v58 = vld [vmem:[#allocation7 + $0x17e0] sm:$0xff]  ;;  %v841_v59 = vld [vmem:[#allocation7 + $0x1038] sm:$0xff] }
 0x23e   :  { %v849_v60 = vld [vmem:[#allocation7 + $0x1078] sm:$0xff]  ;;  %v1095_v32 = vld [vmem:[#allocation7 + $0x1828] sm:$0xff] }
 0x23f   :  { %v1103_v61 = vld [vmem:[#allocation7 + $0x1868] sm:$0xff] }
 0x240   :  { %4687 = vmatpush1.bf16.msra.mxu0 %v4686_v10  ;;  %4495 = vmatpush1.bf16.msra.mxu1 %v4494_v11  ;;  %v4706_v10 = vpack.c.bf16 %v768_v45, %v760_v3  ;;  %v4514_v11 = vpack.c.bf16 %v1022_v38, %v1014_v2  ;;  %v1094_v2 = vld [vmem:[#allocation7 + $0x1820] sm:$0xff]  ;;  %v840_v3 = vld [vmem:[#allocation7 + $0x1030] sm:$0xff] }
 0x241   :  { %4689 = vmatprep.subr.bf16.mxu0 %v4688_v12  ;;  %4497 = vmatprep.subr.bf16.mxu1 %v4496_v62  ;;  %v4708_v12 = vpack.c.bf16 %v785_v5, %v777_v4  ;;  %v4516_v62 = vpack.c.bf16 %v1039_v8, %v1031_v7  ;;  %v848_v45 = vld [vmem:[#allocation7 + $0x1070] sm:$0xff]  ;;  %v1102_v38 = vld [vmem:[#allocation7 + $0x1860] sm:$0xff]  ;;  %v857_v4 = vld [vmem:[#allocation7 + $0x10b8] sm:$0xff] }
 0x242   :  { %v865_v5 = vld [vmem:[#allocation7 + $0x10f8] sm:$0xff]  ;;  %v1111_v7 = vld [vmem:[#allocation7 + $0x18a8] sm:$0xff] }
 0x243   :  { %v1119_v8 = vld [vmem:[#allocation7 + $0x18e8] sm:$0xff] }
 0x244   :  { %4691 = vmatpush1.bf16.msra.mxu0 %v4690_v26  ;;  %4499 = vmatpush1.bf16.msra.mxu1 %v4498_v25  ;;  %v4710_v26 = vpack.c.bf16 %v784_v15, %v776_v14  ;;  %v4518_v25 = vpack.c.bf16 %v1038_v16, %v1030_v13  ;;  %v1110_v13 = vld [vmem:[#allocation7 + $0x18a0] sm:$0xff]  ;;  %v856_v14 = vld [vmem:[#allocation7 + $0x10b0] sm:$0xff] }
 0x245   :  { %4693 = vmatprep.subr.bf16.mxu0 %v4692_v27  ;;  %4501 = vmatprep.subr.bf16.mxu1 %v4500_v31  ;;  %v4712_v27 = vpack.c.bf16 %v801_v20, %v793_v18  ;;  %v4520_v31 = vpack.c.bf16 %v1055_v23, %v1047_v22  ;;  %v864_v15 = vld [vmem:[#allocation7 + $0x10f0] sm:$0xff]  ;;  %v1118_v16 = vld [vmem:[#allocation7 + $0x18e0] sm:$0xff]  ;;  %v873_v18 = vld [vmem:[#allocation7 + $0x1138] sm:$0xff] }
 0x246   :  { %v881_v20 = vld [vmem:[#allocation7 + $0x1178] sm:$0xff]  ;;  %v1127_v22 = vld [vmem:[#allocation7 + $0x1928] sm:$0xff] }
 0x247   :  { %v1135_v23 = vld [vmem:[#allocation7 + $0x1968] sm:$0xff] }
 0x248   :  { %4695 = vmatpush1.bf16.msra.mxu0 %v4694_v39  ;;  %4503 = vmatpush1.bf16.msra.mxu1 %v4502_v6  ;;  %v4714_v39 = vpack.c.bf16 %v800_v30, %v792_v29  ;;  %v4522_v6 = vpack.c.bf16 %v1054_v33, %v1046_v28  ;;  %v4732_v28 = vpack.c.bf16 %v881_v20, %v873_v18  ;;  %v1126_v29 = vld [vmem:[#allocation7 + $0x1920] sm:$0xff]  ;;  %v872_v30 = vld [vmem:[#allocation7 + $0x1130] sm:$0xff]  ;;  %v953_v20 = vld [vmem:[#allocation7 + $0x13b8] sm:$0xff] }
 0x249   :  { %4697 = vmatprep.subr.bf16.mxu0 %v4696_v41  ;;  %4505 = vmatprep.subr.bf16.mxu1 %v4504_v46  ;;  %v4716_v41 = vpack.c.bf16 %v817_v35, %v809_v34  ;;  %v4524_v46 = vpack.c.bf16 %v1071_v37, %v1063_v36  ;;  %v1134_v33 = vld [vmem:[#allocation7 + $0x1960] sm:$0xff]  ;;  %v889_v34 = vld [vmem:[#allocation7 + $0x11b8] sm:$0xff]  ;;  %v1143_v37 = vld [vmem:[#allocation7 + $0x19a8] sm:$0xff] }
 0x24a   :  { %v897_v35 = vld [vmem:[#allocation7 + $0x11f8] sm:$0xff]  ;;  %v1198_v18 = vld [vmem:[#allocation7 + $0x1b60] sm:$0xff] }
 0x24b   :  { %v5780_v36 = vld [vmem:[%s5883_s1 + $0x38] sm:$0xff] }
 0x24c   :  { %4699 = vmatpush1.bf16.msra.mxu0 %v4698_v52  ;;  %4507 = vmatpush1.bf16.msra.mxu1 %v4506_v53  ;;  %v4718_v52 = vpack.c.bf16 %v816_v44, %v808_v43  ;;  %v4526_v53 = vpack.c.bf16 %v1070_v47, %v1062_v42  ;;  %v4736_v42 = vpack.c.bf16 %v897_v35, %v889_v34  ;;  %v1142_v43 = vld [vmem:[#allocation7 + $0x19a0] sm:$0xff]  ;;  %v888_v44 = vld [vmem:[#allocation7 + $0x11b0] sm:$0xff] }
 0x24d   :  { %4701 = vmatprep.subr.bf16.mxu0 %v4700_v54  ;;  %4509 = vmatprep.subr.bf16.mxu1 %v4508_v57  ;;  %v4720_v54 = vpack.c.bf16 %v833_v49, %v825_v48  ;;  %v4528_v57 = vpack.c.bf16 %v1087_v24, %v1079_v51  ;;  %v1150_v48 = vld [vmem:[#allocation7 + $0x19e0] sm:$0xff]  ;;  %v905_v49 = vld [vmem:[#allocation7 + $0x1238] sm:$0xff]  ;;  %v1159_v24 = vld [vmem:[#allocation7 + $0x1a28] sm:$0xff] }
 0x24e   :  { %v913_v51 = vld [vmem:[#allocation7 + $0x1278] sm:$0xff]  ;;  %v1206_v34 = vld [vmem:[#allocation7 + $0x1ba0] sm:$0xff]  ;;  %v952_v35 = vld [vmem:[#allocation7 + $0x13b0] sm:$0xff] }
 0x250   :  { %4703 = vmatpush1.bf16.msra.mxu0 %v4702_v63  ;;  %4511 = vmatpush1.bf16.msra.mxu1 %v4510_v0  ;;  %v4722_v63 = vpack.c.bf16 %v832_v56, %v824_v55  ;;  %v4530_v0 = vpack.c.bf16 %v1086_v58, %v1078_v19  ;;  %v1158_v19 = vld [vmem:[#allocation7 + $0x1a20] sm:$0xff]  ;;  %v904_v55 = vld [vmem:[#allocation7 + $0x1230] sm:$0xff] }
 0x251   :  { %4705 = vmatprep.subr.bf16.mxu0 %v4704_v1  ;;  %4513 = vmatprep.subr.bf16.mxu1 %v4512_v40  ;;  %v4724_v1 = vpack.c.bf16 %v849_v60, %v841_v59  ;;  %v4532_v40 = vpack.c.bf16 %v1103_v61, %v1095_v32  ;;  %v912_v56 = vld [vmem:[#allocation7 + $0x1270] sm:$0xff]  ;;  %v1166_v58 = vld [vmem:[#allocation7 + $0x1a60] sm:$0xff]  ;;  %v921_v59 = vld [vmem:[#allocation7 + $0x12b8] sm:$0xff] }
 0x252   :  { %v929_v60 = vld [vmem:[#allocation7 + $0x12f8] sm:$0xff]  ;;  %v1175_v32 = vld [vmem:[#allocation7 + $0x1aa8] sm:$0xff] }
 0x253   :  { %v1183_v61 = vld [vmem:[#allocation7 + $0x1ae8] sm:$0xff] }
 0x254   :  { %4707 = vmatpush1.bf16.msra.mxu0 %v4706_v10  ;;  %4515 = vmatpush1.bf16.msra.mxu1 %v4514_v11  ;;  %v4726_v10 = vpack.c.bf16 %v848_v45, %v840_v3  ;;  %v4534_v11 = vpack.c.bf16 %v1102_v38, %v1094_v2  ;;  %v1174_v2 = vld [vmem:[#allocation7 + $0x1aa0] sm:$0xff]  ;;  %v920_v3 = vld [vmem:[#allocation7 + $0x12b0] sm:$0xff] }
 0x255   :  { %4709 = vmatprep.subr.bf16.mxu0 %v4708_v12  ;;  %4517 = vmatprep.subr.bf16.mxu1 %v4516_v62  ;;  %v4728_v12 = vpack.c.bf16 %v865_v5, %v857_v4  ;;  %v4536_v62 = vpack.c.bf16 %v1119_v8, %v1111_v7  ;;  %v928_v45 = vld [vmem:[#allocation7 + $0x12f0] sm:$0xff]  ;;  %v1182_v38 = vld [vmem:[#allocation7 + $0x1ae0] sm:$0xff]  ;;  %v937_v4 = vld [vmem:[#allocation7 + $0x1338] sm:$0xff]  ;;  %v221_v7 = vlaneseq }
 0x256   :  { %v945_v5 = vld [vmem:[#allocation7 + $0x1378] sm:$0xff]  ;;  %v1191_v8 = vld [vmem:[#allocation7 + $0x1b28] sm:$0xff] }
 0x258   :  { %4711 = vmatpush1.bf16.msra.mxu0 %v4710_v26  ;;  %4519 = vmatpush1.bf16.msra.mxu1 %v4518_v25  ;;  %v5774_v26 = vld [vmem:[%s5883_s1 + $0x20] sm:$0xff]  ;;  %v4730_v25 = vpack.c.bf16 %v864_v15, %v856_v14  ;;  %v936_v15 = vld [vmem:[#allocation7 + $0x1330] sm:$0xff] }
 0x259   :  { %4713 = vmatprep.subr.bf16.mxu0 %v4712_v27  ;;  %4521 = vmatprep.subr.bf16.mxu1 %v4520_v31  ;;  %v4538_v27 = vpack.c.bf16 %v1118_v16, %v1110_v13  ;;  %v880_v31 = vld [vmem:[#allocation7 + $0x1170] sm:$0xff]  ;;  %v4748_v13 = vpack.c.bf16 %v945_v5, %v937_v4  ;;  %v1190_v14 = vld [vmem:[#allocation7 + $0x1b20] sm:$0xff] }
 0x25c   :  { %4715 = vmatpush1.bf16.msra.mxu0 %v4714_v39  ;;  %4523 = vmatpush1.bf16.msra.mxu1 %v4522_v6  ;;  %v1151_v39 = vld [vmem:[#allocation7 + $0x19e8] sm:$0xff]  ;;  %v4734_v6 = vpack.c.bf16 %v880_v31, %v872_v30 }
 0x25d   :  { %4717 = vmatprep.subr.bf16.mxu0 %v4716_v41  ;;  %4525 = vmatprep.subr.bf16.mxu1 %v4524_v46  ;;  %v4542_v41 = vpack.c.bf16 %v1134_v33, %v1126_v29  ;;  %v896_v46 = vld [vmem:[#allocation7 + $0x11f0] sm:$0xff]  ;;  %v4544_v47 = vpack.c.bf16 %v1151_v39, %v1143_v37  ;;  %v5788_v29 = vld [vmem:[#allocation8] sm:$0xff] }
 0x25e   :  { %v960_v37 = vld [vmem:[#allocation7 + $0x13f0] sm:$0xff] }
 0x260   :  { %4719 = vmatpush1.bf16.msra.mxu0 %v4718_v52  ;;  %4527 = vmatpush1.bf16.msra.mxu1 %v4526_v53  ;;  %v1167_v52 = vld [vmem:[#allocation7 + $0x1a68] sm:$0xff]  ;;  %v4738_v53 = vpack.c.bf16 %v896_v46, %v888_v44 }
 0x261   :  { %4721 = vmatprep.subr.bf16.mxu0 %v4720_v54  ;;  %4529 = vmatprep.subr.bf16.mxu1 %v4528_v57  ;;  %v4740_v54 = vpack.c.bf16 %v913_v51, %v905_v49  ;;  %v4548_v57 = vpack.c.bf16 %v1167_v52, %v1159_v24  ;;  %v1223_v44 = vld [vmem:[#allocation7 + $0x1c28] sm:$0xff]  ;;  %v1222_v24 = vld [vmem:[#allocation7 + $0x1c20] sm:$0xff]  ;;  %v968_v52 = vld [vmem:[#allocation7 + $0x1430] sm:$0xff] }
 0x262   :  { %v1231_v46 = vld [vmem:[#allocation7 + $0x1c68] sm:$0xff] }
 0x264   :  { %4723 = vmatpush1.bf16.msra.mxu0 %v4722_v63  ;;  %4531 = vmatpush1.bf16.msra.mxu1 %v4530_v0  ;;  %v4742_v63 = vpack.c.bf16 %v912_v56, %v904_v55  ;;  %v4550_v0 = vpack.c.bf16 %v1166_v58, %v1158_v19  ;;  %v985_v19 = vld [vmem:[#allocation7 + $0x14b8] sm:$0xff]  ;;  %v1239_v56 = vld [vmem:[#allocation7 + $0x1ca8] sm:$0xff] }
 0x265   :  { %4725 = vmatprep.subr.bf16.mxu0 %v4724_v1  ;;  %4533 = vmatprep.subr.bf16.mxu1 %v4532_v40  ;;  %v4744_v1 = vpack.c.bf16 %v929_v60, %v921_v59  ;;  %v4552_v40 = vpack.c.bf16 %v1183_v61, %v1175_v32  ;;  %v993_v55 = vld [vmem:[#allocation7 + $0x14f8] sm:$0xff]  ;;  %v1238_v61 = vld [vmem:[#allocation7 + $0x1ca0] sm:$0xff] }
 0x266   :  { %v4760_v32 = vpack.c.bf16 %v993_v55, %v985_v19  ;;  %v1302_v55 = vld [vmem:[#allocation7 + $0x1ea0] sm:$0xff] }
 0x267   :  { %2376 = vmatmul.mubr.f32.vlgmr.msra.gmra.mrb[4].mxu0 %v5760_v9  ;;  %2163 = vmatmul.mubr.f32.vlgmr.msra.gmra.mrb[2].mxu1 %v5774_v26  ;;  %v4540_v9 = vpack.c.bf16 %v1135_v23, %v1127_v22  ;;  %v961_v22 = vld [vmem:[#allocation7 + $0x13f8] sm:$0xff]  ;;  %v5784_v23 = vshrl.u32 %v221_v7, 7 }
 0x268   :  { %4727 = vmatpush1.bf16.msra.mxu0 %v4726_v10  ;;  %4535 = vmatpush1.bf16.msra.mxu1 %v4534_v11  ;;  %v1199_v10 = vld [vmem:[#allocation7 + $0x1b68] sm:$0xff]  ;;  %v4746_v11 = vpack.c.bf16 %v928_v45, %v920_v3  ;;  %v4752_v33 = vpack.c.bf16 %v961_v22, %v953_v20  ;;  %v1001_v3 = vld [vmem:[#allocation7 + $0x1538] sm:$0xff] }
 0x269   :  { %4729 = vmatprep.subr.bf16.mxu0 %v4728_v12  ;;  %4537 = vmatprep.subr.bf16.mxu1 %v4536_v62  ;;  %v4554_v12 = vpack.c.bf16 %v1182_v38, %v1174_v2  ;;  %v944_v62 = vld [vmem:[#allocation7 + $0x1370] sm:$0xff]  ;;  %v4556_v16 = vpack.c.bf16 %v1199_v10, %v1191_v8  ;;  %v1246_v2 = vld [vmem:[#allocation7 + $0x1ce0] sm:$0xff]  ;;  %v1009_v45 = vld [vmem:[#allocation7 + $0x1578] sm:$0xff] }
 0x26a   :  { %2233 = vmatprep.mubr.f32.mxu1 %v5780_v36  ;;  %2446 = vmatprep.mubr.f32.mxu0 %v5766_v21  ;;  %v4546_v21 = vpack.c.bf16 %v1150_v48, %v1142_v43  ;;  %v4750_v31 = vpack.c.bf16 %v944_v62, %v936_v15  ;;  %v5791_v43 = vsub.s32 1, %v5784_v23  ;;  %v1263_v38 = vld [vmem:[#allocation7 + $0x1d68] sm:$0xff]  ;;  %v4570_v7 = vpack.c.bf16 %v1246_v2, %v1238_v61  ;;  %v1254_v10 = vld [vmem:[#allocation7 + $0x1d20] sm:$0xff]  ;;  %v1017_v15 = vld [vmem:[#allocation7 + $0x15b8] sm:$0xff] }
 0x26b   :  { %v4764_v8 = vpack.c.bf16 %v1009_v45, %v1001_v3  ;;  %v1025_v62 = vld [vmem:[#allocation7 + $0x15f8] sm:$0xff]  ;;  %v1318_v45 = vld [vmem:[#allocation7 + $0x1f20] sm:$0xff] }
 0x26c   :  { %4731 = vmatpush1.bf16.msra.mxu0 %v4730_v25  ;;  %4539 = vmatpush1.bf16.msra.mxu1 %v4538_v27  ;;  %v1207_v27 = vld [vmem:[#allocation7 + $0x1ba8] sm:$0xff]  ;;  %v1355_v48 = vrot.slane %v5788_v29, %v5791_v43 }
 0x26d   :  { %4733 = vmatprep.subr.bf16.mxu0 %v4732_v28  ;;  %4541 = vmatprep.subr.bf16.mxu1 %v4540_v9  ;;  %v1215_v28 = vld [vmem:[#allocation7 + $0x1be8] sm:$0xff]  ;;  %v4558_v9 = vpack.c.bf16 %v1198_v18, %v1190_v14  ;;  %v1262_v14 = vld [vmem:[#allocation7 + $0x1d60] sm:$0xff] }
 0x26e   :  { %v4560_v39 = vpack.c.bf16 %v1215_v28, %v1207_v27  ;;  %v1279_v18 = vld [vmem:[#allocation7 + $0x1de8] sm:$0xff]  ;;  %v4574_v22 = vpack.c.bf16 %v1262_v14, %v1254_v10  ;;  %v4768_v27 = vpack.c.bf16 %v1025_v62, %v1017_v15  ;;  %v1270_v28 = vld [vmem:[#allocation7 + $0x1da0] sm:$0xff]  ;;  %v1089_v10 = vld [vmem:[#allocation7 + $0x17f8] sm:$0xff] }
 0x26f   :  { %v1334_v62 = vld [vmem:[#allocation7 + $0x1fa0] sm:$0xff] }
 0x270   :  { %4735 = vmatpush1.bf16.msra.mxu0 %v4734_v6  ;;  %4543 = vmatpush1.bf16.msra.mxu1 %v4542_v41  ;;  %v1214_v6 = vld [vmem:[#allocation7 + $0x1be0] sm:$0xff]  ;;  %v969_v41 = vld [vmem:[#allocation7 + $0x1438] sm:$0xff] }
 0x271   :  { %4737 = vmatprep.subr.bf16.mxu0 %v4736_v42  ;;  %4545 = vmatprep.subr.bf16.mxu1 %v4544_v47  ;;  %v977_v42 = vld [vmem:[#allocation7 + $0x1478] sm:$0xff]  ;;  %v4754_v47 = vpack.c.bf16 %v960_v37, %v952_v35  ;;  %v4562_v49 = vpack.c.bf16 %v1214_v6, %v1206_v34  ;;  %v1287_v37 = vld [vmem:[#allocation7 + $0x1e28] sm:$0xff] }
 0x272   :  { %v4756_v51 = vpack.c.bf16 %v977_v42, %v969_v41  ;;  %v1033_v34 = vld [vmem:[#allocation7 + $0x1638] sm:$0xff] }
 0x273   :  { %v1041_v35 = vld [vmem:[#allocation7 + $0x1678] sm:$0xff] }
 0x274   :  { %4739 = vmatpush1.bf16.msra.mxu0 %v4738_v53  ;;  %4547 = vmatpush1.bf16.msra.mxu1 %v4546_v21  ;;  %v976_v53 = vld [vmem:[#allocation7 + $0x1470] sm:$0xff]  ;;  %v4564_v21 = vpack.c.bf16 %v1231_v46, %v1223_v44  ;;  %v4772_v42 = vpack.c.bf16 %v1041_v35, %v1033_v34  ;;  %v1286_v44 = vld [vmem:[#allocation7 + $0x1e20] sm:$0xff] }
 0x275   :  { %4741 = vmatprep.subr.bf16.mxu0 %v4740_v54  ;;  %4549 = vmatprep.subr.bf16.mxu1 %v4548_v57  ;;  %v1230_v54 = vld [vmem:[#allocation7 + $0x1c60] sm:$0xff]  ;;  %v1247_v57 = vld [vmem:[#allocation7 + $0x1ce8] sm:$0xff]  ;;  %v4758_v58 = vpack.c.bf16 %v976_v53, %v968_v52  ;;  %v1032_v46 = vld [vmem:[#allocation7 + $0x1630] sm:$0xff] }
 0x276   :  { %v4566_v60 = vpack.c.bf16 %v1230_v54, %v1222_v24  ;;  %v1057_v24 = vld [vmem:[#allocation7 + $0x16f8] sm:$0xff]  ;;  %v1303_v52 = vld [vmem:[#allocation7 + $0x1ea8] sm:$0xff] }
 0x277   :  { %v1311_v53 = vld [vmem:[#allocation7 + $0x1ee8] sm:$0xff] }
 0x278   :  { %4743 = vmatpush1.bf16.msra.mxu0 %v4742_v63  ;;  %4551 = vmatpush1.bf16.msra.mxu1 %v4550_v0  ;;  %v984_v63 = vld [vmem:[#allocation7 + $0x14b0] sm:$0xff] }
 0x279   :  { %4745 = vmatprep.subr.bf16.mxu0 %v4744_v1  ;;  %4553 = vmatprep.subr.bf16.mxu1 %v4552_v40  ;;  %v992_v0 = vld [vmem:[#allocation7 + $0x14f0] sm:$0xff]  ;;  %v4568_v1 = vpack.c.bf16 %v1247_v57, %v1239_v56  ;;  %v1255_v40 = vld [vmem:[#allocation7 + $0x1d28] sm:$0xff] }
 0x27a   :  { %v5786_v25 = vpop.f32.mrb[0].mxu1  ;;  %v4762_v4 = vpack.c.bf16 %v992_v0, %v984_v63  ;;  %v1048_v56 = vld [vmem:[#allocation7 + $0x16b0] sm:$0xff]  ;;  %v1319_v63 = vld [vmem:[#allocation7 + $0x1f28] sm:$0xff] }
 0x27b   :  { %v1669_v30 = vpop.f32.mrb[1].mxu1  ;;  %v1056_v57 = vld [vmem:[#allocation7 + $0x16f0] sm:$0xff]  ;;  %v1327_v0 = vld [vmem:[#allocation7 + $0x1f68] sm:$0xff] }
 0x27c   :  { %4747 = vmatpush1.bf16.msra.mxu0 %v4746_v11  ;;  %4555 = vmatpush1.bf16.msra.mxu1 %v4554_v12  ;;  %v5141_v59 = vadd.f32 %v1669_v30, %v1355_v48  ;;  %v1000_v11 = vld [vmem:[#allocation7 + $0x1530] sm:$0xff] }
 0x27d   :  { %4749 = vmatprep.subr.bf16.mxu0 %v4748_v13  ;;  %4557 = vmatprep.subr.bf16.mxu1 %v4556_v16  ;;  %v1008_v12 = vld [vmem:[#allocation7 + $0x1570] sm:$0xff]  ;;  %v4572_v13 = vpack.c.bf16 %v1263_v38, %v1255_v40  ;;  %v1271_v16 = vld [vmem:[#allocation7 + $0x1da8] sm:$0xff] }
 0x27e   :  { %v3580_v5 = vmul.f32 -1.442695, %v5141_v59  ;;  %v4766_v20 = vpack.c.bf16 %v1008_v12, %v1000_v11  ;;  %v1016_v30 = vld [vmem:[#allocation7 + $0x15b0] sm:$0xff]  ;;  %v1310_v59 = vld [vmem:[#allocation7 + $0x1ee0] sm:$0xff]  ;;  %v1335_v11 = vld [vmem:[#allocation7 + $0x1fa8] sm:$0xff] }
 0x27f   :  { %v4586_v2 = vpack.c.bf16 %v1310_v59, %v1302_v55  ;;  %v1064_v40 = vld [vmem:[#allocation7 + $0x1730] sm:$0xff]  ;;  %v1343_v12 = vld [vmem:[#allocation7 + $0x1fe8] sm:$0xff] }
 0x280   :  { %4751 = vmatpush1.bf16.msra.mxu0 %v4750_v31  ;;  %4559 = vmatpush1.bf16.msra.mxu1 %v4558_v9  ;;  %5189 = vpow2.f32 %v3580_v5  ;;  %v1024_v31 = vld [vmem:[#allocation7 + $0x15f0] sm:$0xff]  ;;  %v4576_v9 = vpack.c.bf16 %v1279_v18, %v1271_v16  ;;  %v4588_v5 = vpack.c.bf16 %v1327_v0, %v1319_v63  ;;  %v2624_v59 = vld [vmem:[#allocation11 + $0xa0] sm:$0xff] }
 0x281   :  { %4753 = vmatprep.subr.bf16.mxu0 %v4752_v33  ;;  %4561 = vmatprep.subr.bf16.mxu1 %v4560_v39  ;;  %v1278_v33 = vld [vmem:[#allocation7 + $0x1de0] sm:$0xff]  ;;  %v1295_v39 = vld [vmem:[#allocation7 + $0x1e68] sm:$0xff]  ;;  %v4770_v6 = vpack.c.bf16 %v1024_v31, %v1016_v30  ;;  %v1072_v38 = vld [vmem:[#allocation7 + $0x1770] sm:$0xff] }
 0x282   :  { %v4578_v41 = vpack.c.bf16 %v1278_v33, %v1270_v28  ;;  %v4580_v48 = vpack.c.bf16 %v1295_v39, %v1287_v37  ;;  %v1080_v16 = vld [vmem:[#allocation7 + $0x17b0] sm:$0xff]  ;;  %v1097_v28 = vld [vmem:[#allocation7 + $0x1838] sm:$0xff]  ;;  %v2620_v31 = vld [vmem:[#allocation11 + $0x80] sm:$0xff] }
 0x283   :  { %v1088_v18 = vld [vmem:[#allocation7 + $0x17f0] sm:$0xff]  ;;  %v1105_v30 = vld [vmem:[#allocation7 + $0x1878] sm:$0xff] }
 0x284   :  { %4755 = vmatpush1.bf16.msra.mxu0 %v4754_v47  ;;  %4563 = vmatpush1.bf16.msra.mxu1 %v4562_v49  ;;  %v1040_v47 = vld [vmem:[#allocation7 + $0x1670] sm:$0xff]  ;;  %v1294_v49 = vld [vmem:[#allocation7 + $0x1e60] sm:$0xff]  ;;  %v4786_v34 = vpack.c.bf16 %v1088_v18, %v1080_v16  ;;  %v4788_v37 = vpack.c.bf16 %v1105_v30, %v1097_v28  ;;  %v1161_v16 = vld [vmem:[#allocation7 + $0x1a38] sm:$0xff] }
 0x285   :  { %4757 = vmatprep.subr.bf16.mxu0 %v4756_v51  ;;  %4565 = vmatprep.subr.bf16.mxu1 %v4564_v21  ;;  %v1049_v51 = vld [vmem:[#allocation7 + $0x16b8] sm:$0xff]  ;;  %v4774_v21 = vpack.c.bf16 %v1040_v47, %v1032_v46  ;;  %v4582_v54 = vpack.c.bf16 %v1294_v49, %v1286_v44  ;;  %v1096_v39 = vld [vmem:[#allocation7 + $0x1830] sm:$0xff]  ;;  %v2623_v49 = vld [vmem:[#allocation11 + $0x98] sm:$0xff] }
 0x286   :  { %v4776_v19 = vpack.c.bf16 %v1057_v24, %v1049_v51  ;;  %v2605_v44 = vld [vmem:[#allocation11 + $0x8] sm:$0xff]  ;;  %v1113_v46 = vld [vmem:[#allocation7 + $0x18b8] sm:$0xff] }
 0x287   :  { %v1121_v47 = vld [vmem:[#allocation7 + $0x18f8] sm:$0xff] }
 0x288   :  { %4759 = vmatpush1.bf16.msra.mxu0 %v4758_v58  ;;  %4567 = vmatpush1.bf16.msra.mxu1 %v4566_v60  ;;  %v4584_v58 = vpack.c.bf16 %v1311_v53, %v1303_v52  ;;  %v1065_v60 = vld [vmem:[#allocation7 + $0x1738] sm:$0xff]  ;;  %v1112_v53 = vld [vmem:[#allocation7 + $0x18b0] sm:$0xff] }
 0x289   :  { %4761 = vmatprep.subr.bf16.mxu0 %v4760_v32  ;;  %4569 = vmatprep.subr.bf16.mxu1 %v4568_v1  ;;  %v1073_v32 = vld [vmem:[#allocation7 + $0x1778] sm:$0xff]  ;;  %v4778_v1 = vpack.c.bf16 %v1056_v57, %v1048_v56  ;;  %v2607_v56 = vld [vmem:[#allocation11 + $0x18] sm:$0xff] }
 0x28a   :  { %v5190_v61 = vpop.eup %5189  ;;  %v4780_v3 = vpack.c.bf16 %v1073_v32, %v1065_v60  ;;  %v1129_v57 = vld [vmem:[#allocation7 + $0x1938] sm:$0xff]  ;;  %v2625_v60 = vld [vmem:[#allocation11 + $0xa8] sm:$0xff] }
 0x28b   :  { %v1169_v18 = vld [vmem:[#allocation7 + $0x1a78] sm:$0xff] }
 0x28c   :  { %4763 = vmatpush1.bf16.msra.mxu0 %v4762_v4  ;;  %4571 = vmatpush1.bf16.msra.mxu1 %v4570_v7  ;;  %v2549_v4 = vadd.f32 1.0, %v5190_v61  ;;  %v1326_v7 = vld [vmem:[#allocation7 + $0x1f60] sm:$0xff]  ;;  %v5805_v61 = vld [vmem:[%s5883_s1 + $0x30] sm:$0xff]  ;;  %v4804_v30 = vpack.c.bf16 %v1169_v18, %v1161_v16  ;;  %v1225_v16 = vld [vmem:[#allocation7 + $0x1c38] sm:$0xff]  ;;  %s5490_s1 = smov [#allocation17]  }
 0x28d   :  { %4765 = vmatprep.subr.bf16.mxu0 %v4764_v8  ;;  %4573 = vmatprep.subr.bf16.mxu1 %v4572_v13  ;;  %v1081_v8 = vld [vmem:[#allocation7 + $0x17b8] sm:$0xff]  ;;  %v4782_v13 = vpack.c.bf16 %v1072_v38, %v1064_v40  ;;  %v4590_v14 = vpack.c.bf16 %v1326_v7, %v1318_v45  ;;  %v4860_v45 = vpack.c.bf16 %v2625_v60, %v2624_v59  ;;  %v2609_v40 = vld [vmem:[#allocation11 + $0x28] sm:$0xff]  ;;  %v2627_v7 = vld [vmem:[#allocation11 + $0xb8] sm:$0xff]  ;;  %s3564_s30 = sshll.u32 %s5490_s1, 4  ;;  %s3565_s30 = int_to_ptr.vmem [resolvable:$true] %s3564_s30 }
 0x28e   :  { %v4784_v15 = vpack.c.bf16 %v1089_v10, %v1081_v8  ;;  %5191 = vrcp.f32 %v2549_v4  ;;  %v1145_v38 = vld [vmem:[#allocation7 + $0x19b8] sm:$0xff]  ;;  %s5440_s0 = scalar_lea.vmem %s3565_s30, 1024  ;;  %p5445_p3 = scmp.lt.s32.totalorder %s3565_s30, %s3565_s30 }
 0x28f   :  { %v1153_v4 = vld [vmem:[#allocation7 + $0x19f8] sm:$0xff]  ;;  %p5441_p2 = scmp.ne.s32.totalorder %s3565_s30, %s5440_s0  ;;  %p5446_p4 = scmp.lt.s32.totalorder %s5440_s0, %s5440_s0 }
 0x290   :  { %4767 = vmatpush1.bf16.msra.mxu0 %v4766_v20  ;;  %4575 = vmatpush1.bf16.msra.mxu1 %v4574_v22  ;;  %v5796_v20 = vsub.s32 0, %v5784_v23  ;;  %v4592_v22 = vpack.c.bf16 %v1343_v12, %v1335_v11  ;;  %v4800_v11 = vpack.c.bf16 %v1153_v4, %v1145_v38  ;;  %v1144_v12 = vld [vmem:[#allocation7 + $0x19b0] sm:$0xff]  ;;  %v2635_v38 = vld [vmem:[#allocation11 + $0xf8] sm:$0xff]  ;;  %v1358_v4 = vsub.s32 2, %v5784_v23  ;;  %v1233_v18 = vld [vmem:[#allocation7 + $0x1c78] sm:$0xff] }
 0x291   :  { %4769 = vmatprep.subr.bf16.mxu0 %v4768_v27  ;;  %4577 = vmatprep.subr.bf16.mxu1 %v4576_v9  ;;  %v1342_v27 = vld [vmem:[#allocation7 + $0x1fe0] sm:$0xff]  ;;  %v2621_v9 = vld [vmem:[#allocation11 + $0x88] sm:$0xff]  ;;  %p5447_p5 = por %p5446_p4, %p5445_p3 }
 0x292   :  { %v1351_v33 = vrot.slane %v5788_v29, %v5796_v20  ;;  %v4594_v35 = vpack.c.bf16 %v1342_v27, %v1334_v62  ;;  %v2611_v62 = vld [vmem:[#allocation11 + $0x38] sm:$0xff]  ;;  %v2629_v27 = vld [vmem:[#allocation11 + $0xc8] sm:$0xff] }
 0x293   :  { %p5448_p6 = pnand %p5447_p5, %p5441_p2 }
 0x294   :  { %4771 = vmatpush1.bf16.msra.mxu0 %v4770_v6  ;;  %4579 = vmatpush1.bf16.msra.mxu1 %v4578_v41  ;;  %v1104_v6 = vld [vmem:[#allocation7 + $0x1870] sm:$0xff]  ;;  %v4852_v41 = vpack.c.bf16 %v2621_v9, %v2620_v31  ;;  %v5140_v51 = vadd.f32 %v5786_v25, %v1351_v33  ;;  %v2612_v33 = vld [vmem:[#allocation11 + $0x40] sm:$0xff] }
 0x295   :  { %4773 = vmatprep.subr.bf16.mxu0 %v4772_v42  ;;  %4581 = vmatprep.subr.bf16.mxu1 %v4580_v48  ;;  %v2604_v42 = vld [vmem:[#allocation11] sm:$0xff]  ;;  %v2622_v48 = vld [vmem:[#allocation11 + $0x90] sm:$0xff]  ;;  %v4790_v24 = vpack.c.bf16 %v1104_v6, %v1096_v39  ;;  %v1160_v31 = vld [vmem:[#allocation7 + $0x1a30] sm:$0xff] }
 0x296   :  { %v4854_v52 = vpack.c.bf16 %v2605_v44, %v2604_v42  ;;  %v4856_v55 = vpack.c.bf16 %v2623_v49, %v2622_v48  ;;  %v3579_v25 = vmul.f32 -1.442695, %v5140_v51  ;;  %v1168_v9 = vld [vmem:[#allocation7 + $0x1a70] sm:$0xff]  ;;  %v1185_v39 = vld [vmem:[#allocation7 + $0x1af8] sm:$0xff]  ;;  %v1362_v44 = vsub.s32 3, %v5784_v23 }
 0x297   :  { %v2630_v6 = vld [vmem:[#allocation11 + $0xd0] sm:$0xff]  ;;  %v4806_v42 = vpack.c.bf16 %v1168_v9, %v1160_v31  ;;  %v1176_v48 = vld [vmem:[#allocation7 + $0x1ab0] sm:$0xff]  ;;  %v4820_v31 = vpack.c.bf16 %v1233_v18, %v1225_v16  ;;  %v2660_v16 = vld [vmem:[#allocation11 + $0x1c0] sm:$0xff] }
 0x298   :  { %4775 = vmatpush1.bf16.msra.mxu0 %v4774_v21  ;;  %4583 = vmatpush1.bf16.msra.mxu1 %v4582_v54  ;;  %v1120_v21 = vld [vmem:[#allocation7 + $0x18f0] sm:$0xff]  ;;  %v2606_v54 = vld [vmem:[#allocation11 + $0x10] sm:$0xff]  ;;  %v5192_v32 = vpop.eup %5191  ;;  %5193 = vpow2.f32 %v3579_v25 }
 0x299   :  { %4777 = vmatprep.subr.bf16.mxu0 %v4776_v19  ;;  %4585 = vmatprep.subr.bf16.mxu1 %v4584_v58  ;;  %v4792_v19 = vpack.c.bf16 %v1121_v47, %v1113_v46  ;;  %v1137_v58 = vld [vmem:[#allocation7 + $0x1978] sm:$0xff]  ;;  %v4794_v63 = vpack.c.bf16 %v1120_v21, %v1112_v53  ;;  %v4858_v0 = vpack.c.bf16 %v2607_v56, %v2606_v54  ;;  %v1184_v49 = vld [vmem:[#allocation7 + $0x1af0] sm:$0xff]  ;;  %v2615_v53 = vld [vmem:[#allocation11 + $0x58] sm:$0xff] }
 0x29a   :  { %v2614_v51 = vld [vmem:[#allocation11 + $0x50] sm:$0xff]  ;;  %v1363_v56 = vrot.slane %v5788_v29, %v1362_v44  ;;  %v1200_v25 = vld [vmem:[#allocation7 + $0x1b70] sm:$0xff] }
 0x29b   :  { %v1193_v21 = vld [vmem:[#allocation7 + $0x1b38] sm:$0xff]  ;;  %v4874_v59 = vpack.c.bf16 %v2615_v53, %v2614_v51  ;;  %v1224_v9 = vld [vmem:[#allocation7 + $0x1c30] sm:$0xff]  ;;  %v2639_v53 = vld [vmem:[#allocation11 + $0x118] sm:$0xff] }
 0x29c   :  { %4779 = vmatpush1.bf16.msra.mxu0 %v4778_v1  ;;  %4587 = vmatpush1.bf16.msra.mxu1 %v4586_v2  ;;  %v4796_v1 = vpack.c.bf16 %v1137_v58, %v1129_v57  ;;  %v1128_v2 = vld [vmem:[#allocation7 + $0x1930] sm:$0xff]  ;;  %v1201_v54 = vld [vmem:[#allocation7 + $0x1b78] sm:$0xff]  ;;  %v4810_v57 = vpack.c.bf16 %v1184_v49, %v1176_v48 }
 0x29d   :  { %4781 = vmatprep.subr.bf16.mxu0 %v4780_v3  ;;  %4589 = vmatprep.subr.bf16.mxu1 %v4588_v5  ;;  %v1136_v3 = vld [vmem:[#allocation7 + $0x1970] sm:$0xff]  ;;  %v2626_v5 = vld [vmem:[#allocation11 + $0xb0] sm:$0xff]  ;;  %v4812_v60 = vpack.c.bf16 %v1201_v54, %v1193_v21 }
 0x29e   :  { %v4798_v8 = vpack.c.bf16 %v1136_v3, %v1128_v2  ;;  %v2617_v2 = vld [vmem:[#allocation11 + $0x68] sm:$0xff]  ;;  %v1209_v3 = vld [vmem:[#allocation7 + $0x1bb8] sm:$0xff] }
 0x29f   :  { %v1240_v49 = vld [vmem:[#allocation7 + $0x1cb0] sm:$0xff]  ;;  %v1257_v21 = vld [vmem:[#allocation7 + $0x1d38] sm:$0xff] }
 0x2a0   :  { %4783 = vmatpush1.bf16.msra.mxu0 %v4782_v13  ;;  %4591 = vmatpush1.bf16.msra.mxu1 %v4590_v14  ;;  %v1152_v13 = vld [vmem:[#allocation7 + $0x19f0] sm:$0xff]  ;;  %v2610_v14 = vld [vmem:[#allocation11 + $0x30] sm:$0xff] }
 0x2a1   :  { %4785 = vmatprep.subr.bf16.mxu0 %v4784_v15  ;;  %4593 = vmatprep.subr.bf16.mxu1 %v4592_v22  ;;  %v4864_v15 = vpack.c.bf16 %v2627_v7, %v2626_v5  ;;  %v2628_v22 = vld [vmem:[#allocation11 + $0xc0] sm:$0xff]  ;;  %v4802_v28 = vpack.c.bf16 %v1152_v13, %v1144_v12  ;;  %v1216_v12 = vld [vmem:[#allocation7 + $0x1bf0] sm:$0xff]  ;;  %v2618_v13 = vld [vmem:[#allocation11 + $0x70] sm:$0xff] }
 0x2a2   :  { %v1248_v51 = vld [vmem:[#allocation7 + $0x1cf0] sm:$0xff]  ;;  %v1265_v54 = vld [vmem:[#allocation7 + $0x1d78] sm:$0xff] }
 0x2a3   :  { %v2661_v18 = vld [vmem:[#allocation11 + $0x1c8] sm:$0xff] }
 0x2a4   :  { %4787 = vmatpush1.bf16.msra.mxu0 %v4786_v34  ;;  %4595 = vmatpush1.bf16.msra.mxu1 %v4594_v35  ;;  %v4868_v34 = vpack.c.bf16 %v2629_v27, %v2628_v22  ;;  %v2613_v35 = vld [vmem:[#allocation11 + $0x48] sm:$0xff]  ;;  %v2652_v22 = vld [vmem:[#allocation11 + $0x180] sm:$0xff] }
 0x2a5   :  { %4789 = vmatprep.subr.bf16.mxu0 %v4788_v37  ;;  %4853 = vmatprep.subr.bf16.mxu1 %v4852_v41  ;;  %v1177_v37 = vld [vmem:[#allocation7 + $0x1ab8] sm:$0xff]  ;;  %v2631_v41 = vld [vmem:[#allocation11 + $0xd8] sm:$0xff]  ;;  %v4870_v46 = vpack.c.bf16 %v2613_v35, %v2612_v33  ;;  %v2653_v27 = vld [vmem:[#allocation11 + $0x188] sm:$0xff] }
 0x2a6   :  { %v4808_v47 = vpack.c.bf16 %v1185_v39, %v1177_v37  ;;  %v1232_v33 = vld [vmem:[#allocation7 + $0x1c70] sm:$0xff]  ;;  %v4884_v35 = vpack.c.bf16 %v2653_v27, %v2652_v22  ;;  %v1241_v39 = vld [vmem:[#allocation7 + $0x1cb8] sm:$0xff] }
 0x2a7   :  { %2447 = vmatmul.mubr.f32.vlgmr.msra.gmra.mrb[4].mxu0 %v5774_v26  ;;  %2234 = vmatmul.mubr.f32.vlgmr.msra.gmra.mrb[2].mxu1 %v5805_v61  ;;  %v2608_v26 = vld [vmem:[#allocation11 + $0x20] sm:$0xff]  ;;  %v2637_v37 = vld [vmem:[#allocation11 + $0x108] sm:$0xff] }
 0x2a8   :  { %4791 = vmatpush1.bf16.msra.mxu0 %v4790_v24  ;;  %4855 = vmatpush3.bf16.msra.mxu1 %v4854_v52  ;;  %v4862_v10 = vpack.c.bf16 %v2609_v40, %v2608_v26  ;;  %v5194_v24 = vpop.eup %5193  ;;  %v4872_v52 = vpack.c.bf16 %v2631_v41, %v2630_v6  ;;  %v1217_v26 = vld [vmem:[#allocation7 + $0x1bf8] sm:$0xff] }
 0x2a9   :  { %2796 = vmatprep.mubr.f32.mxu1 %v5192_v32  ;;  %4793 = vmatprep.subr.bf16.mxu0 %v4792_v19  ;;  %v2632_v19 = vld [vmem:[#allocation11 + $0xe0] sm:$0xff]  ;;  %v2548_v58 = vadd.f32 1.0, %v5194_v24  ;;  %v1192_v32 = vld [vmem:[#allocation7 + $0x1b30] sm:$0xff]  ;;  %v2634_v40 = vld [vmem:[#allocation11 + $0xf0] sm:$0xff] }
 0x2aa   :  { %4857 = vmatprep.subr.bf16.mxu1 %v4856_v55  ;;  %2517 = vmatprep.mubr.f32.mxu0 %v5780_v36  ;;  %v4866_v36 = vpack.c.bf16 %v2611_v62, %v2610_v14  ;;  %v2633_v55 = vld [vmem:[#allocation11 + $0xe8] sm:$0xff]  ;;  %v4814_v7 = vpack.c.bf16 %v1200_v25, %v1192_v32  ;;  %v2619_v62 = vld [vmem:[#allocation11 + $0x78] sm:$0xff]  ;;  %v1249_v6 = vld [vmem:[#allocation7 + $0x1cf8] sm:$0xff] }
 0x2ab   :  { %5195 = vrcp.f32 %v2548_v58  ;;  %v2654_v41 = vld [vmem:[#allocation11 + $0x190] sm:$0xff]  ;;  %v4824_v48 = vpack.c.bf16 %v1249_v6, %v1241_v39  ;;  %v4826_v58 = vpack.c.bf16 %v1248_v51, %v1240_v49  ;;  %v1256_v32 = vld [vmem:[#allocation7 + $0x1d30] sm:$0xff]  ;;  %v2663_v39 = vld [vmem:[#allocation11 + $0x1d8] sm:$0xff] }
 0x2ac   :  { %4795 = vmatpush1.bf16.msra.mxu0 %v4794_v63  ;;  %4859 = vmatpush3.bf16.msra.mxu1 %v4858_v0  ;;  %v2616_v63 = vld [vmem:[#allocation11 + $0x60] sm:$0xff]  ;;  %v2638_v24 = vld [vmem:[#allocation11 + $0x110] sm:$0xff]  ;;  %v1264_v25 = vld [vmem:[#allocation7 + $0x1d70] sm:$0xff] }
 0x2ad   :  { %4797 = vmatprep.subr.bf16.mxu0 %v4796_v1  ;;  %4861 = vmatprep.subr.bf16.mxu1 %v4860_v45  ;;  %v4876_v1 = vpack.c.bf16 %v2633_v55, %v2632_v19  ;;  %v2656_v55 = vld [vmem:[#allocation11 + $0x1a0] sm:$0xff]  ;;  %v2647_v51 = vld [vmem:[#allocation11 + $0x158] sm:$0xff] }
 0x2b0   :  { %4799 = vmatpush1.bf16.msra.mxu0 %v4798_v8  ;;  %4863 = vmatpush3.bf16.msra.mxu1 %v4862_v10  ;;  %v4878_v8 = vpack.c.bf16 %v2617_v2, %v2616_v63  ;;  %v4816_v10 = vpack.c.bf16 %v1217_v26, %v1209_v3  ;;  %v2640_v63 = vld [vmem:[#allocation11 + $0x120] sm:$0xff]  ;;  %v2641_v2 = vld [vmem:[#allocation11 + $0x128] sm:$0xff]  ;;  %v1273_v3 = vld [vmem:[#allocation7 + $0x1db8] sm:$0xff] }
 0x2b1   :  { %4801 = vmatprep.subr.bf16.mxu0 %v4800_v11  ;;  %4865 = vmatprep.subr.bf16.mxu1 %v4864_v15  ;;  %v1208_v11 = vld [vmem:[#allocation7 + $0x1bb0] sm:$0xff]  ;;  %v4880_v15 = vpack.c.bf16 %v2635_v38, %v2634_v40  ;;  %v1281_v26 = vld [vmem:[#allocation7 + $0x1df8] sm:$0xff]  ;;  %v2659_v38 = vld [vmem:[#allocation11 + $0x1b8] sm:$0xff] }
 0x2b2   :  { %v2658_v40 = vld [vmem:[#allocation11 + $0x1b0] sm:$0xff] }
 0x2b4   :  { %4803 = vmatpush1.bf16.msra.mxu0 %v4802_v28  ;;  %4867 = vmatpush3.bf16.msra.mxu1 %v4866_v36  ;;  %v1359_v28 = vrot.slane %v5788_v29, %v1358_v4  ;;  %v4818_v36 = vpack.c.bf16 %v1216_v12, %v1208_v11  ;;  %v4822_v29 = vpack.c.bf16 %v1232_v33, %v1224_v9  ;;  %v1280_v11 = vld [vmem:[#allocation7 + $0x1df0] sm:$0xff]  ;;  %v2642_v12 = vld [vmem:[#allocation11 + $0x130] sm:$0xff] }
 0x2b5   :  { %4805 = vmatprep.subr.bf16.mxu0 %v4804_v30  ;;  %4869 = vmatprep.subr.bf16.mxu1 %v4868_v34  ;;  %v4882_v30 = vpack.c.bf16 %v2619_v62, %v2618_v13  ;;  %v2636_v34 = vld [vmem:[#allocation11 + $0x100] sm:$0xff]  ;;  %v5196_v19 = vpop.eup %5195  ;;  %v4896_v13 = vpack.c.bf16 %v2659_v38, %v2658_v40  ;;  %v1297_v62 = vld [vmem:[#allocation7 + $0x1e78] sm:$0xff]  ;;  %v4900_v9 = vpack.c.bf16 %v2661_v18, %v2660_v16  ;;  %v2645_v33 = vld [vmem:[#allocation11 + $0x148] sm:$0xff] }
 0x2b6   :  { %v1336_v40 = vld [vmem:[#allocation7 + $0x1fb0] sm:$0xff] }
 0x2b7   :  { %v1344_v38 = vld [vmem:[#allocation7 + $0x1ff0] sm:$0xff] }
 0x2b8   :  { %4807 = vmatpush1.bf16.msra.mxu0 %v4806_v42  ;;  %4871 = vmatpush3.bf16.msra.mxu1 %v4870_v46  ;;  %v2655_v42 = vld [vmem:[#allocation11 + $0x198] sm:$0xff] }
 0x2b9   :  { %4809 = vmatprep.subr.bf16.mxu0 %v4808_v47  ;;  %4873 = vmatprep.subr.bf16.mxu1 %v4872_v52  ;;  %v4886_v47 = vpack.c.bf16 %v2637_v37, %v2636_v34  ;;  %v4888_v52 = vpack.c.bf16 %v2655_v42, %v2654_v41  ;;  %v1305_v34 = vld [vmem:[#allocation7 + $0x1eb8] sm:$0xff] }
 0x2ba   :  { %v1951_v0 = vpop.f32.mrb[2].mxu0  ;;  %v2662_v37 = vld [vmem:[#allocation11 + $0x1d0] sm:$0xff] }
 0x2bb   :  { %v1953_v45 = vpop.f32.mrb[3].mxu0  ;;  %v5142_v46 = vadd.f32 %v1951_v0, %v1359_v28  ;;  %v4904_v49 = vpack.c.bf16 %v2663_v39, %v2662_v37  ;;  %v2673_v37 = vld [vmem:[#allocation11 + $0x228] sm:$0xff] }
 0x2bc   :  { %v5143_v5 = vadd.f32 %v1953_v45, %v1363_v56  ;;  %4811 = vmatpush1.bf16.msra.mxu0 %v4810_v57  ;;  %4875 = vmatpush3.bf16.msra.mxu1 %v4874_v59  ;;  %v2657_v56 = vld [vmem:[#allocation11 + $0x1a8] sm:$0xff]  ;;  %v4890_v59 = vpack.c.bf16 %v2639_v53, %v2638_v24  ;;  %v1321_v24 = vld [vmem:[#allocation7 + $0x1f38] sm:$0xff] }
 0x2bd   :  { %4813 = vmatprep.subr.bf16.mxu0 %v4812_v60  ;;  %4877 = vmatprep.subr.bf16.mxu1 %v4876_v1  ;;  %v3581_v57 = vmul.f32 -1.442695, %v5142_v46  ;;  %v4828_v60 = vpack.c.bf16 %v1265_v54, %v1257_v21  ;;  %v4892_v1 = vpack.c.bf16 %v2657_v56, %v2656_v55  ;;  %v1304_v46 = vld [vmem:[#allocation7 + $0x1eb0] sm:$0xff]  ;;  %v2664_v21 = vld [vmem:[#allocation11 + $0x1e0] sm:$0xff] }
 0x2be   :  { %v3582_v14 = vmul.f32 -1.442695, %v5143_v5  ;;  %v4830_v5 = vpack.c.bf16 %v1264_v25, %v1256_v32  ;;  %v2665_v54 = vld [vmem:[#allocation11 + $0x1e8] sm:$0xff] }
 0x2bf   :  { %v4908_v32 = vpack.c.bf16 %v2665_v54, %v2664_v21  ;;  %v2649_v25 = vld [vmem:[#allocation11 + $0x168] sm:$0xff]  ;;  %v2695_v21 = vld [vmem:[#allocation11 + $0x2d8] sm:$0xff] }
 0x2c0   :  { %5197 = vpow2.f32 %v3582_v14  ;;  %4815 = vmatpush1.bf16.msra.mxu0 %v4814_v7  ;;  %4879 = vmatpush3.bf16.msra.mxu1 %v4878_v8  ;;  %v4894_v7 = vpack.c.bf16 %v2641_v2, %v2640_v63  ;;  %v4832_v8 = vpack.c.bf16 %v1281_v26, %v1273_v3  ;;  %v2643_v14 = vld [vmem:[#allocation11 + $0x138] sm:$0xff]  ;;  %v1337_v63 = vld [vmem:[#allocation7 + $0x1fb8] sm:$0xff] }
 0x2c1   :  { %4817 = vmatprep.subr.bf16.mxu0 %v4816_v10  ;;  %4881 = vmatprep.subr.bf16.mxu1 %v4880_v15  ;;  %5199 = vpow2.f32 %v3581_v57  ;;  %v1272_v10 = vld [vmem:[#allocation7 + $0x1db0] sm:$0xff]  ;;  %v1289_v15 = vld [vmem:[#allocation7 + $0x1e38] sm:$0xff]  ;;  %v4898_v27 = vpack.c.bf16 %v2643_v14, %v2642_v12  ;;  %v2667_v2 = vld [vmem:[#allocation11 + $0x1f8] sm:$0xff]  ;;  %v4850_v12 = vpack.c.bf16 %v1344_v38, %v1336_v40 }
 0x2c2   :  { %v4834_v22 = vpack.c.bf16 %v1280_v11, %v1272_v10  ;;  %v4836_v28 = vpack.c.bf16 %v1297_v62, %v1289_v15  ;;  %v2684_v10 = vld [vmem:[#allocation11 + $0x280] sm:$0xff]  ;;  %v2685_v11 = vld [vmem:[#allocation11 + $0x288] sm:$0xff] }
 0x2c3   :  { %v4916_v14 = vpack.c.bf16 %v2685_v11, %v2684_v10  ;;  %v2668_v15 = vld [vmem:[#allocation11 + $0x200] sm:$0xff]  ;;  %v2669_v62 = vld [vmem:[#allocation11 + $0x208] sm:$0xff] }
 0x2c4   :  { %4819 = vmatpush1.bf16.msra.mxu0 %v4818_v36  ;;  %4883 = vmatpush3.bf16.msra.mxu1 %v4882_v30  ;;  %v1288_v36 = vld [vmem:[#allocation7 + $0x1e30] sm:$0xff]  ;;  %v4918_v16 = vpack.c.bf16 %v2669_v62, %v2668_v15  ;;  %v2700_v10 = vld [vmem:[#allocation11 + $0x300] sm:$0xff]  ;;  %v2702_v62 = vld [vmem:[#allocation11 + $0x310] sm:$0xff] }
 0x2c5   :  { %4821 = vmatprep.subr.bf16.mxu0 %v4820_v31  ;;  %4885 = vmatprep.subr.bf16.mxu1 %v4884_v35  ;;  %v1296_v30 = vld [vmem:[#allocation7 + $0x1e70] sm:$0xff]  ;;  %v2644_v31 = vld [vmem:[#allocation11 + $0x140] sm:$0xff]  ;;  %v1313_v35 = vld [vmem:[#allocation7 + $0x1ef8] sm:$0xff] }
 0x2c6   :  { %v4838_v6 = vpack.c.bf16 %v1296_v30, %v1288_v36  ;;  %v4902_v41 = vpack.c.bf16 %v2645_v33, %v2644_v31  ;;  %v4840_v42 = vpack.c.bf16 %v1313_v35, %v1305_v34  ;;  %v2670_v36 = vld [vmem:[#allocation11 + $0x210] sm:$0xff]  ;;  %v2671_v30 = vld [vmem:[#allocation11 + $0x218] sm:$0xff]  ;;  %v2689_v33 = vld [vmem:[#allocation11 + $0x2a8] sm:$0xff] }
 0x2c7   :  { %2797 = vmatmul.mubr.f32.vlgmr.msra.gmra.mrb[4].mxu1 %v5196_v19  ;;  %v4922_v31 = vpack.c.bf16 %v2671_v30, %v2670_v36  ;;  %v2672_v35 = vld [vmem:[#allocation11 + $0x220] sm:$0xff]  ;;  %v2589_v40 = vld [vmem:[#allocation10 + $0x88] sm:$0xff] }
 0x2c8   :  { %4823 = vmatpush1.bf16.msra.mxu0 %v4822_v29  ;;  %4887 = vmatpush3.bf16.msra.mxu1 %v4886_v47  ;;  %v1312_v29 = vld [vmem:[#allocation7 + $0x1ef0] sm:$0xff]  ;;  %v2646_v47 = vld [vmem:[#allocation11 + $0x150] sm:$0xff]  ;;  %v4926_v39 = vpack.c.bf16 %v2673_v37, %v2672_v35  ;;  %v2704_v36 = vld [vmem:[#allocation11 + $0x320] sm:$0xff] }
 0x2c9   :  { %4825 = vmatprep.subr.bf16.mxu0 %v4824_v48  ;;  %4889 = vmatprep.subr.bf16.mxu1 %v4888_v52  ;;  %v1329_v52 = vld [vmem:[#allocation7 + $0x1f78] sm:$0xff]  ;;  %v4842_v19 = vpack.c.bf16 %v1312_v29, %v1304_v46  ;;  %v4906_v56 = vpack.c.bf16 %v2647_v51, %v2646_v47  ;;  %v2675_v46 = vld [vmem:[#allocation11 + $0x238] sm:$0xff]  ;;  %v2692_v47 = vld [vmem:[#allocation11 + $0x2c0] sm:$0xff] }
 0x2ca   :  { %v5198_v0 = vpop.eup %5197  ;;  %v4844_v57 = vpack.c.bf16 %v1329_v52, %v1321_v24  ;;  %v2676_v51 = vld [vmem:[#allocation11 + $0x240] sm:$0xff]  ;;  %v2677_v24 = vld [vmem:[#allocation11 + $0x248] sm:$0xff]  ;;  %v2706_v35 = vld [vmem:[#allocation11 + $0x330] sm:$0xff] }
 0x2cb   :  { %v2551_v45 = vadd.f32 1.0, %v5198_v0  ;;  %v5200_v48 = vpop.eup %5199  ;;  %v1345_v0 = vld [vmem:[#allocation7 + $0x1ff8] sm:$0xff]  ;;  %v4934_v52 = vpack.c.bf16 %v2677_v24, %v2676_v51  ;;  %v2701_v11 = vld [vmem:[#allocation11 + $0x308] sm:$0xff]  ;;  %v2707_v37 = vld [vmem:[#allocation11 + $0x338] sm:$0xff] }
 0x2cc   :  { %4827 = vmatpush1.bf16.msra.mxu0 %v4826_v58  ;;  %4891 = vmatpush3.bf16.msra.mxu1 %v4890_v59  ;;  %v2550_v55 = vadd.f32 1.0, %v5200_v48  ;;  %v1320_v58 = vld [vmem:[#allocation7 + $0x1f30] sm:$0xff]  ;;  %v2710_v51 = vld [vmem:[#allocation11 + $0x350] sm:$0xff]  ;;  %v2711_v24 = vld [vmem:[#allocation11 + $0x358] sm:$0xff] }
 0x2cd   :  { %5201 = vrcp.f32 %v2551_v45  ;;  %4829 = vmatprep.subr.bf16.mxu0 %v4828_v60  ;;  %4893 = vmatprep.subr.bf16.mxu1 %v4892_v1  ;;  %v1328_v59 = vld [vmem:[#allocation7 + $0x1f70] sm:$0xff]  ;;  %v2648_v60 = vld [vmem:[#allocation11 + $0x160] sm:$0xff]  ;;  %v2666_v1 = vld [vmem:[#allocation11 + $0x1f0] sm:$0xff]  ;;  %v4848_v45 = vpack.c.bf16 %v1345_v0, %v1337_v63 }
 0x2ce   :  { %v4846_v3 = vpack.c.bf16 %v1328_v59, %v1320_v58  ;;  %5203 = vrcp.f32 %v2550_v55  ;;  %v4910_v26 = vpack.c.bf16 %v2649_v25, %v2648_v60  ;;  %v2693_v48 = vld [vmem:[#allocation11 + $0x2c8] sm:$0xff]  ;;  %v2679_v55 = vld [vmem:[#allocation11 + $0x258] sm:$0xff]  ;;  %v2680_v59 = vld [vmem:[#allocation11 + $0x260] sm:$0xff] }
 0x2cf   :  { %v2697_v58 = vld [vmem:[#allocation11 + $0x2e8] sm:$0xff]  ;;  %v2698_v25 = vld [vmem:[#allocation11 + $0x2f0] sm:$0xff]  ;;  %v2699_v63 = vld [vmem:[#allocation11 + $0x2f8] sm:$0xff] }
 0x2d0   :  { %4831 = vmatpush1.bf16.msra.mxu0 %v4830_v5  ;;  %4895 = vmatpush3.bf16.msra.mxu1 %v4894_v7  ;;  %v2650_v5 = vld [vmem:[#allocation11 + $0x170] sm:$0xff]  ;;  %v4912_v7 = vpack.c.bf16 %v2667_v2, %v2666_v1  ;;  %v4944_v1 = vpack.c.bf16 %v2699_v63, %v2698_v25  ;;  %v2705_v30 = vld [vmem:[#allocation11 + $0x328] sm:$0xff] }
 0x2d1   :  { %4833 = vmatprep.subr.bf16.mxu0 %v4832_v8  ;;  %4897 = vmatprep.subr.bf16.mxu1 %v4896_v13  ;;  %v2651_v8 = vld [vmem:[#allocation11 + $0x178] sm:$0xff]  ;;  %v2682_v2 = vld [vmem:[#allocation11 + $0x270] sm:$0xff] }
 0x2d2   :  { %v4914_v13 = vpack.c.bf16 %v2651_v8, %v2650_v5  ;;  %v2716_v5 = vld [vmem:[#allocation11 + $0x380] sm:$0xff]  ;;  %v219_v63 = vld [vmem:[#allocation5] sm:$0x3] }
 0x2d4   :  { %4835 = vmatpush1.bf16.msra.mxu0 %v4834_v22  ;;  %4899 = vmatpush3.bf16.msra.mxu1 %v4898_v27  ;;  %v2686_v22 = vld [vmem:[#allocation11 + $0x290] sm:$0xff]  ;;  %v2687_v27 = vld [vmem:[#allocation11 + $0x298] sm:$0xff] }
 0x2d5   :  { %4837 = vmatprep.subr.bf16.mxu0 %v4836_v28  ;;  %4901 = vmatprep.subr.bf16.mxu1 %v4900_v9  ;;  %v4920_v28 = vpack.c.bf16 %v2687_v27, %v2686_v22  ;;  %v2688_v9 = vld [vmem:[#allocation11 + $0x2a0] sm:$0xff]  ;;  %v2721_v27 = vld [vmem:[#allocation11 + $0x3a8] sm:$0xff] }
 0x2d6   :  { %v4924_v34 = vpack.c.bf16 %v2689_v33, %v2688_v9  ;;  %v2720_v22 = vld [vmem:[#allocation11 + $0x3a0] sm:$0xff]  ;;  %v2722_v9 = vld [vmem:[#allocation11 + $0x3b0] sm:$0xff]  ;;  %v2723_v33 = vld [vmem:[#allocation11 + $0x3b8] sm:$0xff] }
 0x2d7   :  { %v5202_v53 = vpop.eup %5201 }
 0x2d8   :  { %4839 = vmatpush1.bf16.msra.mxu0 %v4838_v6  ;;  %2866 = vmatprep.mubr.f32.mxu1 %v5202_v53  ;;  %v5204_v18 = vpop.eup %5203  ;;  %v2690_v6 = vld [vmem:[#allocation11 + $0x2b0] sm:$0xff] }
 0x2d9   :  { %4903 = vmatpush3.bf16.msra.mxu1 %v4902_v41  ;;  %4841 = vmatprep.subr.bf16.mxu0 %v4840_v42  ;;  %v2674_v42 = vld [vmem:[#allocation11 + $0x230] sm:$0xff] }
 0x2da   :  { %4905 = vmatprep.subr.bf16.mxu1 %v4904_v49  ;;  %v4930_v29 = vpack.c.bf16 %v2675_v46, %v2674_v42  ;;  %v4932_v49 = vpack.c.bf16 %v2693_v48, %v2692_v47  ;;  %v2694_v53 = vld [vmem:[#allocation11 + $0x2d0] sm:$0xff]  ;;  %v2708_v42 = vld [vmem:[#allocation11 + $0x340] sm:$0xff]  ;;  %v2709_v46 = vld [vmem:[#allocation11 + $0x348] sm:$0xff] }
 0x2db   :  { %v4936_v54 = vpack.c.bf16 %v2695_v21, %v2694_v53  ;;  %v2726_v47 = vld [vmem:[#allocation11 + $0x3d0] sm:$0xff]  ;;  %v2727_v48 = vld [vmem:[#allocation11 + $0x3d8] sm:$0xff]  ;;  %v4970_v53 = vpack.c.bf16 %v2711_v24, %v2710_v51  ;;  %v2729_v21 = vld [vmem:[#allocation11 + $0x3e8] sm:$0xff] }
 0x2dc   :  { %4843 = vmatpush1.bf16.msra.mxu0 %v4842_v19  ;;  %v2678_v19 = vld [vmem:[#allocation11 + $0x250] sm:$0xff]  ;;  %v2595_v24 = vld [vmem:[#allocation10 + $0xb8] sm:$0xff] }
 0x2dd   :  { %4907 = vmatpush3.bf16.msra.mxu1 %v4906_v56  ;;  %4845 = vmatprep.subr.bf16.mxu0 %v4844_v57  ;;  %v4938_v56 = vpack.c.bf16 %v2679_v55, %v2678_v19  ;;  %v2696_v57 = vld [vmem:[#allocation11 + $0x2e0] sm:$0xff]  ;;  %v2713_v19 = vld [vmem:[#allocation11 + $0x368] sm:$0xff]  ;;  %v2594_v51 = vld [vmem:[#allocation10 + $0xb0] sm:$0xff] }
 0x2de   :  { %4909 = vmatprep.subr.bf16.mxu1 %v4908_v32  ;;  %v4940_v60 = vpack.c.bf16 %v2697_v58, %v2696_v57  ;;  %v2681_v32 = vld [vmem:[#allocation11 + $0x268] sm:$0xff]  ;;  %v2731_v57 = vld [vmem:[#allocation11 + $0x3f8] sm:$0xff] }
 0x2df   :  { %v4942_v0 = vpack.c.bf16 %v2681_v32, %v2680_v59  ;;  %v2715_v32 = vld [vmem:[#allocation11 + $0x378] sm:$0xff] }
 0x2e0   :  { %4847 = vmatpush1.bf16.msra.mxu0 %v4846_v3  ;;  %v2683_v3 = vld [vmem:[#allocation11 + $0x278] sm:$0xff] }
 0x2e1   :  { %4911 = vmatpush3.bf16.msra.mxu1 %v4910_v26  ;;  %4849 = vmatprep.subr.bf16.mxu0 %v4848_v45  ;;  %v4946_v26 = vpack.c.bf16 %v2683_v3, %v2682_v2  ;;  %v2588_v45 = vld [vmem:[#allocation10 + $0x80] sm:$0xff]  ;;  %v1370_v2 = vsub.s32 5, %v5784_v23 }
 0x2e2   :  { %4913 = vmatprep.subr.bf16.mxu1 %v4912_v7  ;;  %v4980_v38 = vpack.c.bf16 %v2589_v40, %v2588_v45  ;;  %v2717_v7 = vld [vmem:[#allocation11 + $0x388] sm:$0xff] }
 0x2e3   :  { %v4948_v8 = vpack.c.bf16 %v2717_v7, %v2716_v5 }
 0x2e4   :  { %4851 = vmatpush1.bf16.msra.mxu0 %v4850_v12  ;;  %v4950_v12 = vpack.c.bf16 %v2701_v11, %v2700_v10 }
 0x2e5   :  { %4915 = vmatpush3.bf16.msra.mxu1 %v4914_v13  ;;  %4917 = vmatprep.subr.bf16.mxu0 %v4916_v14  ;;  %v2718_v13 = vld [vmem:[#allocation11 + $0x390] sm:$0xff]  ;;  %v2719_v14 = vld [vmem:[#allocation11 + $0x398] sm:$0xff] }
 0x2e6   :  { %4949 = vmatprep.subr.bf16.mxu1 %v4948_v8  ;;  %v4952_v15 = vpack.c.bf16 %v2719_v14, %v2718_v13 }
 0x2e7   :  { %2518 = vmatmul.mubr.f32.vlgmr.msra.gmra.mrb[4].mxu0 %v5805_v61  ;;  %v2691_v61 = vld [vmem:[#allocation11 + $0x2b8] sm:$0xff] }
 0x2e8   :  { %2867 = vmatmul.mubr.f32.vlgmr.msra.gmra.mrb[6].mxu1 %v5204_v18  ;;  %4919 = vmatpush3.bf16.msra.mxu0 %v4918_v16  ;;  %v4928_v41 = vpack.c.bf16 %v2691_v61, %v2690_v6  ;;  %v2703_v16 = vld [vmem:[#allocation11 + $0x318] sm:$0xff]  ;;  %v2724_v6 = vld [vmem:[#allocation11 + $0x3c0] sm:$0xff]  ;;  %v2725_v61 = vld [vmem:[#allocation11 + $0x3c8] sm:$0xff] }
 0x2e9   :  { %4921 = vmatprep.subr.bf16.mxu0 %v4920_v28  ;;  %4951 = vmatpush3.bf16.msra.mxu1 %v4950_v12  ;;  %v4954_v18 = vpack.c.bf16 %v2703_v16, %v2702_v62  ;;  %v4956_v28 = vpack.c.bf16 %v2721_v27, %v2720_v22  ;;  %v2572_v22 = vld [vmem:[#allocation10] sm:$0xff]  ;;  %v2573_v27 = vld [vmem:[#allocation10 + $0x8] sm:$0xff] }
 0x2ea   :  { %4953 = vmatprep.subr.bf16.mxu1 %v4952_v15 }
 0x2ec   :  { %4923 = vmatpush3.bf16.msra.mxu0 %v4922_v31  ;;  %v4958_v31 = vpack.c.bf16 %v2705_v30, %v2704_v36  ;;  %v2591_v36 = vld [vmem:[#allocation10 + $0x98] sm:$0xff] }
 0x2ed   :  { %4925 = vmatprep.subr.bf16.mxu0 %v4924_v34  ;;  %4955 = vmatpush3.bf16.msra.mxu1 %v4954_v18  ;;  %v4960_v34 = vpack.c.bf16 %v2723_v33, %v2722_v9  ;;  %v224_v18 = vrot.slane %v219_v63, %v5796_v20 }
 0x2ee   :  { %4957 = vmatprep.subr.bf16.mxu1 %v4956_v28  ;;  %v2590_v28 = vld [vmem:[#allocation10 + $0x90] sm:$0xff] }
 0x2ef   :  { %v298_v30 = vadd.f32 %v5738_v17, %v224_v18  ;;  %v4984_v33 = vpack.c.bf16 %v2591_v36, %v2590_v28  ;;  %v2576_v17 = vld [vmem:[#allocation10 + $0x20] sm:$0xff]  ;;  %v1374_v18 = vsub.s32 6, %v5784_v23 }
 0x2f0   :  { %4927 = vmatpush3.bf16.msra.mxu0 %v4926_v39  ;;  %v4962_v39 = vpack.c.bf16 %v2707_v37, %v2706_v35  ;;  %v2575_v35 = vld [vmem:[#allocation10 + $0x18] sm:$0xff] }
 0x2f1   :  { %4929 = vmatprep.subr.bf16.mxu0 %v4928_v41  ;;  %4959 = vmatpush3.bf16.msra.mxu1 %v4958_v31  ;;  %v4964_v41 = vpack.c.bf16 %v2725_v61, %v2724_v6  ;;  %v4982_v31 = vpack.c.bf16 %v2573_v27, %v2572_v22  ;;  %v2593_v6 = vld [vmem:[#allocation10 + $0xa8] sm:$0xff]  ;;  %v1378_v22 = vsub.s32 7, %v5784_v23 }
 0x2f2   :  { %4961 = vmatprep.subr.bf16.mxu1 %v4960_v34  ;;  %v2574_v34 = vld [vmem:[#allocation10 + $0x10] sm:$0xff] }
 0x2f4   :  { %4931 = vmatpush3.bf16.msra.mxu0 %v4930_v29  ;;  %v4966_v29 = vpack.c.bf16 %v2709_v46, %v2708_v42  ;;  %v4986_v46 = vpack.c.bf16 %v2575_v35, %v2574_v34 }
 0x2f5   :  { %4933 = vmatprep.subr.bf16.mxu0 %v4932_v49  ;;  %4963 = vmatpush3.bf16.msra.mxu1 %v4962_v39  ;;  %v4968_v49 = vpack.c.bf16 %v2727_v48, %v2726_v47  ;;  %v2592_v39 = vld [vmem:[#allocation10 + $0xa0] sm:$0xff]  ;;  %v2577_v48 = vld [vmem:[#allocation10 + $0x28] sm:$0xff] }
 0x2f6   :  { %4965 = vmatprep.subr.bf16.mxu1 %v4964_v41  ;;  %v3577_v41 = vmul.f32 -1.442695, %v298_v30  ;;  %v4988_v47 = vpack.c.bf16 %v2593_v6, %v2592_v39 }
 0x2f8   :  { %4935 = vmatpush3.bf16.msra.mxu0 %v4934_v52  ;;  %v2728_v52 = vld [vmem:[#allocation11 + $0x3e0] sm:$0xff] }
 0x2f9   :  { %4937 = vmatprep.subr.bf16.mxu0 %v4936_v54  ;;  %4967 = vmatpush3.bf16.msra.mxu1 %v4966_v29  ;;  %v2712_v54 = vld [vmem:[#allocation11 + $0x360] sm:$0xff]  ;;  %v4972_v55 = vpack.c.bf16 %v2729_v21, %v2728_v52  ;;  %v4990_v52 = vpack.c.bf16 %v2577_v48, %v2576_v17  ;;  %v2578_v21 = vld [vmem:[#allocation10 + $0x30] sm:$0xff] }
 0x2fa   :  { %4969 = vmatprep.subr.bf16.mxu1 %v4968_v49  ;;  %v4974_v58 = vpack.c.bf16 %v2713_v19, %v2712_v54  ;;  %v2579_v54 = vld [vmem:[#allocation10 + $0x38] sm:$0xff]  ;;  %v2596_v19 = vld [vmem:[#allocation10 + $0xc0] sm:$0xff]  ;;  %v3097_v17 = vld [vmem:[#allocation14 + $0x8] sm:$0xff] }
 0x2fb   :  { %v3105_v48 = vld [vmem:[#allocation14 + $0x48] sm:$0xff] }
 0x2fc   :  { %4939 = vmatpush3.bf16.msra.mxu0 %v4938_v56  ;;  %v2730_v56 = vld [vmem:[#allocation11 + $0x3f0] sm:$0xff] }
 0x2fd   :  { %4941 = vmatprep.subr.bf16.mxu0 %v4940_v60  ;;  %4971 = vmatpush3.bf16.msra.mxu1 %v4970_v53  ;;  %v4976_v59 = vpack.c.bf16 %v2731_v57, %v2730_v56  ;;  %v2714_v60 = vld [vmem:[#allocation11 + $0x370] sm:$0xff]  ;;  %v4992_v53 = vpack.c.bf16 %v2595_v24, %v2594_v51  ;;  %v4994_v56 = vpack.c.bf16 %v2579_v54, %v2578_v21  ;;  %v3099_v51 = vld [vmem:[#allocation14 + $0x18] sm:$0xff]  ;;  %v3104_v21 = vld [vmem:[#allocation14 + $0x40] sm:$0xff] }
 0x2fe   :  { %4973 = vmatprep.subr.bf16.mxu1 %v4972_v55  ;;  %v4978_v25 = vpack.c.bf16 %v2715_v32, %v2714_v60  ;;  %v2597_v55 = vld [vmem:[#allocation10 + $0xc8] sm:$0xff]  ;;  %v2598_v60 = vld [vmem:[#allocation10 + $0xd0] sm:$0xff]  ;;  %v2599_v32 = vld [vmem:[#allocation10 + $0xd8] sm:$0xff]  ;;  %v5012_v24 = vpack.c.bf16 %v3105_v48, %v3097_v17 }
 0x2ff   :  { %v4996_v57 = vpack.c.bf16 %v2597_v55, %v2596_v19  ;;  %v3098_v19 = vld [vmem:[#allocation14 + $0x10] sm:$0xff]  ;;  %v3168_v17 = vld [vmem:[#allocation14 + $0x240] sm:$0xff] }
 0x300   :  { %4943 = vmatpush3.bf16.msra.mxu0 %v4942_v0  ;;  %v228_v0 = vrot.slane %v219_v63, %v5791_v43  ;;  %v3106_v55 = vld [vmem:[#allocation14 + $0x50] sm:$0xff] }
 0x301   :  { %4945 = vmatprep.subr.bf16.mxu0 %v4944_v1  ;;  %4975 = vmatpush3.bf16.msra.mxu1 %v4974_v58  ;;  %v1366_v1 = vsub.s32 4, %v5784_v23  ;;  %v2580_v58 = vld [vmem:[#allocation10 + $0x40] sm:$0xff] }
 0x302   :  { %4977 = vmatprep.subr.bf16.mxu1 %v4976_v59  ;;  %v300_v3 = vadd.f32 %v5740_v50, %v228_v0  ;;  %v2581_v59 = vld [vmem:[#allocation10 + $0x48] sm:$0xff]  ;;  %v5000_v0 = vpack.c.bf16 %v2599_v32, %v2598_v60  ;;  %v3115_v60 = vld [vmem:[#allocation14 + $0x98] sm:$0xff] }
 0x303   :  { %v3123_v32 = vld [vmem:[#allocation14 + $0xd8] sm:$0xff] }
 0x304   :  { %4947 = vmatpush3.bf16.msra.mxu0 %v4946_v26  ;;  %v5822_v26 = vld [vmem:[#allocation8] sm:$0xff] }
 0x305   :  { %4981 = vmatprep.subr.bf16.mxu0 %v4980_v38  ;;  %4979 = vmatpush3.bf16.msra.mxu1 %v4978_v25  ;;  %v1367_v45 = vrot.slane %v5822_v26, %v1366_v1  ;;  %v1371_v40 = vrot.slane %v5822_v26, %v1370_v2  ;;  %v3578_v38 = vmul.f32 -1.442695, %v300_v3  ;;  %v4998_v25 = vpack.c.bf16 %v2581_v59, %v2580_v58  ;;  %v2582_v3 = vld [vmem:[#allocation10 + $0x50] sm:$0xff] }
 0x306   :  { %v1375_v27 = vrot.slane %v5822_v26, %v1374_v18  ;;  %v1379_v28 = vrot.slane %v5822_v26, %v1378_v22  ;;  %5013 = vmatprep.subr.bf16.mxu1 %v5012_v24  ;;  %v3121_v58 = vld [vmem:[#allocation14 + $0xc8] sm:$0xff]  ;;  %v3162_v24 = vld [vmem:[#allocation14 + $0x210] sm:$0xff] }
 0x307   :  { %5205 = vpow2.f32 %v3578_v38  ;;  %v2601_v38 = vld [vmem:[#allocation10 + $0xe8] sm:$0xff] }
 0x311   :  { %v5206_v50 = vpop.eup %5205 }
 0x312   :  { %v309_v62 = vadd.f32 1.0, %v5206_v50  ;;  %v2603_v50 = vld [vmem:[#allocation10 + $0xf8] sm:$0xff] }
 0x37a   :  { %v2235_v5 = vpop.f32.mrb[2].mxu1 }
 0x37b   :  { %v5144_v7 = vadd.f32 %v2235_v5, %v1367_v45  ;;  %v2237_v8 = vpop.f32.mrb[3].mxu1  ;;  %v2583_v45 = vld [vmem:[#allocation10 + $0x58] sm:$0xff] }
 0x37c   :  { %v5145_v10 = vadd.f32 %v2237_v8, %v1371_v40  ;;  %v2600_v40 = vld [vmem:[#allocation10 + $0xe0] sm:$0xff] }
 0x37d   :  { %v3583_v11 = vmul.f32 -1.442695, %v5144_v7  ;;  %v5002_v7 = vpack.c.bf16 %v2583_v45, %v2582_v3  ;;  %v5004_v8 = vpack.c.bf16 %v2601_v38, %v2600_v40  ;;  %v3114_v3 = vld [vmem:[#allocation14 + $0x90] sm:$0xff] }
 0x37e   :  { %v3584_v12 = vmul.f32 -1.442695, %v5145_v10  ;;  %v2584_v10 = vld [vmem:[#allocation10 + $0x60] sm:$0xff]  ;;  %v3122_v45 = vld [vmem:[#allocation14 + $0xd0] sm:$0xff] }
 0x37f   :  { %5207 = vpow2.f32 %v3583_v11  ;;  %v2585_v11 = vld [vmem:[#allocation10 + $0x68] sm:$0xff]  ;;  %v5050_v38 = vpack.c.bf16 %v3122_v45, %v3114_v3  ;;  %v3195_v3 = vld [vmem:[#allocation14 + $0x318] sm:$0xff] }
 0x380   :  { %5209 = vpow2.f32 %v3584_v12  ;;  %v2602_v12 = vld [vmem:[#allocation10 + $0xf0] sm:$0xff] }
 0x389   :  { %v5208_v13 = vpop.eup %5207 }
 0x38a   :  { %v5210_v14 = vpop.eup %5209  ;;  %v2552_v15 = vadd.f32 1.0, %v5208_v13  ;;  %v5006_v13 = vpack.c.bf16 %v2585_v11, %v2584_v10  ;;  %v3139_v11 = vld [vmem:[#allocation14 + $0x158] sm:$0xff] }
 0x38b   :  { %v2553_v16 = vadd.f32 1.0, %v5210_v14  ;;  %v5008_v14 = vpack.c.bf16 %v2603_v50, %v2602_v12  ;;  %v3128_v12 = vld [vmem:[#allocation14 + $0x100] sm:$0xff] }
 0x38c   :  { %v3136_v50 = vld [vmem:[#allocation14 + $0x140] sm:$0xff] }
 0x38d   :  { %5211 = vrcp.f32 %v2553_v16 }
 0x38e   :  { %5213 = vrcp.f32 %v2552_v15  ;;  %v2586_v15 = vld [vmem:[#allocation10 + $0x70] sm:$0xff] }
 0x38f   :  { %5215 = vrcp.f32 %v309_v62  ;;  %v2587_v62 = vld [vmem:[#allocation10 + $0x78] sm:$0xff] }
 0x390   :  { %5217 = vpow2.f32 %v3577_v41  ;;  %v5010_v16 = vpack.c.bf16 %v2587_v62, %v2586_v15  ;;  %v3130_v15 = vld [vmem:[#allocation14 + $0x110] sm:$0xff] }
 0x391   :  { %v3138_v62 = vld [vmem:[#allocation14 + $0x150] sm:$0xff] }
 0x397   :  { %v5212_v9 = vpop.eup %5211 }
 0x398   :  { %v5214_v37 = vpop.eup %5213  ;;  %2936 = vmatprep.mubr.f32.mxu0 %v5212_v9 }
 0x399   :  { %v5216_v61 = vpop.eup %5215  ;;  %2937 = vmatmul.mubr.f32.vlgmr.msra.gmra.mrb[6].mxu0 %v5214_v37 }
 0x39a   :  { %4983 = vmatpush3.bf16.msra.mxu0 %v4982_v31  ;;  %v3621_v42 = vpop.f32.mrb[4].mxu1  ;;  %3076 = vmatprep.mubr.f32.mxu0 %v5216_v61  ;;  %v5218_v63 = vpop.eup %5217 }
 0x39b   :  { %v3622_v29 = vpop.f32.mrb[5].mxu1  ;;  %4985 = vmatprep.subr.bf16.mxu0 %v4984_v33  ;;  %v308_v5 = vadd.f32 1.0, %v5218_v63  ;;  %v5048_v63 = vpack.c.bf16 %v3123_v32, %v3115_v60  ;;  %v3178_v60 = vld [vmem:[#allocation14 + $0x290] sm:$0xff] }
 0x39c   :  { %v5832_v49 = vadd.f32 %v3622_v29, %v3621_v42  ;;  %v3186_v32 = vld [vmem:[#allocation14 + $0x2d0] sm:$0xff] }
 0x39d   :  { %5219 = vrcp.f32 %v308_v5  ;;  %v3129_v5 = vld [vmem:[#allocation14 + $0x108] sm:$0xff] }
 0x39e   :  { %4987 = vmatpush3.bf16.msra.mxu0 %v4986_v46 }
 0x39f   :  { %4989 = vmatprep.subr.bf16.mxu0 %v4988_v47 }
 0x3a2   :  { %4991 = vmatpush3.bf16.msra.mxu0 %v4990_v52  ;;  %v3107_v52 = vld [vmem:[#allocation14 + $0x58] sm:$0xff] }
 0x3a3   :  { %4993 = vmatprep.subr.bf16.mxu0 %v4992_v53  ;;  %v3096_v53 = vld [vmem:[#allocation14] sm:$0xff] }
 0x3a4   :  { %v5014_v54 = vpack.c.bf16 %v3104_v21, %v3096_v53  ;;  %v3177_v21 = vld [vmem:[#allocation14 + $0x288] sm:$0xff] }
 0x3a6   :  { %4995 = vmatpush3.bf16.msra.mxu0 %v4994_v56  ;;  %v5046_v56 = vpack.c.bf16 %v3106_v55, %v3098_v19  ;;  %v3187_v55 = vld [vmem:[#allocation14 + $0x2d8] sm:$0xff] }
 0x3a7   :  { %4997 = vmatprep.subr.bf16.mxu0 %v4996_v57  ;;  %v5220_v36 = vpop.eup %5219  ;;  %v3113_v57 = vld [vmem:[#allocation14 + $0x88] sm:$0xff] }
 0x3a8   :  { %v5016_v59 = vpack.c.bf16 %v3121_v58, %v3113_v57  ;;  %v3184_v57 = vld [vmem:[#allocation14 + $0x2c0] sm:$0xff] }
 0x3aa   :  { %4999 = vmatpush3.bf16.msra.mxu0 %v4998_v25  ;;  %v3112_v25 = vld [vmem:[#allocation14 + $0x80] sm:$0xff] }
 0x3ab   :  { %5001 = vmatprep.subr.bf16.mxu0 %v5000_v0  ;;  %v3120_v0 = vld [vmem:[#allocation14 + $0xc0] sm:$0xff] }
 0x3ac   :  { %v5018_v40 = vpack.c.bf16 %v3120_v0, %v3112_v25  ;;  %v5066_v25 = vpack.c.bf16 %v3186_v32, %v3178_v60  ;;  %v3201_v0 = vld [vmem:[#allocation14 + $0x348] sm:$0xff]  ;;  %v3110_v60 = vld [vmem:[#allocation14 + $0x70] sm:$0xff] }
 0x3ad   :  { %v3125_v32 = vld [vmem:[#allocation14 + $0xe8] sm:$0xff] }
 0x3ae   :  { %5003 = vmatpush3.bf16.msra.mxu0 %v5002_v7  ;;  %v3137_v7 = vld [vmem:[#allocation14 + $0x148] sm:$0xff] }
 0x3af   :  { %5005 = vmatprep.subr.bf16.mxu0 %v5004_v8  ;;  %v3131_v8 = vld [vmem:[#allocation14 + $0x118] sm:$0xff]  ;;  %v5020_v10 = vpack.c.bf16 %v3137_v7, %v3129_v5  ;;  %v3200_v5 = vld [vmem:[#allocation14 + $0x340] sm:$0xff]  ;;  %v5489_v7 = vmov 0.0  }
 0x3b2   :  { %5007 = vmatpush3.bf16.msra.mxu0 %v5006_v13  ;;  %v5052_v13 = vpack.c.bf16 %v3139_v11, %v3131_v8  ;;  %v3194_v11 = vld [vmem:[#allocation14 + $0x310] sm:$0xff] }
 0x3b3   :  { %5009 = vmatprep.subr.bf16.mxu0 %v5008_v14  ;;  %v5022_v14 = vpack.c.bf16 %v3136_v50, %v3128_v12  ;;  %v3202_v12 = vld [vmem:[#allocation14 + $0x350] sm:$0xff]  ;;  %v3209_v50 = vld [vmem:[#allocation14 + $0x388] sm:$0xff] }
 0x3b6   :  { %5011 = vmatpush3.bf16.msra.mxu0 %v5010_v16  ;;  %v5054_v16 = vpack.c.bf16 %v3138_v62, %v3130_v15  ;;  %v3211_v15 = vld [vmem:[#allocation14 + $0x398] sm:$0xff] }
 0x3b7   :  { %v3219_v62 = vld [vmem:[#allocation14 + $0x3d8] sm:$0xff] }
 0x3b9   :  { %3077 = vmatmul.mubr.f32.vlgmr.msra.gmra.mrb[8].mxu0 %v5220_v36  ;;  %v3147_v36 = vld [vmem:[#allocation14 + $0x198] sm:$0xff] }
 0x3ba   :  { %v2519_v30 = vpop.f32.mrb[4].mxu0  ;;  %3401 = vmatprep.mubr.f32.mxu0 %v5489_v7 }
 0x3bb   :  { %v5146_v31 = vadd.f32 %v2519_v30, %v1375_v27  ;;  %v3656_v9 = vpop.f32.mrb[6].mxu1  ;;  %v2521_v33 = vpop.f32.mrb[5].mxu0  ;;  %v3145_v27 = vld [vmem:[#allocation14 + $0x188] sm:$0xff] }
 0x3bc   :  { %v5147_v34 = vadd.f32 %v2521_v33, %v1379_v28  ;;  %v3657_v35 = vpop.f32.mrb[7].mxu1  ;;  %v3153_v28 = vld [vmem:[#allocation14 + $0x1c8] sm:$0xff]  ;;  %v3152_v33 = vld [vmem:[#allocation14 + $0x1c0] sm:$0xff] }
 0x3bd   :  { %v3585_v37 = vmul.f32 -1.442695, %v5146_v31  ;;  %v3658_v39 = vadd.f32 %v3657_v35, %v3656_v9  ;;  %v5024_v30 = vpack.c.bf16 %v3153_v28, %v3145_v27  ;;  %v3155_v31 = vld [vmem:[#allocation14 + $0x1d8] sm:$0xff]  ;;  %v3144_v9 = vld [vmem:[#allocation14 + $0x180] sm:$0xff]  ;;  %v5072_v27 = vpack.c.bf16 %v3219_v62, %v3211_v15 }
 0x3be   :  { %v3586_v6 = vmul.f32 -1.442695, %v5147_v34  ;;  %v5056_v34 = vpack.c.bf16 %v3155_v31, %v3147_v36  ;;  %v5026_v35 = vpack.c.bf16 %v3152_v33, %v3144_v9  ;;  %v3208_v28 = vld [vmem:[#allocation14 + $0x380] sm:$0xff]  ;;  %v3218_v31 = vld [vmem:[#allocation14 + $0x3d0] sm:$0xff]  ;;  %v3101_v9 = vld [vmem:[#allocation14 + $0x28] sm:$0xff] }
 0x3bf   :  { %5221 = vpow2.f32 %v3585_v37  ;;  %v5843_v61 = vadd.f32 %v3658_v39, %v5832_v49  ;;  %v5044_v49 = vpack.c.bf16 %v3107_v52, %v3099_v51  ;;  %v3146_v37 = vld [vmem:[#allocation14 + $0x190] sm:$0xff]  ;;  %v3216_v36 = vld [vmem:[#allocation14 + $0x3c0] sm:$0xff]  ;;  %v3109_v33 = vld [vmem:[#allocation14 + $0x68] sm:$0xff] }
 0x3c0   :  { %5223 = vpow2.f32 %v3586_v6  ;;  %v3154_v39 = vld [vmem:[#allocation14 + $0x1d0] sm:$0xff] }
 0x3c1   :  { %5045 = vmatprep.subr.bf16.mxu0 %v5044_v49  ;;  %v5058_v6 = vpack.c.bf16 %v3154_v39, %v3146_v37  ;;  %v3170_v52 = vld [vmem:[#allocation14 + $0x250] sm:$0xff]  ;;  %v3185_v49 = vld [vmem:[#allocation14 + $0x2c8] sm:$0xff]  ;;  %v3103_v37 = vld [vmem:[#allocation14 + $0x38] sm:$0xff] }
 0x3c2   :  { %5047 = vmatpush1.bf16.msra.mxu0 %v5046_v56  ;;  %v5062_v53 = vpack.c.bf16 %v3170_v52, %v3162_v24  ;;  %v5032_v19 = vpack.c.bf16 %v3185_v49, %v3177_v21  ;;  %v3176_v56 = vld [vmem:[#allocation14 + $0x280] sm:$0xff]  ;;  %v3111_v39 = vld [vmem:[#allocation14 + $0x78] sm:$0xff] }
 0x3c3   :  { %5049 = vmatprep.subr.bf16.mxu0 %v5048_v63  ;;  %v3193_v63 = vld [vmem:[#allocation14 + $0x308] sm:$0xff]  ;;  %v3587_v21 = vld [vmem:[#allocation13] ss:$0 sm:$0xff] }
 0x3c4   :  { %v5036_v45 = vpack.c.bf16 %v3201_v0, %v3193_v63  ;;  %v3127_v63 = vld [vmem:[#allocation14 + $0xf8] sm:$0xff] }
 0x3c6   :  { %5051 = vmatpush1.bf16.msra.mxu0 %v5050_v38  ;;  %v3192_v38 = vld [vmem:[#allocation14 + $0x300] sm:$0xff] }
 0x3c7   :  { %5053 = vmatprep.subr.bf16.mxu0 %v5052_v13  ;;  %v5070_v13 = vpack.c.bf16 %v3202_v12, %v3194_v11  ;;  %v3133_v11 = vld [vmem:[#allocation14 + $0x128] sm:$0xff] }
 0x3c9   :  { %v5222_v41 = vpop.eup %5221 }
 0x3ca   :  { %v5224_v42 = vpop.eup %5223  ;;  %v2554_v46 = vadd.f32 1.0, %v5222_v41  ;;  %5055 = vmatpush1.bf16.msra.mxu0 %v5054_v16  ;;  %v3161_v41 = vld [vmem:[#allocation14 + $0x208] sm:$0xff] }
 0x3cb   :  { %v2555_v26 = vadd.f32 1.0, %v5224_v42  ;;  %5057 = vmatprep.subr.bf16.mxu0 %v5056_v34  ;;  %v3169_v42 = vld [vmem:[#allocation14 + $0x248] sm:$0xff]  ;;  %v5042_v34 = vpack.c.bf16 %v3216_v36, %v3208_v28 }
 0x3cd   :  { %5225 = vrcp.f32 %v2555_v26  ;;  %v5028_v26 = vpack.c.bf16 %v3169_v42, %v3161_v41  ;;  %v5108_v41 = vpack.c.bf16 %v3111_v39, %v3103_v37 }
 0x3ce   :  { %5227 = vrcp.f32 %v2554_v46  ;;  %v3163_v46 = vld [vmem:[#allocation14 + $0x218] sm:$0xff]  ;;  %5059 = vmatpush1.bf16.msra.mxu0 %v5058_v6  ;;  %v5076_v6 = vpack.c.bf16 %v3109_v33, %v3101_v9  ;;  %v3149_v9 = vld [vmem:[#allocation14 + $0x1a8] sm:$0xff] }
 0x3cf   :  { %v3157_v33 = vld [vmem:[#allocation14 + $0x1e8] sm:$0xff] }
 0x3d7   :  { %v5226_v29 = vpop.eup %5225 }
 0x3d8   :  { %v5228_v47 = vpop.eup %5227  ;;  %3006 = vmatprep.mubr.f32.mxu1 %v5226_v29  ;;  %v3171_v29 = vld [vmem:[#allocation14 + $0x258] sm:$0xff] }
 0x3d9   :  { %3007 = vmatmul.mubr.f32.vlgmr.msra.gmra.mrb[8].mxu1 %v5228_v47  ;;  %v3160_v47 = vld [vmem:[#allocation14 + $0x200] sm:$0xff]  ;;  %v5060_v48 = vpack.c.bf16 %v3171_v29, %v3163_v46 }
 0x3da   :  { %5015 = vmatpush1.bf16.msra.mxu1 %v5014_v54  ;;  %v5030_v51 = vpack.c.bf16 %v3168_v17, %v3160_v47  ;;  %v3179_v54 = vld [vmem:[#allocation14 + $0x298] sm:$0xff]  ;;  %3330 = vmatprep.mubr.f32.mxu1 %v5489_v7 }
 0x3db   :  { %5017 = vmatprep.subr.bf16.mxu1 %v5016_v59  ;;  %5061 = vmatprep.subr.bf16.mxu0 %v5060_v48  ;;  %v5064_v58 = vpack.c.bf16 %v3187_v55, %v3179_v54  ;;  %v5034_v59 = vpack.c.bf16 %v3184_v57, %v3176_v56  ;;  %v3100_v57 = vld [vmem:[#allocation14 + $0x20] sm:$0xff] }
 0x3dc   :  { %5063 = vmatpush1.bf16.msra.mxu0 %v5062_v53 }
 0x3dd   :  { %5065 = vmatprep.subr.bf16.mxu0 %v5064_v58  ;;  %v3108_v58 = vld [vmem:[#allocation14 + $0x60] sm:$0xff] }
 0x3de   :  { %5019 = vmatpush1.bf16.msra.mxu1 %v5018_v40  ;;  %v3203_v40 = vld [vmem:[#allocation14 + $0x358] sm:$0xff]  ;;  %v5078_v0 = vpack.c.bf16 %v3108_v58, %v3100_v57 }
 0x3df   :  { %5021 = vmatprep.subr.bf16.mxu1 %v5020_v10  ;;  %v5068_v8 = vpack.c.bf16 %v3203_v40, %v3195_v3  ;;  %v5038_v10 = vpack.c.bf16 %v3200_v5, %v3192_v38  ;;  %v3124_v40 = vld [vmem:[#allocation14 + $0xe0] sm:$0xff]  ;;  %v3183_v57 = vld [vmem:[#allocation14 + $0x2b8] sm:$0xff] }
 0x3e0   :  { %5067 = vmatpush1.bf16.msra.mxu0 %v5066_v25  ;;  %v3119_v25 = vld [vmem:[#allocation14 + $0xb8] sm:$0xff] }
 0x3e1   :  { %5069 = vmatprep.subr.bf16.mxu0 %v5068_v8  ;;  %v5112_v5 = vpack.c.bf16 %v3127_v63, %v3119_v25  ;;  %v3118_v8 = vld [vmem:[#allocation14 + $0xb0] sm:$0xff]  ;;  %v3191_v58 = vld [vmem:[#allocation14 + $0x2f8] sm:$0xff] }
 0x3e2   :  { %5023 = vmatpush1.bf16.msra.mxu1 %v5022_v14  ;;  %v3217_v14 = vld [vmem:[#allocation14 + $0x3c8] sm:$0xff]  ;;  %v5128_v63 = vpack.c.bf16 %v3191_v58, %v3183_v57 }
 0x3e3   :  { %5025 = vmatprep.subr.bf16.mxu1 %v5024_v30  ;;  %v5040_v16 = vpack.c.bf16 %v3217_v14, %v3209_v50  ;;  %v3210_v30 = vld [vmem:[#allocation14 + $0x390] sm:$0xff]  ;;  %v3141_v50 = vld [vmem:[#allocation14 + $0x168] sm:$0xff]  ;;  %v3143_v14 = vld [vmem:[#allocation14 + $0x178] sm:$0xff] }
 0x3e4   :  { %5071 = vmatpush1.bf16.msra.mxu0 %v5070_v13  ;;  %v3135_v13 = vld [vmem:[#allocation14 + $0x138] sm:$0xff]  ;;  %v5084_v28 = vpack.c.bf16 %v3141_v50, %v3133_v11  ;;  %v3196_v11 = vld [vmem:[#allocation14 + $0x320] sm:$0xff] }
 0x3e5   :  { %5073 = vmatprep.subr.bf16.mxu0 %v5072_v27  ;;  %v3140_v27 = vld [vmem:[#allocation14 + $0x160] sm:$0xff]  ;;  %v5116_v36 = vpack.c.bf16 %v3143_v14, %v3135_v13 }
 0x3e6   :  { %5027 = vmatpush1.bf16.msra.mxu1 %v5026_v35  ;;  %v5074_v35 = vpack.c.bf16 %v3218_v31, %v3210_v30  ;;  %v3134_v30 = vld [vmem:[#allocation14 + $0x130] sm:$0xff]  ;;  %v3204_v50 = vld [vmem:[#allocation14 + $0x360] sm:$0xff] }
 0x3e7   :  { %5029 = vmatprep.subr.bf16.mxu1 %v5028_v26  ;;  %v3142_v31 = vld [vmem:[#allocation14 + $0x170] sm:$0xff] }
 0x3e8   :  { %5075 = vmatpush1.bf16.msra.mxu0 %v5074_v35  ;;  %v3159_v35 = vld [vmem:[#allocation14 + $0x1f8] sm:$0xff]  ;;  %v5118_v39 = vpack.c.bf16 %v3142_v31, %v3134_v30  ;;  %v5102_v30 = vpack.c.bf16 %v3204_v50, %v3196_v11 }
 0x3e9   :  { %5109 = vmatprep.subr.bf16.mxu0 %v5108_v41  ;;  %v3156_v41 = vld [vmem:[#allocation14 + $0x1e0] sm:$0xff] }
 0x3ea   :  { %5031 = vmatpush1.bf16.msra.mxu1 %v5030_v51 }
 0x3eb   :  { %5033 = vmatprep.subr.bf16.mxu1 %v5032_v19 }
 0x3ee   :  { %5035 = vmatpush1.bf16.msra.mxu1 %v5034_v59  ;;  %v3102_v59 = vld [vmem:[#allocation14 + $0x30] sm:$0xff] }
 0x3ef   :  { %5037 = vmatprep.subr.bf16.mxu1 %v5036_v45  ;;  %v5110_v3 = vpack.c.bf16 %v3110_v60, %v3102_v59  ;;  %v3116_v45 = vld [vmem:[#allocation14 + $0xa0] sm:$0xff] }
 0x3f0   :  { %v5082_v15 = vpack.c.bf16 %v3124_v40, %v3116_v45  ;;  %v3197_v45 = vld [vmem:[#allocation14 + $0x328] sm:$0xff] }
 0x3f1   :  { %v3205_v40 = vld [vmem:[#allocation14 + $0x368] sm:$0xff] }
 0x3f2   :  { %5039 = vmatpush1.bf16.msra.mxu1 %v5038_v10  ;;  %v3126_v10 = vld [vmem:[#allocation14 + $0xf0] sm:$0xff]  ;;  %v5100_v13 = vpack.c.bf16 %v3205_v40, %v3197_v45 }
 0x3f3   :  { %5041 = vmatprep.subr.bf16.mxu1 %v5040_v16  ;;  %v5114_v62 = vpack.c.bf16 %v3126_v10, %v3118_v8  ;;  %v3132_v16 = vld [vmem:[#allocation14 + $0x120] sm:$0xff] }
 0x3f4   :  { %v5086_v37 = vpack.c.bf16 %v3140_v27, %v3132_v16  ;;  %v3213_v16 = vld [vmem:[#allocation14 + $0x3a8] sm:$0xff] }
 0x3f5   :  { %v3221_v27 = vld [vmem:[#allocation14 + $0x3e8] sm:$0xff] }
 0x3f6   :  { %5043 = vmatpush1.bf16.msra.mxu1 %v5042_v34  ;;  %v3151_v34 = vld [vmem:[#allocation14 + $0x1b8] sm:$0xff] }
 0x3f7   :  { %5077 = vmatprep.subr.bf16.mxu1 %v5076_v6  ;;  %v3148_v6 = vld [vmem:[#allocation14 + $0x1a0] sm:$0xff] }
 0x46c   :  { %v3691_v42 = vpop.f32.mrb[6].mxu0 }
 0x46d   :  { %v3692_v46 = vpop.f32.mrb[7].mxu0 }
 0x46e   :  { %v3693_v26 = vadd.f32 %v3692_v46, %v3691_v42  ;;  %v5088_v42 = vpack.c.bf16 %v3157_v33, %v3149_v9  ;;  %v5120_v46 = vpack.c.bf16 %v3159_v35, %v3151_v34  ;;  %v3212_v9 = vld [vmem:[#allocation14 + $0x3a0] sm:$0xff]  ;;  %v5104_v33 = vpack.c.bf16 %v3221_v27, %v3213_v16 }
 0x46f   :  { %v3220_v35 = vld [vmem:[#allocation14 + $0x3e0] sm:$0xff] }
 0x470   :  { %v2939_v29 = vadd.f32 %v3693_v26, %v5843_v61  ;;  %v3117_v61 = vld [vmem:[#allocation14 + $0xa8] sm:$0xff]  ;;  %v3150_v26 = vld [vmem:[#allocation14 + $0x1b0] sm:$0xff] }
 0x471   :  { %v5080_v38 = vpack.c.bf16 %v3125_v32, %v3117_v61  ;;  %v3180_v61 = vld [vmem:[#allocation14 + $0x2a0] sm:$0xff] }
 0x472   :  { %v3188_v32 = vld [vmem:[#allocation14 + $0x2e0] sm:$0xff] }
 0x473   :  { %v5098_v8 = vpack.c.bf16 %v3188_v32, %v3180_v61 }
 0x48c   :  { %v3761_v47 = vpop.f32.mrb[8].mxu0 }
 0x48d   :  { %v3762_v17 = vpop.f32.mrb[9].mxu0 }
 0x48e   :  { %v3763_v48 = vadd.f32 %v3762_v17, %v3761_v47  ;;  %v3165_v47 = vld [vmem:[#allocation14 + $0x228] sm:$0xff] }
 0x48f   :  { %v3173_v17 = vld [vmem:[#allocation14 + $0x268] sm:$0xff] }
 0x4ac   :  { %v3726_v51 = vpop.f32.mrb[8].mxu1 }
 0x4ad   :  { %v3727_v24 = vpop.f32.mrb[9].mxu1 }
 0x4ae   :  { %v3728_v52 = vadd.f32 %v3727_v24, %v3726_v51  ;;  %v3175_v51 = vld [vmem:[#allocation14 + $0x278] sm:$0xff]  ;;  %v5090_v24 = vpack.c.bf16 %v3156_v41, %v3148_v6  ;;  %v5106_v6 = vpack.c.bf16 %v3220_v35, %v3212_v9 }
 0x4b0   :  { %v3009_v53 = vadd.f32 %v3728_v52, %v2939_v29  ;;  %v3158_v29 = vld [vmem:[#allocation14 + $0x1f0] sm:$0xff]  ;;  %v3164_v52 = vld [vmem:[#allocation14 + $0x220] sm:$0xff] }
 0x4b2   :  { %v3079_v49 = vadd.f32 %v3763_v48, %v3009_v53  ;;  %v3167_v48 = vld [vmem:[#allocation14 + $0x238] sm:$0xff]  ;;  %v3172_v53 = vld [vmem:[#allocation14 + $0x260] sm:$0xff] }
 0x4b3   :  { %v5094_v59 = vpack.c.bf16 %v3172_v53, %v3164_v52 }
 0x4b4   :  { %v3089_v54 = vadd.f32 %v3587_v21, %v3079_v49  ;;  %v5092_v21 = vpack.c.bf16 %v3173_v17, %v3165_v47  ;;  %v5124_v49 = vpack.c.bf16 %v3175_v51, %v3167_v48 }
 0x4b6   :  { %v3588_v19 = vmul.f32 -1.442695, %v3089_v54  ;;  %v3166_v54 = vld [vmem:[#allocation14 + $0x230] sm:$0xff] }
 0x4b8   :  { %5229 = vpow2.f32 %v3588_v19  ;;  %v3174_v19 = vld [vmem:[#allocation14 + $0x270] sm:$0xff] }
 0x4b9   :  { %v5126_v60 = vpack.c.bf16 %v3174_v19, %v3166_v54 }
 0x4c2   :  { %v5230_v55 = vpop.eup %5229 }
 0x4c3   :  { %v3093_v56 = vadd.f32 1.0, %v5230_v55  ;;  %v3181_v55 = vld [vmem:[#allocation14 + $0x2a8] sm:$0xff] }
 0x4c5   :  { %5231 = vrcp.f32 %v3093_v56  ;;  %v3189_v56 = vld [vmem:[#allocation14 + $0x2e8] sm:$0xff] }
 0x4c6   :  { %v5096_v25 = vpack.c.bf16 %v3189_v56, %v3181_v55 }
 0x4cf   :  { %v5848_v12 = vpop.eup %5231 }
 0x4d0   :  { %3331 = vmatmul.mubr.f32.vlgmr.msra.gmra.mrb[10].mxu1 %v5848_v12  ;;  %3402 = vmatmul.mubr.f32.vlgmr.msra.gmra.mrb[10].mxu0 %v5848_v12 }
 0x4d1   :  { %5079 = vmatpush1.bf16.msra.mxu1 %v5078_v0  ;;  %5111 = vmatpush1.bf16.msra.mxu0 %v5110_v3  ;;  %v3182_v0 = vld [vmem:[#allocation14 + $0x2b0] sm:$0xff] }
 0x4d2   :  { %5081 = vmatprep.subr.bf16.mxu1 %v5080_v38  ;;  %5113 = vmatprep.subr.bf16.mxu0 %v5112_v5  ;;  %v3190_v3 = vld [vmem:[#allocation14 + $0x2f0] sm:$0xff]  ;;  %v3199_v38 = vld [vmem:[#allocation14 + $0x338] sm:$0xff] }
 0x4d3   :  { %3472 = vmatprep.mubr.f32.mxu1 %v5489_v7  ;;  %3543 = vmatprep.mubr.f32.mxu0 %v5489_v7  ;;  %v5122_v7 = vpack.c.bf16 %v3158_v29, %v3150_v26  ;;  %v3207_v5 = vld [vmem:[#allocation14 + $0x378] sm:$0xff]  ;;  %v5130_v10 = vpack.c.bf16 %v3190_v3, %v3182_v0 }
 0x4d4   :  { %v5132_v14 = vpack.c.bf16 %v3207_v5, %v3199_v38 }
 0x4d5   :  { %5083 = vmatpush1.bf16.msra.mxu1 %v5082_v15  ;;  %5115 = vmatpush1.bf16.msra.mxu0 %v5114_v62  ;;  %v3198_v15 = vld [vmem:[#allocation14 + $0x330] sm:$0xff] }
 0x4d6   :  { %5085 = vmatprep.subr.bf16.mxu1 %v5084_v28  ;;  %5117 = vmatprep.subr.bf16.mxu0 %v5116_v36  ;;  %v3206_v62 = vld [vmem:[#allocation14 + $0x370] sm:$0xff]  ;;  %v3215_v28 = vld [vmem:[#allocation14 + $0x3b8] sm:$0xff] }
 0x4d7   :  { %v3223_v36 = vld [vmem:[#allocation14 + $0x3f8] sm:$0xff]  ;;  %v5134_v31 = vpack.c.bf16 %v3206_v62, %v3198_v15 }
 0x4d8   :  { %v5136_v34 = vpack.c.bf16 %v3223_v36, %v3215_v28 }
 0x4d9   :  { %5087 = vmatpush1.bf16.msra.mxu1 %v5086_v37  ;;  %5119 = vmatpush1.bf16.msra.mxu0 %v5118_v39  ;;  %v3214_v37 = vld [vmem:[#allocation14 + $0x3b0] sm:$0xff] }
 0x4da   :  { %5089 = vmatprep.subr.bf16.mxu1 %v5088_v42  ;;  %5121 = vmatprep.subr.bf16.mxu0 %v5120_v46  ;;  %v3222_v39 = vld [vmem:[#allocation14 + $0x3f0] sm:$0xff]  ;;  %v3224_v42 = vld [vmem:[#allocation16] sm:$0xff] }
 0x4db   :  { %v5138_v41 = vpack.c.bf16 %v3222_v39, %v3214_v37  ;;  %v3229_v46 = vrot.slane %v3224_v42, %v5796_v20  ;;  %v3237_v26 = vrot.slane %v3224_v42, %v1358_v4  ;;  %v3233_v29 = vrot.slane %v3224_v42, %v5791_v43 }
 0x4dc   :  { %v3241_v47 = vrot.slane %v3224_v42, %v1362_v44  ;;  %v3245_v20 = vrot.slane %v3224_v42, %v1366_v1  ;;  %v3253_v43 = vrot.slane %v3224_v42, %v1374_v18  ;;  %v3249_v44 = vrot.slane %v3224_v42, %v1370_v2 }
 0x4dd   :  { %5091 = vmatpush1.bf16.msra.mxu1 %v5090_v24  ;;  %5123 = vmatpush1.bf16.msra.mxu0 %v5122_v7  ;;  %v3257_v4 = vrot.slane %v3224_v42, %v1378_v22 }
 0x4de   :  { %5093 = vmatprep.subr.bf16.mxu1 %v5092_v21  ;;  %5125 = vmatprep.subr.bf16.mxu0 %v5124_v49 }
 0x4e1   :  { %5095 = vmatpush1.bf16.msra.mxu1 %v5094_v59  ;;  %5127 = vmatpush1.bf16.msra.mxu0 %v5126_v60 }
 0x4e2   :  { %5097 = vmatprep.subr.bf16.mxu1 %v5096_v25  ;;  %5129 = vmatprep.subr.bf16.mxu0 %v5128_v63 }
 0x4e5   :  { %5099 = vmatpush1.bf16.msra.mxu1 %v5098_v8  ;;  %5131 = vmatpush1.bf16.msra.mxu0 %v5130_v10 }
 0x4e6   :  { %5101 = vmatprep.subr.bf16.mxu1 %v5100_v13  ;;  %5133 = vmatprep.subr.bf16.mxu0 %v5132_v14 }
 0x4e9   :  { %5103 = vmatpush1.bf16.msra.mxu1 %v5102_v30  ;;  %5135 = vmatpush1.bf16.msra.mxu0 %v5134_v31 }
 0x4ea   :  { %5105 = vmatprep.subr.bf16.mxu1 %v5104_v33  ;;  %5137 = vmatprep.subr.bf16.mxu0 %v5136_v34 }
 0x4ed   :  { %5107 = vmatpush1.bf16.msra.mxu1 %v5106_v6  ;;  %5139 = vmatpush1.bf16.msra.mxu0 %v5138_v41 }
 0x4f0   :  { %3473 = vmatmul.mubr.f32.vlgmr.msra.gmra.mrb[12].mxu1 %v5848_v12  ;;  %3544 = vmatmul.mubr.f32.vlgmr.msra.gmra.mrb[12].mxu0 %v5848_v12 }
 0x5a3   :  { %v3332_v17 = vpop.f32.mrb[10].mxu1  ;;  %v3403_v48 = vpop.f32.mrb[10].mxu0 }
 0x5a4   :  { %v3333_v51 = vadd.f32 %v3332_v17, %v3229_v46  ;;  %v3404_v24 = vadd.f32 %v3403_v48, %v3237_v26  ;;  %v3334_v7 = vpop.f32.mrb[11].mxu1  ;;  %v3405_v52 = vpop.f32.mrb[11].mxu0 }
 0x5a5   :  { %v3335_v53 = vadd.f32 %v3334_v7, %v3233_v29  ;;  %v3406_v21 = vadd.f32 %v3405_v52, %v3241_v47 }
 0x5a6   :  { %3550 = vst [vmem:[#allocation17] sm:$0xff] %v3333_v51  ;;  %3552 = vst [vmem:[#allocation17 + $0x10] sm:$0xff] %v3404_v24 }
 0x5a7   :  { %3551 = vst [vmem:[#allocation17 + $0x8] sm:$0xff] %v3335_v53  ;;  %3553 = vst [vmem:[#allocation17 + $0x18] sm:$0xff] %v3406_v21 }
 0x5c3   :  { %v3474_v12 = vpop.f32.mrb[12].mxu1  ;;  %v3545_v49 = vpop.f32.mrb[12].mxu0 }
 0x5c4   :  { %v3475_v54 = vadd.f32 %v3474_v12, %v3245_v20  ;;  %v3546_v19 = vadd.f32 %v3545_v49, %v3253_v43  ;;  %v3476_v55 = vpop.f32.mrb[13].mxu1  ;;  %v3547_v56 = vpop.f32.mrb[13].mxu0 }
 0x5c5   :  { %v3477_v57 = vadd.f32 %v3476_v55, %v3249_v44  ;;  %v3548_v58 = vadd.f32 %v3547_v56, %v3257_v4 }
 0x5c6   :  { %3554 = vst [vmem:[#allocation17 + $0x20] sm:$0xff] %v3475_v54  ;;  %3556 = vst [vmem:[#allocation17 + $0x30] sm:$0xff] %v3546_v19 }
 0x5c7   :  { %3555 = vst [vmem:[#allocation17 + $0x28] sm:$0xff] %v3477_v57  ;;  %3557 = vst [vmem:[#allocation17 + $0x38] sm:$0xff] %v3548_v58 }
 0x5c8   :  { %5451 = shalt.err (!%p5448_p6)
}
 0x5c9   :  { %s5452_s14 = scalar_lea.hbm %s5893_s11, 1024 }
 0x5ca   :  { %p5453_p7 = scmp.ne.s32.totalorder %s5893_s11, %s5452_s14  ;;  %p5456_p8 = scmp.lt.u32.totalorder %s5452_s14, %s5893_s11 }
 0x5cc   :  { %p5458_p9 = pnand %p5456_p8, %p5453_p7 }
 0x5ce   :  { %5461 = shalt.err (!%p5458_p9)
}
 0x5cf   :  { %3567 = dma.vmem_to_hbm [thread:$0]  %s3565_s30, 1024, %s5893_s11, [#allocation4]  }
 0x5d0   :  { %5472 = dma.done.wait [#allocation4], 1024  }
 0x5d1   :  { %5473 = vsyncadd [#allocation4], 4294966272 }
 0x5d2   :  { %3571 = vsyncpa [#allocation3], 1 }
 0x5d3   :  { %3572 = vsyncpa [#allocation6], 1 }
 0x5d4   :  { %3573 = vsyncpa [#allocation9], 1 }
 0x5d5   :  { %3574 = vsyncpa [#allocation12], 1 }
 0x5d6   :  { %3575 = vsyncpa [#allocation15], 1 }
 0x5d7   :  { %3576 = vsyncpa [#allocation4], 1 }

</bundles_post_ra>
